<compile_context>
chip_gen: v5e
topology: v5e:2x2
jax: 0.10.0
libtpu: 0.0.40
codegen_flags: <defaults>
</compile_context>

<pallas_src>
import jax
import jax.numpy as jnp
from jax import lax
from jax.experimental import pallas as pl
from jax.experimental.pallas import tpu as pltpu

# ---- config (mirrors siamese_cnn_config) ------------------------------------
EMB_DIM = 300
KERNEL_SIZES = (2, 3, 5)
KERNEL_NUM = 64
POLARITIES_DIM = 3
FEAT_DIM = len(KERNEL_SIZES) * KERNEL_NUM * 2    # 3 * 64 * 2 = 384

C_PAD = 256      # per-sentence channel width: [K5 | K3 | K2 | pad] (64 each)
P_PAD = 128      # logits padded to a lane-dense store; sliced in the wrapper
NEG_INF = -1e30


def siamese_cnn_kernel(x_ref, w01_ref, w2_ref, w34_ref, bc_ref, neg_ref,
                       wd_ref, bd_ref, out_ref):
    """One batch tile per grid step.

    x_ref   : (2, BT, Lp, E)  both sentences of the tile (bf16)
    w01_ref : (2, E, 256)     conv taps 0,1, channels [K5|K3|K2|pad] (bf16)
    w2_ref  : (E, 128)        conv tap 2, channels [K5|K3] (bf16)
    w34_ref : (E, 128)        conv taps 3,4 merged, channels [K5t3|K5t4] (bf16)
    bc_ref  : (1, 256)        conv bias, same channel order (f32)
    neg_ref : (Lp, 256)       precomputed -1e30 validity mask (f32)
    wd_ref  : (4, 128, 128)   dense weight stack [s1_lo, s1_hi, s2_lo, s2_hi]
    bd_ref  : (1, 128)        dense bias (f32)
    out_ref : (BT, 128)       padded logits
    """
    two, BT, Lp, E = x_ref.shape
    M = two * BT * Lp

    # (2, BT, Lp, E) -> (M, E): free merge of leading dims (Lp % 8 == 0).
    x = x_ref[...].reshape(M, E)

    # ---- conv taps: channel-narrowed matmuls --------------------------------
    # Taps 0 and 1 carry all three filters -> full 256-wide matmuls.
    y0 = jnp.dot(x, w01_ref[0], preferred_element_type=jnp.float32)     # (M,256)
    acc_lo = y0[:, :128]             # [K5 | K3]
    acc_hi = y0[:, 128:]             # [K2 | pad]

    y1 = jnp.dot(x, w01_ref[1], preferred_element_type=jnp.float32)
    r1 = pltpu.roll(y1, M - 1, axis=0)
    acc_lo = acc_lo + r1[:, :128]
    acc_hi = acc_hi + r1[:, 128:]

    # Tap 2 only exists for K=3 and K=5 -> 128-wide matmul and roll.
    y2 = jnp.dot(x, w2_ref[...], preferred_element_type=jnp.float32)    # (M,128)
    acc_lo = acc_lo + pltpu.roll(y2, M - 2, axis=0)

    # Taps 3 and 4 only exist for K=5 -> ONE merged 128-wide matmul.
    # After the roll by 3, the tap-4 half needs one extra sublane shift plus a
    # lane rotate back into the K5 lane block; the K3 lanes are masked out.
    y34 = jnp.dot(x, w34_ref[...], preferred_element_type=jnp.float32)  # (M,128)
    r3 = pltpu.roll(y34, M - 3, axis=0)
    r4 = pltpu.roll(pltpu.roll(r3, M - 1, axis=0), 64, axis=1)
    lane = lax.broadcasted_iota(jnp.int32, (M, 128), 1)
    acc_lo = acc_lo + jnp.where(lane < 64, r3 + r4, 0.0)

    # ---- masked global max-pool over time -----------------------------------
    # Roll wrap / cross-example bleed only lands at masked positions
    # (t >= L - K + 1); requires one static L for the whole batch.
    neg = neg_ref[...]
    conv_lo = acc_lo.reshape(two * BT, Lp, 128) + neg[None, :, :128]
    conv_hi = acc_hi.reshape(two * BT, Lp, 128) + neg[None, :, 128:]
    # bias is per-channel constant -> adding after the max is equivalent
    pooled_lo = jnp.max(conv_lo, axis=1) + bc_ref[:, :128]      # (2BT, 128)
    pooled_hi = jnp.max(conv_hi, axis=1) + bc_ref[:, 128:]

    # ---- dense: per-sentence / per-half weight stack (no lane concat) -------
    logits = (jnp.dot(pooled_lo[:BT], wd_ref[0], preferred_element_type=jnp.float32)
              + jnp.dot(pooled_hi[:BT], wd_ref[1], preferred_element_type=jnp.float32)
              + jnp.dot(pooled_lo[BT:], wd_ref[2], preferred_element_type=jnp.float32)
              + jnp.dot(pooled_hi[BT:], wd_ref[3], preferred_element_type=jnp.float32)
              + bd_ref[...])
    out_ref[...] = logits.astype(out_ref.dtype)


def siamese_cnn_forward(sen1_emb, sen2_emb, conv_ws, conv_bs, dense_w, dense_b,
                        *, block_batch=128):
    """Pallas wrapper. sen{1,2}_emb: (B, L, E) f32; conv_ws[i]: (K_i, E, 64)."""
    assert KERNEL_SIZES == (2, 3, 5), "tap fusion is specialized to K=(2,3,5)"
    B, L, E = sen1_emb.shape
    P = dense_w.shape[1]
    C = KERNEL_NUM
    assert E == EMB_DIM
    assert L >= max(KERNEL_SIZES), "sequence must cover the widest filter"

    L_pad = pl.cdiv(L, 8) * 8

    # --- batch tile: VMEM-aware (v7x has 64 MiB) + grid >= 2 when possible ---
    BT = min(block_batch, max(8, (4096 // (2 * L_pad)) // 8 * 8))  # M ~ 4K rows
    BT = min(BT, ((B + 7) // 8) * 8)                                # don't exceed batch
    if B > 8:
        BT = min(BT, max(8, ((pl.cdiv(B, 2) + 7) // 8) * 8))        # >=2 grid steps
    BT = max(8, BT)
    B_pad = pl.cdiv(B, BT) * BT

    def pad_act(a):
        a = jnp.pad(a, ((0, B_pad - B), (0, L_pad - L), (0, 0)))
        return a.astype(jnp.bfloat16)            # halve HBM->VMEM traffic

    # Stack the two sentences in the wrapper (no in-kernel concatenate).
    x = jnp.stack([pad_act(sen1_emb), pad_act(sen2_emb)], axis=0)   # (2,B_pad,Lp,E)

    # --- conv weights, channel order [K5 | K3 | K2 | pad] --------------------
    w2k, w3k, w5k = conv_ws            # (2,E,64), (3,E,64), (5,E,64)
    b2, b3, b5 = conv_bs

    w01 = jnp.zeros((2, E, C_PAD), jnp.float32)
    w01 = w01.at[:, :, 0:64].set(w5k[:2])
    w01 = w01.at[:, :, 64:128].set(w3k[:2])
    w01 = w01.at[:, :, 128:192].set(w2k[:2])
    w01 = w01.astype(jnp.bfloat16)

    w2 = jnp.zeros((E, 128), jnp.float32)
    w2 = w2.at[:, 0:64].set(w5k[2]).at[:, 64:128].set(w3k[2]).astype(jnp.bfloat16)

    w34 = jnp.zeros((E, 128), jnp.float32)
    w34 = w34.at[:, 0:64].set(w5k[3]).at[:, 64:128].set(w5k[4]).astype(jnp.bfloat16)

    bc = jnp.zeros((1, C_PAD), jnp.float32)
    bc = bc.at[:, 0:64].set(b5.reshape(1, C))
    bc = bc.at[:, 64:128].set(b3.reshape(1, C))
    bc = bc.at[:, 128:192].set(b2.reshape(1, C))

    # --- precomputed validity mask (grid-invariant) ---------------------------
    t_idx = jnp.arange(L_pad, dtype=jnp.int32)[:, None]
    valid = jnp.concatenate([
        jnp.full((64,), L - 5 + 1, jnp.int32),   # K5 block
        jnp.full((64,), L - 3 + 1, jnp.int32),   # K3 block
        jnp.full((64,), L - 2 + 1, jnp.int32),   # K2 block
        jnp.full((64,), L, jnp.int32),           # pad block (pooled value = 0)
    ])[None, :]
    neg = jnp.where(t_idx < valid, 0.0, NEG_INF).astype(jnp.float32)   # (Lp, 256)

    # --- dense layer: rows reordered to [K5,K3,K2,pad] per sentence, split ----
    def reorder_half(w_half):                       # (192,P), rows in [K2,K3,K5]
        out = jnp.zeros((C_PAD, P_PAD), jnp.float32)
        out = out.at[0:64, :P].set(w_half[128:192])     # K5
        out = out.at[64:128, :P].set(w_half[64:128])    # K3
        out = out.at[128:192, :P].set(w_half[0:64])     # K2
        return out
    half = len(KERNEL_SIZES) * C                    # 192
    wd1 = reorder_half(dense_w[:half])
    wd2 = reorder_half(dense_w[half:])
    wd = jnp.stack([wd1[:128], wd1[128:], wd2[:128], wd2[128:]], axis=0)  # (4,128,128)
    bd = jnp.zeros((1, P_PAD), jnp.float32).at[:, :P].set(dense_b.reshape(1, P))

    # --- explicit scoped-VMEM budget (v5e default 16 MiB is too small) -------
    m_rows = 2 * BT * L_pad
    bytes_in = 2 * m_rows * E * 2                                     # dbl-buffered bf16 tile
    bytes_wgt = 2 * ((2 * C_PAD + 128 + 128) * E * 2 + 4 * 128 * 128 * 4
                     + (C_PAD + P_PAD + L_pad * C_PAD) * 4)
    bytes_out = 2 * BT * P_PAD * 4
    bytes_tmp = m_rows * (E * 2 + 2 * C_PAD * 4 + 6 * 128 * 4)        # x + y0/y1 + acc/rolls
    vmem_limit = int(min(max((bytes_in + bytes_wgt + bytes_out + bytes_tmp) * 3 // 2,
                             32 * 2 ** 20), 96 * 2 ** 20))

    out = pl.pallas_call(
        siamese_cnn_kernel,
        out_shape=jax.ShapeDtypeStruct((B_pad, P_PAD), jnp.float32),
        grid=(B_pad // BT,),
        in_specs=[
            pl.BlockSpec((2, BT, L_pad, E), lambda b: (0, b, 0, 0)),
            pl.BlockSpec((2, E, C_PAD), lambda b: (0, 0, 0)),
            pl.BlockSpec((E, 128), lambda b: (0, 0)),
            pl.BlockSpec((E, 128), lambda b: (0, 0)),
            pl.BlockSpec((1, C_PAD), lambda b: (0, 0)),
            pl.BlockSpec((L_pad, C_PAD), lambda b: (0, 0)),
            pl.BlockSpec((4, 128, 128), lambda b: (0, 0, 0)),
            pl.BlockSpec((1, P_PAD), lambda b: (0, 0)),
        ],
        out_specs=pl.BlockSpec((BT, P_PAD), lambda b: (b, 0)),
        compiler_params=pltpu.CompilerParams(
            dimension_semantics=("parallel",),
            vmem_limit_bytes=vmem_limit),
    )(x, w01, w2, w34, bc, neg, wd, bd)

    return out[:B, :P]


def reference_forward(sen1_emb, sen2_emb, conv_ws, conv_bs, dense_w, dense_b):
    """Pure-JAX f32 reference (different code path) for correctness check."""
    def sentence_feats(xx):
        outs = []
        for w, bias in zip(conv_ws, conv_bs):
            K = w.shape[0]
            L = xx.shape[1]
            L_out = L - K + 1
            windows = jnp.stack([xx[:, k:k + L_out, :] for k in range(K)],
                                axis=2)                      # (B, L_out, K, E)
            conv = jnp.einsum('btke,kec->btc', windows, w) + bias
            outs.append(jnp.max(conv, axis=1))               # (B, C)
        return jnp.concatenate(outs, axis=1)

    feats = jnp.concatenate(
        [sentence_feats(sen1_emb), sentence_feats(sen2_emb)], axis=-1)
    return feats @ dense_w + dense_b


if __name__ == "__main__":
    B, L, VOCAB = 16, 16, 50

    key = jax.random.PRNGKey(0)
    k_emb, k_id1, k_id2, k_w, k_b, k_dw, k_db = jax.random.split(key, 7)

    # Frozen embedding table + integer token ids.
    emb_table = jax.random.normal(k_emb, (VOCAB, EMB_DIM), jnp.float32) * 0.1
    sen1_ids = jax.random.randint(k_id1, (B, L), 0, VOCAB)
    sen2_ids = jax.random.randint(k_id2, (B, L), 0, VOCAB)

    # Conv1d weights: PyTorch shape (C, E, K) -> our layout (K, E, C).
    conv_ws, conv_bs = [], []
    for i, K in enumerate(KERNEL_SIZES):
        kw = jax.random.fold_in(k_w, i)
        kb = jax.random.fold_in(k_b, i)
        w_cek = jax.random.normal(kw, (KERNEL_NUM, EMB_DIM, K), jnp.float32) * 0.05
        conv_ws.append(jnp.transpose(w_cek, (2, 1, 0)))          # (K, E, C)
        conv_bs.append(jax.random.normal(kb, (1, KERNEL_NUM), jnp.float32) * 0.05)

    # Dense: PyTorch Linear(FEAT_DIM -> P); stored as (FEAT_DIM, P).
    dense_w = jax.random.normal(k_dw, (FEAT_DIM, POLARITIES_DIM), jnp.float32) * 0.05
    dense_b = jax.random.normal(k_db, (1, POLARITIES_DIM), jnp.float32) * 0.05

    # Embedding lookup (glue; gather in plain JAX, embedding is frozen).
    # TODO(synk): embedding gather stays outside the kernel (frozen table).
    sen1_emb = jnp.take(emb_table, sen1_ids, axis=0)  # (B, L, E)
    sen2_emb = jnp.take(emb_table, sen2_ids, axis=0)

    logits = siamese_cnn_forward(sen1_emb, sen2_emb, conv_ws, conv_bs,
                                 dense_w, dense_b)
    logits = jax.block_until_ready(logits)

    ref = reference_forward(sen1_emb, sen2_emb, conv_ws, conv_bs,
                            dense_w, dense_b)
    assert logits.shape == (B, POLARITIES_DIM)
    # The kernel runs the conv path in bf16 (f32 accumulation); tolerance
    # covers the bf16 input quantization (~0.4% relative).
    assert jnp.allclose(logits, ref, atol=2e-2, rtol=2e-2), (logits, ref)

    print("KERNEL_OK")
</pallas_src>

<mosaic_0001>
module attributes {stable_mosaic.version = 11 : i64} {
  func.func @siamese_cnn_kernel(%arg0: i32, %arg1: memref<2x8x16x300xbf16, #tpu.memory_space<vmem>>, %arg2: memref<2x300x256xbf16, #tpu.memory_space<vmem>>, %arg3: memref<300x128xbf16, #tpu.memory_space<vmem>>, %arg4: memref<300x128xbf16, #tpu.memory_space<vmem>>, %arg5: memref<1x256xf32, #tpu.memory_space<vmem>>, %arg6: memref<16x256xf32, #tpu.memory_space<vmem>>, %arg7: memref<4x128x128xf32, #tpu.memory_space<vmem>>, %arg8: memref<1x128xf32, #tpu.memory_space<vmem>>, %arg9: memref<8x128xf32, #tpu.memory_space<vmem>>) attributes {dimension_semantics = [#tpu.dimension_semantics<parallel>], iteration_bounds = array<i64: 2>, scalar_prefetch = 0 : i64, scratch_operands = 0 : i64, tpu.core_type = #tpu.core_type<tc>, window_params = [{transform_indices = @transform_0, window_bounds = array<i64: 2, 8, 16, 300>}, {pipeline_mode = #tpu.pipeline_mode<synchronous>, transform_indices = @transform_1, window_bounds = array<i64: 2, 300, 256>}, {pipeline_mode = #tpu.pipeline_mode<synchronous>, transform_indices = @transform_2, window_bounds = array<i64: 300, 128>}, {pipeline_mode = #tpu.pipeline_mode<synchronous>, transform_indices = @transform_3, window_bounds = array<i64: 300, 128>}, {pipeline_mode = #tpu.pipeline_mode<synchronous>, transform_indices = @transform_4, window_bounds = array<i64: 1, 256>}, {pipeline_mode = #tpu.pipeline_mode<synchronous>, transform_indices = @transform_5, window_bounds = array<i64: 16, 256>}, {pipeline_mode = #tpu.pipeline_mode<synchronous>, transform_indices = @transform_6, window_bounds = array<i64: 4, 128, 128>}, {pipeline_mode = #tpu.pipeline_mode<synchronous>, transform_indices = @transform_7, window_bounds = array<i64: 1, 128>}, {transform_indices = @transform_8, window_bounds = array<i64: 8, 128>}]} {
    %c0 = arith.constant 0 : index
    %c0_0 = arith.constant 0 : index
    %c0_1 = arith.constant 0 : index
    %c0_2 = arith.constant 0 : index
    %0 = vector.load %arg1[%c0, %c0_0, %c0_1, %c0_2] : memref<2x8x16x300xbf16, #tpu.memory_space<vmem>>, vector<2x8x16x300xbf16>
    %1 = vector.shape_cast %0 : vector<2x8x16x300xbf16> to vector<256x300xbf16>
    %c0_3 = arith.constant 0 : index
    %c0_4 = arith.constant 0 : index
    %c0_5 = arith.constant 0 : index
    %2 = vector.load %arg2[%c0_3, %c0_4, %c0_5] : memref<2x300x256xbf16, #tpu.memory_space<vmem>>, vector<1x300x256xbf16>
    %3 = vector.shape_cast %2 : vector<1x300x256xbf16> to vector<300x256xbf16>
    %cst = arith.constant dense<0.000000e+00> : vector<256x256xf32>
    %4 = tpu.matmul %1, %3, %cst {dimension_numbers = #tpu.dot_dimension_numbers<[1], [0], [0], [1], [0, 0, 1, 1], [], []>} : vector<256x300xbf16>, vector<300x256xbf16>, vector<256x256xf32> -> vector<256x256xf32>
    %5 = vector.extract_strided_slice %4 {offsets = [0, 0], sizes = [256, 128], strides = [1, 1]} : vector<256x256xf32> to vector<256x128xf32>
    %6 = vector.extract_strided_slice %4 {offsets = [0, 128], sizes = [256, 128], strides = [1, 1]} : vector<256x256xf32> to vector<256x128xf32>
    %c1 = arith.constant 1 : index
    %c0_6 = arith.constant 0 : index
    %c0_7 = arith.constant 0 : index
    %7 = vector.load %arg2[%c1, %c0_6, %c0_7] : memref<2x300x256xbf16, #tpu.memory_space<vmem>>, vector<1x300x256xbf16>
    %8 = vector.shape_cast %7 : vector<1x300x256xbf16> to vector<300x256xbf16>
    %cst_8 = arith.constant dense<0.000000e+00> : vector<256x256xf32>
    %9 = tpu.matmul %1, %8, %cst_8 {dimension_numbers = #tpu.dot_dimension_numbers<[1], [0], [0], [1], [0, 0, 1, 1], [], []>} : vector<256x300xbf16>, vector<300x256xbf16>, vector<256x256xf32> -> vector<256x256xf32>
    %c255_i32 = arith.constant 255 : i32
    %10 = tpu.dynamic_rotate %9 by %c255_i32 dim 0 : vector<256x256xf32>, i32 -> vector<256x256xf32>
    %11 = vector.extract_strided_slice %10 {offsets = [0, 0], sizes = [256, 128], strides = [1, 1]} : vector<256x256xf32> to vector<256x128xf32>
    %12 = arith.addf %5, %11 : vector<256x128xf32>
    %13 = vector.extract_strided_slice %10 {offsets = [0, 128], sizes = [256, 128], strides = [1, 1]} : vector<256x256xf32> to vector<256x128xf32>
    %14 = arith.addf %6, %13 : vector<256x128xf32>
    %c0_9 = arith.constant 0 : index
    %c0_10 = arith.constant 0 : index
    %15 = vector.load %arg3[%c0_9, %c0_10] : memref<300x128xbf16, #tpu.memory_space<vmem>>, vector<300x128xbf16>
    %cst_11 = arith.constant dense<0.000000e+00> : vector<256x128xf32>
    %16 = tpu.matmul %1, %15, %cst_11 {dimension_numbers = #tpu.dot_dimension_numbers<[1], [0], [0], [1], [0, 0, 1, 1], [], []>} : vector<256x300xbf16>, vector<300x128xbf16>, vector<256x128xf32> -> vector<256x128xf32>
    %c254_i32 = arith.constant 254 : i32
    %17 = tpu.dynamic_rotate %16 by %c254_i32 dim 0 : vector<256x128xf32>, i32 -> vector<256x128xf32>
    %18 = arith.addf %12, %17 : vector<256x128xf32>
    %c0_12 = arith.constant 0 : index
    %c0_13 = arith.constant 0 : index
    %19 = vector.load %arg4[%c0_12, %c0_13] : memref<300x128xbf16, #tpu.memory_space<vmem>>, vector<300x128xbf16>
    %cst_14 = arith.constant dense<0.000000e+00> : vector<256x128xf32>
    %20 = tpu.matmul %1, %19, %cst_14 {dimension_numbers = #tpu.dot_dimension_numbers<[1], [0], [0], [1], [0, 0, 1, 1], [], []>} : vector<256x300xbf16>, vector<300x128xbf16>, vector<256x128xf32> -> vector<256x128xf32>
    %c253_i32 = arith.constant 253 : i32
    %21 = tpu.dynamic_rotate %20 by %c253_i32 dim 0 : vector<256x128xf32>, i32 -> vector<256x128xf32>
    %c255_i32_15 = arith.constant 255 : i32
    %22 = tpu.dynamic_rotate %21 by %c255_i32_15 dim 0 : vector<256x128xf32>, i32 -> vector<256x128xf32>
    %c64_i32 = arith.constant 64 : i32
    %23 = tpu.dynamic_rotate %22 by %c64_i32 dim 1 : vector<256x128xf32>, i32 -> vector<256x128xf32>
    %24 = tpu.iota {dimensions = array<i32: 1>} : vector<256x128xi32>
    %c64_i32_16 = arith.constant 64 : i32
    %25 = vector.broadcast %c64_i32_16 : i32 to vector<256x128xi32>
    %26 = arith.cmpi slt, %24, %25 : vector<256x128xi32>
    %27 = arith.addf %21, %23 : vector<256x128xf32>
    %cst_17 = arith.constant 0.000000e+00 : f32
    %28 = vector.broadcast %cst_17 : f32 to vector<256x128xf32>
    %29 = arith.select %26, %27, %28 : vector<256x128xi1>, vector<256x128xf32>
    %30 = arith.addf %18, %29 : vector<256x128xf32>
    %c0_18 = arith.constant 0 : index
    %c0_19 = arith.constant 0 : index
    %31 = vector.load %arg6[%c0_18, %c0_19] : memref<16x256xf32, #tpu.memory_space<vmem>>, vector<16x256xf32>
    %32 = vector.shape_cast %30 : vector<256x128xf32> to vector<16x16x128xf32>
    %33 = vector.extract_strided_slice %31 {offsets = [0, 0], sizes = [16, 128], strides = [1, 1]} : vector<16x256xf32> to vector<16x128xf32>
    %34 = vector.shape_cast %33 : vector<16x128xf32> to vector<1x16x128xf32>
    %35 = vector.broadcast %34 : vector<1x16x128xf32> to vector<16x16x128xf32>
    %36 = arith.addf %32, %35 : vector<16x16x128xf32>
    %37 = vector.shape_cast %14 : vector<256x128xf32> to vector<16x16x128xf32>
    %38 = vector.extract_strided_slice %31 {offsets = [0, 128], sizes = [16, 128], strides = [1, 1]} : vector<16x256xf32> to vector<16x128xf32>
    %39 = vector.shape_cast %38 : vector<16x128xf32> to vector<1x16x128xf32>
    %40 = vector.broadcast %39 : vector<1x16x128xf32> to vector<16x16x128xf32>
    %41 = arith.addf %37, %40 : vector<16x16x128xf32>
    %cst_20 = arith.constant dense<0xFF800000> : vector<16x128xf32>
    %42 = vector.multi_reduction <maximumf>, %36, %cst_20 [1] : vector<16x16x128xf32> to vector<16x128xf32>
    %c0_21 = arith.constant 0 : index
    %c0_22 = arith.constant 0 : index
    %43 = vector.load %arg5[%c0_21, %c0_22] : memref<1x256xf32, #tpu.memory_space<vmem>>, vector<1x128xf32>
    %44 = vector.broadcast %43 : vector<1x128xf32> to vector<16x128xf32>
    %45 = arith.addf %42, %44 : vector<16x128xf32>
    %cst_23 = arith.constant dense<0xFF800000> : vector<16x128xf32>
    %46 = vector.multi_reduction <maximumf>, %41, %cst_23 [1] : vector<16x16x128xf32> to vector<16x128xf32>
    %c0_24 = arith.constant 0 : index
    %c128 = arith.constant 128 : index
    %47 = vector.load %arg5[%c0_24, %c128] : memref<1x256xf32, #tpu.memory_space<vmem>>, vector<1x128xf32>
    %48 = vector.broadcast %47 : vector<1x128xf32> to vector<16x128xf32>
    %49 = arith.addf %46, %48 : vector<16x128xf32>
    %50 = vector.extract_strided_slice %45 {offsets = [0, 0], sizes = [8, 128], strides = [1, 1]} : vector<16x128xf32> to vector<8x128xf32>
    %c0_25 = arith.constant 0 : index
    %c0_26 = arith.constant 0 : index
    %c0_27 = arith.constant 0 : index
    %51 = vector.load %arg7[%c0_25, %c0_26, %c0_27] : memref<4x128x128xf32, #tpu.memory_space<vmem>>, vector<1x128x128xf32>
    %52 = vector.shape_cast %51 : vector<1x128x128xf32> to vector<128x128xf32>
    %cst_28 = arith.constant dense<0.000000e+00> : vector<8x128xf32>
    %53 = tpu.matmul %50, %52, %cst_28 {dimension_numbers = #tpu.dot_dimension_numbers<[1], [0], [0], [1], [0, 0, 1, 1], [], []>} : vector<8x128xf32>, vector<128x128xf32>, vector<8x128xf32> -> vector<8x128xf32>
    %54 = vector.extract_strided_slice %49 {offsets = [0, 0], sizes = [8, 128], strides = [1, 1]} : vector<16x128xf32> to vector<8x128xf32>
    %c1_29 = arith.constant 1 : index
    %c0_30 = arith.constant 0 : index
    %c0_31 = arith.constant 0 : index
    %55 = vector.load %arg7[%c1_29, %c0_30, %c0_31] : memref<4x128x128xf32, #tpu.memory_space<vmem>>, vector<1x128x128xf32>
    %56 = vector.shape_cast %55 : vector<1x128x128xf32> to vector<128x128xf32>
    %cst_32 = arith.constant dense<0.000000e+00> : vector<8x128xf32>
    %57 = tpu.matmul %54, %56, %cst_32 {dimension_numbers = #tpu.dot_dimension_numbers<[1], [0], [0], [1], [0, 0, 1, 1], [], []>} : vector<8x128xf32>, vector<128x128xf32>, vector<8x128xf32> -> vector<8x128xf32>
    %58 = arith.addf %53, %57 : vector<8x128xf32>
    %59 = vector.extract_strided_slice %45 {offsets = [8, 0], sizes = [8, 128], strides = [1, 1]} : vector<16x128xf32> to vector<8x128xf32>
    %c2 = arith.constant 2 : index
    %c0_33 = arith.constant 0 : index
    %c0_34 = arith.constant 0 : index
    %60 = vector.load %arg7[%c2, %c0_33, %c0_34] : memref<4x128x128xf32, #tpu.memory_space<vmem>>, vector<1x128x128xf32>
    %61 = vector.shape_cast %60 : vector<1x128x128xf32> to vector<128x128xf32>
    %cst_35 = arith.constant dense<0.000000e+00> : vector<8x128xf32>
    %62 = tpu.matmul %59, %61, %cst_35 {dimension_numbers = #tpu.dot_dimension_numbers<[1], [0], [0], [1], [0, 0, 1, 1], [], []>} : vector<8x128xf32>, vector<128x128xf32>, vector<8x128xf32> -> vector<8x128xf32>
    %63 = arith.addf %58, %62 : vector<8x128xf32>
    %64 = vector.extract_strided_slice %49 {offsets = [8, 0], sizes = [8, 128], strides = [1, 1]} : vector<16x128xf32> to vector<8x128xf32>
    %c3 = arith.constant 3 : index
    %c0_36 = arith.constant 0 : index
    %c0_37 = arith.constant 0 : index
    %65 = vector.load %arg7[%c3, %c0_36, %c0_37] : memref<4x128x128xf32, #tpu.memory_space<vmem>>, vector<1x128x128xf32>
    %66 = vector.shape_cast %65 : vector<1x128x128xf32> to vector<128x128xf32>
    %cst_38 = arith.constant dense<0.000000e+00> : vector<8x128xf32>
    %67 = tpu.matmul %64, %66, %cst_38 {dimension_numbers = #tpu.dot_dimension_numbers<[1], [0], [0], [1], [0, 0, 1, 1], [], []>} : vector<8x128xf32>, vector<128x128xf32>, vector<8x128xf32> -> vector<8x128xf32>
    %68 = arith.addf %63, %67 : vector<8x128xf32>
    %c0_39 = arith.constant 0 : index
    %c0_40 = arith.constant 0 : index
    %69 = vector.load %arg8[%c0_39, %c0_40] : memref<1x128xf32, #tpu.memory_space<vmem>>, vector<1x128xf32>
    %70 = vector.broadcast %69 : vector<1x128xf32> to vector<8x128xf32>
    %71 = arith.addf %68, %70 : vector<8x128xf32>
    %c0_41 = arith.constant 0 : index
    %c0_42 = arith.constant 0 : index
    %72 = vector.load %arg9[%c0_41, %c0_42] : memref<8x128xf32, #tpu.memory_space<vmem>>, vector<8x128xf32>
    tpu.vector_store %arg9[%c0_41, %c0_42], %71 {strides = array<i32>} : memref<8x128xf32, #tpu.memory_space<vmem>>, vector<8x128xf32>,
    return
  }
  func.func @transform_0(%arg0: i32) -> (i32, i32, i32, i32) {
    %c0_i32 = arith.constant 0 : i32
    %c0_i32_0 = arith.constant 0 : i32
    %c0_i32_1 = arith.constant 0 : i32
    %c0_i32_2 = arith.constant 0 : i32
    return %c0_i32, %arg0, %c0_i32_0, %c0_i32_1 : i32, i32, i32, i32
  }
  func.func @transform_1(%arg0: i32) -> (i32, i32, i32) {
    %c0_i32 = arith.constant 0 : i32
    %c0_i32_0 = arith.constant 0 : i32
    %c0_i32_1 = arith.constant 0 : i32
    %c0_i32_2 = arith.constant 0 : i32
    return %c0_i32, %c0_i32_0, %c0_i32_1 : i32, i32, i32
  }
  func.func @transform_2(%arg0: i32) -> (i32, i32) {
    %c0_i32 = arith.constant 0 : i32
    %c0_i32_0 = arith.constant 0 : i32
    %c0_i32_1 = arith.constant 0 : i32
    return %c0_i32, %c0_i32_0 : i32, i32
  }
  func.func @transform_3(%arg0: i32) -> (i32, i32) {
    %c0_i32 = arith.constant 0 : i32
    %c0_i32_0 = arith.constant 0 : i32
    %c0_i32_1 = arith.constant 0 : i32
    return %c0_i32, %c0_i32_0 : i32, i32
  }
  func.func @transform_4(%arg0: i32) -> (i32, i32) {
    %c0_i32 = arith.constant 0 : i32
    %c0_i32_0 = arith.constant 0 : i32
    %c0_i32_1 = arith.constant 0 : i32
    return %c0_i32, %c0_i32_0 : i32, i32
  }
  func.func @transform_5(%arg0: i32) -> (i32, i32) {
    %c0_i32 = arith.constant 0 : i32
    %c0_i32_0 = arith.constant 0 : i32
    %c0_i32_1 = arith.constant 0 : i32
    return %c0_i32, %c0_i32_0 : i32, i32
  }
  func.func @transform_6(%arg0: i32) -> (i32, i32, i32) {
    %c0_i32 = arith.constant 0 : i32
    %c0_i32_0 = arith.constant 0 : i32
    %c0_i32_1 = arith.constant 0 : i32
    %c0_i32_2 = arith.constant 0 : i32
    return %c0_i32, %c0_i32_0, %c0_i32_1 : i32, i32, i32
  }
  func.func @transform_7(%arg0: i32) -> (i32, i32) {
    %c0_i32 = arith.constant 0 : i32
    %c0_i32_0 = arith.constant 0 : i32
    %c0_i32_1 = arith.constant 0 : i32
    return %c0_i32, %c0_i32_0 : i32, i32
  }
  func.func @transform_8(%arg0: i32) -> (i32, i32) {
    %c0_i32 = arith.constant 0 : i32
    %c0_i32_0 = arith.constant 0 : i32
    return %arg0, %c0_i32 : i32, i32
  }
}

</mosaic_0001>

<bundles_post_ra>
// kernel: tpu_custom_call.1
= control target key start
LH: loop header
LB: loop body
LE: loop exit
PB: predicated region body
PF: predicated region fallthrough
CT: control target
= control target key end

     0   :  { %13 = vsyncpa [#allocation4], 0  ;;  %s9011_s0 = inlined_call_operand.vmem [shape: bf16[2,16,16,300], index: 0, kind: input, shape index: {}]   ;;  %s9012_s1 = inlined_call_operand.vmem [shape: bf16[2,300,256], index: 1, kind: input, shape index: {}]   ;;  %s9013_s2 = inlined_call_operand.vmem [shape: bf16[300,128], index: 2, kind: input, shape index: {}]   ;;  %s9014_s3 = inlined_call_operand.vmem [shape: bf16[300,128], index: 3, kind: input, shape index: {}]   ;;  %s9015_s4 = inlined_call_operand.vmem [shape: f32[1,256], index: 4, kind: input, shape index: {}]   ;;  %s9016_s5 = inlined_call_operand.vmem [shape: f32[16,256], index: 5, kind: input, shape index: {}]   ;;  %s9017_s6 = inlined_call_operand.hbm [shape: f32[4,128,128], index: 6, kind: input, shape index: {}]   ;;  %s9018_s7 = inlined_call_operand.vmem [shape: f32[1,128], index: 7, kind: input, shape index: {}]   ;;  %s9019_s8 = inlined_call_operand.hbm [shape: f32[16,128], index: 8, kind: output, shape index: {}]  }
   0x1   :  { %14 = vsyncpa [#allocation5], 0 }
   0x2   :  { %16 = vsyncpa [#allocation5 + $0x1], 0  ;;  %s5720_s27 = smov 0   ;;  %s5722_s28 = smov 0  }
   0x3   :  { %s5724_s29 = smov 0   ;;  %s5726_s30 = smov 0  }
   0x4 LB: > { %s5741_s9 = sadd.s32 4294967295, %s5669_s30   ;;  %s4476_s10 = sadd.s32 4294967294, %s5669_s30   ;;  %s5669_s30 = sphi %s5726_s30, %s9609_s30   ;;  %s5665_s29 = sphi %s5724_s29, %s9608_s29   ;;  %s5661_s28 = sphi %s5722_s28, %s9607_s28   ;;  %s5657_s27 = sphi %s5720_s27, %s9606_s27  }
   0x5   : > { %s5745_s11 = sadd.s32 1, %s5669_s30   ;;  %s29_s12 = sadd.s32 1, %s5665_s29 }
   0x6   : > { %s26_s13 = ssub.s32 %s5669_s30, %s5745_s11  ;;  %p36_p0 = scmp.ne.s32.totalorder %s5665_s29, %s5661_s28 }
   0x7   : > { %p27_p1 = scmp.eq.s32.totalorder %s26_s13, 0  ;;  %p37_p2 = scmp.eq.s32.totalorder %s5669_s30, 0 }
   0x8   : > { %p213_p3 = scmp.eq.s32.totalorder %s5741_s9, 1  ;;  %p218_p4 = scmp.ne.s32.totalorder %s5661_s28, %s5657_s27 }
   0x9   : > { %s5757_s14 = scalar_select %p27_p1, %s5665_s29, %s29_s12  }
   0xa   : > { %p5759_p5 = por %p37_p2, %p36_p0  ;;  %p5763_p6 = por %p213_p3, %p36_p0 }
   0xb   : > { %p219_p7 = scmp.eq.s32.totalorder %s4476_s10, 1  ;;  %p4477_p8 = scmp.ge.s32.totalorder %s5669_s30, 1 }
   0xc   : > { %p226_p9 = scmp.lt.s32.totalorder %s5669_s30, 3  ;;  %p5526_p11 = scmp.eq.s32.totalorder %s5741_s9, 0 }
   0xd   : > { %p5769_p10 = por %p219_p7, %p218_p4  ;;  %s252_s21 = sshll.u32 %s9017_s6, 4  ;;  %s253_s21 = int_to_ptr.hbm [resolvable:$true] %s252_s21 }
   0xe   : > { %p5774_p12 = pnand %p4477_p8, %p226_p9  ;;  %s5671_s22 = smov [#allocation3]  }
   0xf   : > { %s254_s23 = sshll.u32 %s5671_s22, 4  ;;  %s5672_s24 = smov 128   ;;  %s255_s23 = int_to_ptr.vmem [resolvable:$true] %s254_s23 }
  0x10   : > { %p5518_p13 = pneg %p5774_p12  ;;  %s5673_s25 = smov 8  }
  0x11   : > { %p4479_p1 = scmp.ge.s32.totalorder %s5669_s30, 2 }
  0x12   : > { %p5519_p0 = pnand %p5526_p11, %p5518_p13 }
  0x13   : > { %267 = sbr.rel (%p4479_p1) target bundleno = 93 (0x5d), region = 44 }
  0x14   : > { %5521 = dma.hbm_to_vmem [thread:$0]  (!%p5519_p0), %s253_s21, 8192, %s255_s23, [#allocation4], %s5672_s24, %s5672_s24, %s5673_s25  }
  0x18   : > { %270 = sbr.rel (!%p5759_p5) target bundleno = 93 (0x5d), region = 48  ;;  %s272_s26 = sand.u32 (%p5759_p5), 1, %s5665_s29  }
  0x19   : > { %s5510_s10 = smul.u32 (%p5759_p5), 192, %s5669_s30 }
  0x1a   : > { %s5509_s12 = smul.u32 (%p5759_p5), 384, %s272_s26 }
  0x1b   : > { %s5795_s20 = scalar_lea.vmem (%p5759_p5), %s9011_s0, %s5510_s10 }
  0x1c   : > { %v293_v0 = vld [vmem:[%s5795_s20] sm:$0xff] (%p5759_p5)  ;;  %v295_v1 = vld [vmem:[%s5795_s20 + $0xc] sm:$0xff] (%p5759_p5)  ;;  %v297_v2 = vld [vmem:[%s5795_s20 + $0x18] sm:$0xff] (%p5759_p5)  ;;  %s5800_s15 = scalar_lea.vmem (%p5759_p5), [#allocation2], %s5509_s12 }
  0x1d   : > { %294 = vst [vmem:[%s5800_s15] sm:$0xff] %v293_v0  ;;  %v299_v3 = vld [vmem:[%s5795_s20 + $0x24] sm:$0xff]  ;;  %v301_v4 = vld [vmem:[%s5795_s20 + $0x30] sm:$0xff]  ;;  %v303_v5 = vld [vmem:[%s5795_s20 + $0x3c] sm:$0xff] }
  0x1e   : > { %296 = vst [vmem:[%s5800_s15 + $0xc] sm:$0xff] %v295_v1  ;;  %v305_v6 = vld [vmem:[%s5795_s20 + $0x48] sm:$0xff]  ;;  %v307_v7 = vld [vmem:[%s5795_s20 + $0x54] sm:$0xff]  ;;  %v309_v8 = vld [vmem:[%s5795_s20 + $0x60] sm:$0xff] }
  0x1f   : > { %298 = vst [vmem:[%s5800_s15 + $0x18] sm:$0xff] %v297_v2  ;;  %v311_v9 = vld [vmem:[%s5795_s20 + $0x6c] sm:$0xff]  ;;  %v313_v10 = vld [vmem:[%s5795_s20 + $0x78] sm:$0xff]  ;;  %v315_v11 = vld [vmem:[%s5795_s20 + $0x84] sm:$0xff] }
  0x20   : > { %300 = vst [vmem:[%s5800_s15 + $0x24] sm:$0xff] %v299_v3  ;;  %v317_v12 = vld [vmem:[%s5795_s20 + $0x90] sm:$0xff]  ;;  %v319_v13 = vld [vmem:[%s5795_s20 + $0x9c] sm:$0xff]  ;;  %v321_v14 = vld [vmem:[%s5795_s20 + $0xa8] sm:$0xff] }
  0x21   : > { %302 = vst [vmem:[%s5800_s15 + $0x30] sm:$0xff] %v301_v4  ;;  %v323_v15 = vld [vmem:[%s5795_s20 + $0xb4] sm:$0xff]  ;;  %v325_v16 = vld [vmem:[%s5795_s20 + $0x180] sm:$0xff]  ;;  %v327_v17 = vld [vmem:[%s5795_s20 + $0x18c] sm:$0xff] }
  0x22   : > { %304 = vst [vmem:[%s5800_s15 + $0x3c] sm:$0xff] %v303_v5  ;;  %v329_v18 = vld [vmem:[%s5795_s20 + $0x198] sm:$0xff]  ;;  %v331_v19 = vld [vmem:[%s5795_s20 + $0x1a4] sm:$0xff]  ;;  %v333_v20 = vld [vmem:[%s5795_s20 + $0x1b0] sm:$0xff] }
  0x23   : > { %306 = vst [vmem:[%s5800_s15 + $0x48] sm:$0xff] %v305_v6  ;;  %v335_v21 = vld [vmem:[%s5795_s20 + $0x1bc] sm:$0xff]  ;;  %v337_v22 = vld [vmem:[%s5795_s20 + $0x1c8] sm:$0xff]  ;;  %v339_v23 = vld [vmem:[%s5795_s20 + $0x1d4] sm:$0xff] }
  0x24   : > { %308 = vst [vmem:[%s5800_s15 + $0x54] sm:$0xff] %v307_v7  ;;  %v341_v24 = vld [vmem:[%s5795_s20 + $0x1e0] sm:$0xff]  ;;  %v343_v25 = vld [vmem:[%s5795_s20 + $0x1ec] sm:$0xff]  ;;  %v345_v26 = vld [vmem:[%s5795_s20 + $0x1f8] sm:$0xff] }
  0x25   : > { %310 = vst [vmem:[%s5800_s15 + $0x60] sm:$0xff] %v309_v8  ;;  %v347_v27 = vld [vmem:[%s5795_s20 + $0x204] sm:$0xff]  ;;  %v349_v28 = vld [vmem:[%s5795_s20 + $0x210] sm:$0xff]  ;;  %v351_v29 = vld [vmem:[%s5795_s20 + $0x21c] sm:$0xff] }
  0x26   : > { %312 = vst [vmem:[%s5800_s15 + $0x6c] sm:$0xff] %v311_v9  ;;  %v353_v30 = vld [vmem:[%s5795_s20 + $0x228] sm:$0xff]  ;;  %v355_v31 = vld [vmem:[%s5795_s20 + $0x234] sm:$0xff]  ;;  %v4487_v34 = vld [vmem:[%s5795_s20 + $0x20] sm:$0xf] }
  0x27   : > { %314 = vst [vmem:[%s5800_s15 + $0x78] sm:$0xff] %v313_v10  ;;  %v4483_v32 = vld [vmem:[%s5795_s20 + $0x8] sm:$0xf]  ;;  %v4485_v33 = vld [vmem:[%s5795_s20 + $0x14] sm:$0xf] }
  0x28   : > { %316 = vst [vmem:[%s5800_s15 + $0x84] sm:$0xff] %v315_v11  ;;  %v4489_v35 = vld [vmem:[%s5795_s20 + $0x2c] sm:$0xf]  ;;  %v4491_v36 = vld [vmem:[%s5795_s20 + $0x38] sm:$0xf] }
  0x29   : > { %318 = vst [vmem:[%s5800_s15 + $0x90] sm:$0xff] %v317_v12  ;;  %v4493_v37 = vld [vmem:[%s5795_s20 + $0x44] sm:$0xf]  ;;  %v4495_v38 = vld [vmem:[%s5795_s20 + $0x50] sm:$0xf] }
  0x2a   : > { %320 = vst [vmem:[%s5800_s15 + $0x9c] sm:$0xff] %v319_v13  ;;  %v4497_v39 = vld [vmem:[%s5795_s20 + $0x5c] sm:$0xf]  ;;  %v4499_v40 = vld [vmem:[%s5795_s20 + $0x68] sm:$0xf] }
  0x2b   : > { %322 = vst [vmem:[%s5800_s15 + $0xa8] sm:$0xff] %v321_v14  ;;  %v4501_v41 = vld [vmem:[%s5795_s20 + $0x74] sm:$0xf]  ;;  %v4503_v42 = vld [vmem:[%s5795_s20 + $0x80] sm:$0xf] }
  0x2c   : > { %324 = vst [vmem:[%s5800_s15 + $0xb4] sm:$0xff] %v323_v15  ;;  %v4505_v43 = vld [vmem:[%s5795_s20 + $0x8c] sm:$0xf]  ;;  %v4507_v44 = vld [vmem:[%s5795_s20 + $0x98] sm:$0xf] }
  0x2d   : > { %326 = vst [vmem:[%s5800_s15 + $0xc0] sm:$0xff] %v325_v16  ;;  %v4509_v45 = vld [vmem:[%s5795_s20 + $0xa4] sm:$0xf]  ;;  %v4511_v46 = vld [vmem:[%s5795_s20 + $0xb0] sm:$0xf] }
  0x2e   : > { %328 = vst [vmem:[%s5800_s15 + $0xcc] sm:$0xff] %v327_v17  ;;  %v4513_v47 = vld [vmem:[%s5795_s20 + $0xbc] sm:$0xf]  ;;  %v4515_v48 = vld [vmem:[%s5795_s20 + $0x188] sm:$0xf] }
  0x2f   : > { %330 = vst [vmem:[%s5800_s15 + $0xd8] sm:$0xff] %v329_v18  ;;  %v4517_v49 = vld [vmem:[%s5795_s20 + $0x194] sm:$0xf]  ;;  %v4519_v50 = vld [vmem:[%s5795_s20 + $0x1a0] sm:$0xf] }
  0x30   : > { %332 = vst [vmem:[%s5800_s15 + $0xe4] sm:$0xff] %v331_v19  ;;  %v4521_v51 = vld [vmem:[%s5795_s20 + $0x1ac] sm:$0xf]  ;;  %v4523_v52 = vld [vmem:[%s5795_s20 + $0x1b8] sm:$0xf] }
  0x31   : > { %334 = vst [vmem:[%s5800_s15 + $0xf0] sm:$0xff] %v333_v20  ;;  %v4525_v53 = vld [vmem:[%s5795_s20 + $0x1c4] sm:$0xf]  ;;  %v4527_v54 = vld [vmem:[%s5795_s20 + $0x1d0] sm:$0xf] }
  0x32   : > { %336 = vst [vmem:[%s5800_s15 + $0xfc] sm:$0xff] %v335_v21  ;;  %v4529_v55 = vld [vmem:[%s5795_s20 + $0x1dc] sm:$0xf]  ;;  %v4531_v56 = vld [vmem:[%s5795_s20 + $0x1e8] sm:$0xf] }
  0x33   : > { %338 = vst [vmem:[%s5800_s15 + $0x108] sm:$0xff] %v337_v22  ;;  %v4533_v57 = vld [vmem:[%s5795_s20 + $0x1f4] sm:$0xf]  ;;  %v4535_v58 = vld [vmem:[%s5795_s20 + $0x200] sm:$0xf] }
  0x34   : > { %340 = vst [vmem:[%s5800_s15 + $0x114] sm:$0xff] %v339_v23  ;;  %v4537_v59 = vld [vmem:[%s5795_s20 + $0x20c] sm:$0xf]  ;;  %v4539_v60 = vld [vmem:[%s5795_s20 + $0x218] sm:$0xf] }
  0x35   : > { %342 = vst [vmem:[%s5800_s15 + $0x120] sm:$0xff] %v341_v24  ;;  %v4541_v61 = vld [vmem:[%s5795_s20 + $0x224] sm:$0xf]  ;;  %v4543_v62 = vld [vmem:[%s5795_s20 + $0x230] sm:$0xf] }
  0x36   : > { %344 = vst [vmem:[%s5800_s15 + $0x12c] sm:$0xff] %v343_v25  ;;  %v4545_v63 = vld [vmem:[%s5795_s20 + $0x23c] sm:$0xf] }
  0x37   : > { %346 = vst [vmem:[%s5800_s15 + $0x138] sm:$0xff] %v345_v26 }
  0x38   : > { %348 = vst [vmem:[%s5800_s15 + $0x144] sm:$0xff] %v347_v27 }
  0x39   : > { %350 = vst [vmem:[%s5800_s15 + $0x150] sm:$0xff] %v349_v28 }
  0x3a   : > { %352 = vst [vmem:[%s5800_s15 + $0x15c] sm:$0xff] %v351_v29 }
  0x3b   : > { %354 = vst [vmem:[%s5800_s15 + $0x168] sm:$0xff] %v353_v30 }
  0x3c   : > { %356 = vst [vmem:[%s5800_s15 + $0x174] sm:$0xff] %v355_v31 }
  0x3d   : > { %4484 = vst [vmem:[%s5800_s15 + $0x8] sm:$0xf] %v4483_v32 }
  0x3e   : > { %4486 = vst [vmem:[%s5800_s15 + $0x14] sm:$0xf] %v4485_v33 }
  0x3f   : > { %4488 = vst [vmem:[%s5800_s15 + $0x20] sm:$0xf] %v4487_v34 }
  0x40   : > { %4490 = vst [vmem:[%s5800_s15 + $0x2c] sm:$0xf] %v4489_v35 }
  0x41   : > { %4492 = vst [vmem:[%s5800_s15 + $0x38] sm:$0xf] %v4491_v36 }
  0x42   : > { %4494 = vst [vmem:[%s5800_s15 + $0x44] sm:$0xf] %v4493_v37 }
  0x43   : > { %4496 = vst [vmem:[%s5800_s15 + $0x50] sm:$0xf] %v4495_v38 }
  0x44   : > { %4498 = vst [vmem:[%s5800_s15 + $0x5c] sm:$0xf] %v4497_v39 }
  0x45   : > { %4500 = vst [vmem:[%s5800_s15 + $0x68] sm:$0xf] %v4499_v40 }
  0x46   : > { %4502 = vst [vmem:[%s5800_s15 + $0x74] sm:$0xf] %v4501_v41 }
  0x47   : > { %4504 = vst [vmem:[%s5800_s15 + $0x80] sm:$0xf] %v4503_v42 }
  0x48   : > { %4506 = vst [vmem:[%s5800_s15 + $0x8c] sm:$0xf] %v4505_v43 }
  0x49   : > { %4508 = vst [vmem:[%s5800_s15 + $0x98] sm:$0xf] %v4507_v44 }
  0x4a   : > { %4510 = vst [vmem:[%s5800_s15 + $0xa4] sm:$0xf] %v4509_v45 }
  0x4b   : > { %4512 = vst [vmem:[%s5800_s15 + $0xb0] sm:$0xf] %v4511_v46 }
  0x4c   : > { %4514 = vst [vmem:[%s5800_s15 + $0xbc] sm:$0xf] %v4513_v47 }
  0x4d   : > { %4516 = vst [vmem:[%s5800_s15 + $0xc8] sm:$0xf] %v4515_v48 }
  0x4e   : > { %4518 = vst [vmem:[%s5800_s15 + $0xd4] sm:$0xf] %v4517_v49 }
  0x4f   : > { %4520 = vst [vmem:[%s5800_s15 + $0xe0] sm:$0xf] %v4519_v50 }
  0x50   : > { %4522 = vst [vmem:[%s5800_s15 + $0xec] sm:$0xf] %v4521_v51 }
  0x51   : > { %4524 = vst [vmem:[%s5800_s15 + $0xf8] sm:$0xf] %v4523_v52 }
  0x52   : > { %4526 = vst [vmem:[%s5800_s15 + $0x104] sm:$0xf] %v4525_v53 }
  0x53   : > { %4528 = vst [vmem:[%s5800_s15 + $0x110] sm:$0xf] %v4527_v54 }
  0x54   : > { %4530 = vst [vmem:[%s5800_s15 + $0x11c] sm:$0xf] %v4529_v55 }
  0x55   : > { %4532 = vst [vmem:[%s5800_s15 + $0x128] sm:$0xf] %v4531_v56 }
  0x56   : > { %4534 = vst [vmem:[%s5800_s15 + $0x134] sm:$0xf] %v4533_v57 }
  0x57   : > { %4536 = vst [vmem:[%s5800_s15 + $0x140] sm:$0xf] %v4535_v58 }
  0x58   : > { %4538 = vst [vmem:[%s5800_s15 + $0x14c] sm:$0xf] %v4537_v59 }
  0x59   : > { %4540 = vst [vmem:[%s5800_s15 + $0x158] sm:$0xf] %v4539_v60 }
  0x5a   : > { %4542 = vst [vmem:[%s5800_s15 + $0x164] sm:$0xf] %v4541_v61 }
  0x5b   : > { %4544 = vst [vmem:[%s5800_s15 + $0x170] sm:$0xf] %v4543_v62 }
  0x5c   : > { %4546 = vst [vmem:[%s5800_s15 + $0x17c] sm:$0xf] %v4545_v63 }
  0x5d PF: > { %437 = sbr.rel (%p5774_p12) target bundleno = 1715 (0x6b3), region = 74 }
  0x62   : > { %s5930_s21 = sand.u32 1, %s5661_s28  }
  0x63   : > { %s5511_s22 = smul.u32 384, %s5930_s21 }
  0x65   : > { %s5933_s23 = scalar_lea.vmem [#allocation2], %s5511_s22 }
  0x66   : > { %5648 = dma.done.wait (%p5526_p11), [#allocation4], 8192  }
  0x67   : > { %5650 = vsyncadd (%p5526_p11), [#allocation4], 4294959104  ;;  %vm1059_vm0 = vcmask 1045504   ;;  %v4800_v0 = vld [vmem:[%s9012_s1 + $0x70] sm:$0xf]  ;;  %vm1010_vm1 = vcmask 359424  }
  0x68   : > { %v5399_v1 = vld [vmem:[%s9012_s1 + $0x74] sm:$0xf0]  ;;  %v4888_v2 = vld [vmem:[%s9012_s1 + $0x120] sm:$0xf]  ;;  %v5421_v4 = vld [vmem:[%s9012_s1 + $0x124] sm:$0x30] }
  0x69   : > { %v4801_v3 = vor.u32 %v5399_v1, %v4800_v0  ;;  %v4792_v5 = vld [vmem:[%s9012_s1 + $0x60] sm:$0xf]  ;;  %v5397_v6 = vld [vmem:[%s9012_s1 + $0x64] sm:$0xf0]  ;;  %v4889_v7 = vor.u32 %v5421_v4, %v4888_v2  ;;  %v4880_v8 = vld [vmem:[%s9012_s1 + $0x110] sm:$0xf] }
  0x6a   : > { %v5419_v9 = vld [vmem:[%s9012_s1 + $0x114] sm:$0xf0]  ;;  %v4793_v10 = vor.u32 %v5397_v6, %v4792_v5  ;;  %v4784_v12 = vld [vmem:[%s9012_s1 + $0x50] sm:$0xf]  ;;  %v4872_v15 = vld [vmem:[%s9012_s1 + $0x100] sm:$0xf] }
  0x6b   : > { %1066 = vmatpush.bf16.msra.mxu0 %v4801_v3  ;;  %5498 = vmatpush.bf16.msra.mxu1 %v4801_v3  ;;  %v1061_v11 = vsel %vm1059_vm0, %v4889_v7, 0  ;;  %v5395_v13 = vld [vmem:[%s9012_s1 + $0x54] sm:$0xf0]  ;;  %v4881_v14 = vor.u32 %v5419_v9, %v4880_v8  ;;  %v5417_v16 = vld [vmem:[%s9012_s1 + $0x104] sm:$0xf0]  ;;  %vm4167_vm3 = vcmask 1041409  }
  0x6c   : > { %1249 = vmatpush.bf16.msra.mxu2 %v1061_v11  ;;  %5506 = vmatpush.bf16.msra.mxu3 %v1061_v11  ;;  %v4785_v17 = vor.u32 %v5395_v13, %v4784_v12  ;;  %v5414_v18 = vld [vmem:[%s9012_s1 + $0xf4] sm:$0xf]  ;;  %v4866_v19 = vld [vmem:[%s9012_s1 + $0xf8] sm:$0xf0]  ;;  %v4776_v20 = vld [vmem:[%s9012_s1 + $0x40] sm:$0xf]  ;;  %v4873_v23 = vor.u32 %v5417_v16, %v4872_v15 }
  0x6d   : > { %v5393_v21 = vld [vmem:[%s9012_s1 + $0x44] sm:$0xf0]  ;;  %v5338_v24 = vld [vmem:[%s5933_s23 + $0x10] sm:$0xf0]  ;;  %v4680_v25 = vld [vmem:[%s5933_s23 + $0xf8] sm:$0xf]  ;;  %v4869_v27 = vor.u32 %v5414_v18, %v4866_v19 }
  0x6e   : > { %v4560_v22 = vld [vmem:[%s5933_s23 + $0x8] sm:$0xf]  ;;  %v5368_v26 = vld [vmem:[%s5933_s23 + $0x100] sm:$0xf0]  ;;  %v4777_v28 = vor.u32 %v5393_v21, %v4776_v20  ;;  %v4768_v29 = vld [vmem:[%s9012_s1 + $0x30] sm:$0xf] }
  0x6f   : > { %1067 = vmatpush.bf16.msra.mxu0 %v4793_v10  ;;  %5499 = vmatpush.bf16.msra.mxu1 %v4793_v10  ;;  %v5995_v30 = vor.u32 %v5338_v24, %v4560_v22  ;;  %v5997_v31 = vor.u32 %v5368_v26, %v4680_v25  ;;  %v5391_v32 = vld [vmem:[%s9012_s1 + $0x34] sm:$0xf0]  ;;  %v5412_v33 = vld [vmem:[%s9012_s1 + $0xe4] sm:$0xf]  ;;  %v4858_v34 = vld [vmem:[%s9012_s1 + $0xe8] sm:$0xf0] }
  0x70   : > { %1250 = vmatpush.bf16.msra.mxu2 %v4881_v14  ;;  %5507 = vmatpush.bf16.msra.mxu3 %v4881_v14  ;;  %v4861_v35 = vor.u32 %v5412_v33, %v4858_v34  ;;  %v4769_v36 = vor.u32 %v5391_v32, %v4768_v29  ;;  %v4760_v37 = vld [vmem:[%s9012_s1 + $0x20] sm:$0xf]  ;;  %v5389_v38 = vld [vmem:[%s9012_s1 + $0x24] sm:$0xf0]  ;;  %v5410_v39 = vld [vmem:[%s9012_s1 + $0xd4] sm:$0xf] }
  0x71   : > { %9130 = vst [vmem:[#allocation9_spill] sm:$0xff] %v5995_v30  ;;  %v4850_v40 = vld [vmem:[%s9012_s1 + $0xd8] sm:$0xf0]  ;;  %v4761_v41 = vor.u32 %v5389_v38, %v4760_v37  ;;  %v4752_v43 = vld [vmem:[%s9012_s1 + $0x10] sm:$0xf]  ;;  %vm4170_vm4 = vcmask 1042434  }
  0x72   : > { %9131 = vst [vmem:[#allocation10_spill] sm:$0xff] %v5997_v31  ;;  %v4853_v42 = vor.u32 %v5410_v39, %v4850_v40  ;;  %v5387_v44 = vld [vmem:[%s9012_s1 + $0x14] sm:$0xf0]  ;;  %v5420_v46 = vld [vmem:[%s9012_s1 + $0x124] sm:$0xf]  ;;  %vm4173_vm5 = vcmask 1043459  }
  0x73   : > { %1068 = vmatpush.bf16.msra.mxu0 %v4785_v17  ;;  %5500 = vmatpush.bf16.msra.mxu1 %v4785_v17  ;;  %v4753_v45 = vor.u32 %v5387_v44, %v4752_v43  ;;  %v4890_v47 = vld [vmem:[%s9012_s1 + $0x128] sm:$0x30]  ;;  %v4744_v48 = vld [vmem:[%s9012_s1] sm:$0xf]  ;;  %v5385_v49 = vld [vmem:[%s9012_s1 + $0x4] sm:$0xf0] }
  0x74   : > { %1251 = vmatpush.bf16.msra.mxu2 %v4873_v23  ;;  %5508 = vmatpush.bf16.msra.mxu3 %v4873_v23  ;;  %v4572_v50 = vld [vmem:[%s5933_s23 + $0x20] sm:$0xf]  ;;  %v5341_v51 = vld [vmem:[%s5933_s23 + $0x28] sm:$0xf0]  ;;  %v4692_v52 = vld [vmem:[%s5933_s23 + $0x110] sm:$0xf]  ;;  %v4893_v55 = vor.u32 %v5420_v46, %v4890_v47  ;;  %v4745_v56 = vor.u32 %v5385_v49, %v4744_v48 }
  0x75   : > { %v5371_v53 = vld [vmem:[%s5933_s23 + $0x118] sm:$0xf0]  ;;  %v4552_v54 = vld [vmem:[%s5933_s23] sm:$0xf]  ;;  %v5337_v57 = vld [vmem:[%s5933_s23 + $0x8] sm:$0xf0]  ;;  %v6050_v60 = vor.u32 %v5341_v51, %v4572_v50 }
  0x76   : > { %v4660_v58 = vld [vmem:[%s5933_s23 + $0xd8] sm:$0xf]  ;;  %v5364_v59 = vld [vmem:[%s5933_s23 + $0xe0] sm:$0xf0]  ;;  %v6052_v61 = vor.u32 %v5371_v53, %v4692_v52  ;;  %v6054_v62 = vor.u32 %v5337_v57, %v4552_v54  ;;  %v1064_v0 = vsel %vm1059_vm0, %v4893_v55, 0  ;;  %vm4176_vm6 = vcmask 1044484  }
  0x77   : > { %1069 = vmatpush.bf16.msra.mxu0 %v4777_v28  ;;  %5501 = vmatpush.bf16.msra.mxu1 %v4777_v28  ;;  %9132 = vst [vmem:[#allocation11_spill] sm:$0xff] %v6050_v60  ;;  %v6056_v63 = vor.u32 %v5364_v59, %v4660_v58  ;;  %v5408_v1 = vld [vmem:[%s9012_s1 + $0xc4] sm:$0xf]  ;;  %v4842_v2 = vld [vmem:[%s9012_s1 + $0xc8] sm:$0xf0]  ;;  %vm4179_vm7 = vcmask 1045509  }
  0x78   : > { %1422 = vmatpush.bf16.msrb.mxu2 %v4869_v27  ;;  %4904 = vmatmul.msk.bf16.vlgmr.msra.gmra.mxu3 %vm1010_vm1, %v5997_v31  ;;  %9133 = vst [vmem:[#allocation12_spill] sm:$0xff] %v6052_v61  ;;  %v4845_v3 = vor.u32 %v5408_v1, %v4842_v2  ;;  %v4584_v4 = vld [vmem:[%s5933_s23 + $0x38] sm:$0xf]  ;;  %v5344_v5 = vld [vmem:[%s5933_s23 + $0x40] sm:$0xf0]  ;;  %vm4182_vm8 = vcmask 1046534  }
  0x79   : > { %4894 = vmatmul.msk.bf16.vlgmr.msra.gmra.mxu2 %vm1010_vm1, %v5995_v30  ;;  %9134 = vst [vmem:[#allocation13_spill] sm:$0xff] %v6056_v63  ;;  %v4704_v6 = vld [vmem:[%s5933_s23 + $0x128] sm:$0xf]  ;;  %v5374_v7 = vld [vmem:[%s5933_s23 + $0x130] sm:$0xf0]  ;;  %v6079_v12 = vor.u32 %v5344_v5, %v4584_v4  ;;  %vm4185_vm9 = vcmask 1047559  }
  0x7a   : > { %v4564_v8 = vld [vmem:[%s5933_s23 + $0x18] sm:$0xf]  ;;  %v5340_v9 = vld [vmem:[%s5933_s23 + $0x20] sm:$0xf0]  ;;  %v4672_v10 = vld [vmem:[%s5933_s23 + $0xf0] sm:$0xf]  ;;  %v6081_v13 = vor.u32 %v5374_v7, %v4704_v6 }
  0x7b   : > { %1070 = vmatpush.bf16.msra.mxu0 %v4769_v36  ;;  %5502 = vmatpush.bf16.msra.mxu1 %v4769_v36  ;;  %v5367_v11 = vld [vmem:[%s5933_s23 + $0xf8] sm:$0xf0]  ;;  %9135 = vst [vmem:[#allocation14_spill] sm:$0xff] %v6079_v12  ;;  %v6083_v14 = vor.u32 %v5340_v9, %v4564_v8  ;;  %v5398_v16 = vld [vmem:[%s9012_s1 + $0x74] sm:$0xf]  ;;  %s5674_s22 = smov 64  }
  0x7c   : > { %1423 = vmatpush.bf16.msrb.mxu2 %v4861_v35  ;;  %9136 = vst [vmem:[#allocation15_spill] sm:$0xff] %v6081_v13  ;;  %v6085_v15 = vor.u32 %v5367_v11, %v4672_v10  ;;  %v4802_v17 = vld [vmem:[%s9012_s1 + $0x78] sm:$0xf0]  ;;  %v5396_v19 = vld [vmem:[%s9012_s1 + $0x64] sm:$0xf]  ;;  %s4549_s15 = sshll.u32 %s5930_s21, 3 }
  0x7d   : > { %v4805_v18 = vor.u32 %v5398_v16, %v4802_v17  ;;  %v4794_v20 = vld [vmem:[%s9012_s1 + $0x68] sm:$0xf0]  ;;  %v5418_v21 = vld [vmem:[%s9012_s1 + $0x114] sm:$0xf]  ;;  %v4882_v23 = vld [vmem:[%s9012_s1 + $0x118] sm:$0xf0] }
  0x7e   : > { %9137 = vst [vmem:[#allocation16_spill] sm:$0xff] %v6085_v15  ;;  %v4797_v22 = vor.u32 %v5396_v19, %v4794_v20  ;;  %v5394_v24 = vld [vmem:[%s9012_s1 + $0x54] sm:$0xf]  ;;  %v4786_v25 = vld [vmem:[%s9012_s1 + $0x58] sm:$0xf0]  ;;  %v4885_v26 = vor.u32 %v5418_v21, %v4882_v23  ;;  %s477_s12 = scalar_lea.vmem [#allocation6], %s4549_s15 }
  0x7f   : > { %1071 = vmatpush.bf16.msra.mxu0 %v4761_v41  ;;  %5503 = vmatpush.bf16.msra.mxu1 %v4761_v41  ;;  %v4789_v27 = vor.u32 %v5394_v24, %v4786_v25  ;;  %v5392_v28 = vld [vmem:[%s9012_s1 + $0x44] sm:$0xf]  ;;  %v4778_v29 = vld [vmem:[%s9012_s1 + $0x48] sm:$0xf0]  ;;  %v4596_v32 = vld [vmem:[%s5933_s23 + $0x50] sm:$0xf] }
  0x80   : > { %1424 = vmatpush.bf16.msrb.mxu2 %v4853_v42  ;;  %1333 = vmatpush.bf16.msrb.mxu3 %v4805_v18  ;;  %v5347_v33 = vld [vmem:[%s5933_s23 + $0x58] sm:$0xf0]  ;;  %v4716_v34 = vld [vmem:[%s5933_s23 + $0x140] sm:$0xf]  ;;  %v5377_v35 = vld [vmem:[%s5933_s23 + $0x148] sm:$0xf0]  ;;  %v4781_v36 = vor.u32 %v5392_v28, %v4778_v29 }
  0x81   : > { %v4576_v37 = vld [vmem:[%s5933_s23 + $0x30] sm:$0xf]  ;;  %v5343_v38 = vld [vmem:[%s5933_s23 + $0x38] sm:$0xf0]  ;;  %v4684_v39 = vld [vmem:[%s5933_s23 + $0x108] sm:$0xf]  ;;  %v6131_v41 = vor.u32 %v5347_v33, %v4596_v32  ;;  %v6133_v42 = vor.u32 %v5377_v35, %v4716_v34 }
  0x82   : > { %v5370_v40 = vld [vmem:[%s5933_s23 + $0x110] sm:$0xf0]  ;;  %v6135_v43 = vor.u32 %v5343_v38, %v4576_v37  ;;  %v4770_v46 = vld [vmem:[%s9012_s1 + $0x38] sm:$0xf0]  ;;  %v5388_v51 = vld [vmem:[%s9012_s1 + $0x24] sm:$0xf] }
  0x83   : > { %1072 = vmatpush.bf16.msra.mxu0 %v4753_v45  ;;  %5504 = vmatpush.bf16.msra.mxu1 %v4753_v45  ;;  %9138 = vst [vmem:[#allocation17_spill] sm:$0xff] %v6131_v41  ;;  %v6137_v44 = vor.u32 %v5370_v40, %v4684_v39  ;;  %v5390_v45 = vld [vmem:[%s9012_s1 + $0x34] sm:$0xf]  ;;  %v4834_v49 = vld [vmem:[%s9012_s1 + $0xb8] sm:$0xf0]  ;;  %s4392_s13 = sshll.u32 %s477_s12, 4  ;;  %s4393_s13 = int_to_ptr.vmem [resolvable:$true] %s4392_s13 }
  0x84   : > { %1425 = vmatpush.bf16.msrb.mxu2 %v4845_v3  ;;  %1334 = vmatpush.bf16.msrb.mxu3 %v4797_v22  ;;  %9139 = vst [vmem:[#allocation18_spill] sm:$0xff] %v6133_v42  ;;  %v4773_v47 = vor.u32 %v5390_v45, %v4770_v46  ;;  %v5406_v48 = vld [vmem:[%s9012_s1 + $0xb4] sm:$0xf]  ;;  %v4762_v52 = vld [vmem:[%s9012_s1 + $0x28] sm:$0xf0]  ;;  %s5623_s25 = scalar_lea.hbm %s9019_s8, 16 }
  0x85   : > { %9140 = vst [vmem:[#allocation19_spill] sm:$0xff] %v6137_v44  ;;  %v4837_v50 = vor.u32 %v5406_v48, %v4834_v49  ;;  %v5386_v53 = vld [vmem:[%s9012_s1 + $0x14] sm:$0xf]  ;;  %v4765_v54 = vor.u32 %v5388_v51, %v4762_v52  ;;  %v4754_v55 = vld [vmem:[%s9012_s1 + $0x18] sm:$0xf0] }
  0x86   : > { %v5384_v57 = vld [vmem:[%s9012_s1 + $0x4] sm:$0xf]  ;;  %v4746_v58 = vld [vmem:[%s9012_s1 + $0x8] sm:$0xf0]  ;;  %v4608_v59 = vld [vmem:[%s5933_s23 + $0x68] sm:$0xf] }
  0x87   : > { %1073 = vmatpush.bf16.msra.mxu0 %v4745_v56  ;;  %5505 = vmatpush.bf16.msra.mxu1 %v4745_v56  ;;  %v4757_v56 = vor.u32 %v5386_v53, %v4754_v55  ;;  %v4728_v1 = vld [vmem:[%s5933_s23 + $0x158] sm:$0xf]  ;;  %v5380_v2 = vld [vmem:[%s5933_s23 + $0x160] sm:$0xf0]  ;;  %v4749_v3 = vor.u32 %v5384_v57, %v4746_v58  ;;  %v4588_v4 = vld [vmem:[%s5933_s23 + $0x48] sm:$0xf] }
  0x88   : > { %4905 = vmatmul.msk.bf16.gmra.mxu3 %vm1010_vm1, %v6052_v61  ;;  %1426 = vmatpush.bf16.msrb.mxu2 %v4837_v50  ;;  %v5346_v5 = vld [vmem:[%s5933_s23 + $0x50] sm:$0xf0]  ;;  %v4696_v6 = vld [vmem:[%s5933_s23 + $0x120] sm:$0xf]  ;;  %v5373_v7 = vld [vmem:[%s5933_s23 + $0x128] sm:$0xf0]  ;;  %v6185_v9 = vor.u32 %v5380_v2, %v4728_v1 }
  0x89   : > { %4895 = vmatmul.msk.bf16.gmra.mxu2 %vm1010_vm1, %v6050_v60  ;;  %1335 = vmatpush.bf16.msrb.mxu3 %v4789_v27  ;;  %v6187_v10 = vor.u32 %v5346_v5, %v4588_v4  ;;  %v6189_v11 = vor.u32 %v5373_v7, %v4696_v6  ;;  %v4864_v16 = vld [vmem:[%s9012_s1 + $0xf0] sm:$0xf]  ;;  %v5415_v17 = vld [vmem:[%s9012_s1 + $0xf4] sm:$0xf0]  ;;  %v5404_v19 = vld [vmem:[%s9012_s1 + $0xa4] sm:$0xf] }
  0x8a   : > { %1074 = vmatmul.bf16.vlgmr.msra.gmra.mxu0 %v6054_v62  ;;  %1119 = vmatmul.bf16.vlgmr.msra.gmra.mxu1 %v6056_v63  ;;  %9142 = vst [vmem:[#allocation21_spill] sm:$0xff] %v6185_v9  ;;  %v4865_v18 = vor.u32 %v5415_v17, %v4864_v16  ;;  %v4826_v20 = vld [vmem:[%s9012_s1 + $0xa8] sm:$0xf0]  ;;  %v4856_v21 = vld [vmem:[%s9012_s1 + $0xe0] sm:$0xf] }
  0x8b   : > { %1516 = vmatpush.bf16.msrb.mxu0 %v1064_v0  ;;  %v5350_v0 = vld [vmem:[%s5933_s23 + $0x70] sm:$0xf0]  ;;  %9143 = vst [vmem:[#allocation22_spill] sm:$0xff] %v6189_v11  ;;  %v4829_v22 = vor.u32 %v5404_v19, %v4826_v20  ;;  %v5413_v23 = vld [vmem:[%s9012_s1 + $0xe4] sm:$0xf0] }
  0x8c   : > { %v6183_v8 = vor.u32 %v5350_v0, %v4608_v59  ;;  %1155 = vmatpush.bf16.msrb.mxu1 %v4865_v18  ;;  %v4857_v24 = vor.u32 %v5413_v23, %v4856_v21  ;;  %v4848_v25 = vld [vmem:[%s9012_s1 + $0xd0] sm:$0xf]  ;;  %v4620_v27 = vld [vmem:[%s5933_s23 + $0x80] sm:$0xf]  ;;  %v5353_v29 = vld [vmem:[%s5933_s23 + $0x88] sm:$0xf0] }
  0x8d   : > { %1336 = vmatpush.bf16.msrb.mxu3 %v4781_v36  ;;  %1427 = vmatpush.bf16.msrb.mxu2 %v4829_v22  ;;  %v4740_v32 = vld [vmem:[%s5933_s23 + $0x170] sm:$0xf]  ;;  %v5383_v33 = vld [vmem:[%s5933_s23 + $0x178] sm:$0xf0]  ;;  %v4600_v34 = vld [vmem:[%s5933_s23 + $0x60] sm:$0xf]  ;;  %v6235_v40 = vor.u32 %v5353_v29, %v4620_v27 }
  0x8e   : > { %9141 = vst [vmem:[#allocation20_spill] sm:$0xff] %v6183_v8  ;;  %v4840_v35 = vld [vmem:[%s9012_s1 + $0xc0] sm:$0xf]  ;;  %v5409_v36 = vld [vmem:[%s9012_s1 + $0xc4] sm:$0xf0]  ;;  %v6237_v45 = vor.u32 %v5383_v33, %v4740_v32 }
  0x8f   : > { %1517 = vmatpush.bf16.msrb.mxu0 %v4885_v26  ;;  %v5411_v26 = vld [vmem:[%s9012_s1 + $0xd4] sm:$0xf0]  ;;  %v5349_v37 = vld [vmem:[%s5933_s23 + $0x68] sm:$0xf0]  ;;  %v5376_v39 = vld [vmem:[%s5933_s23 + $0x140] sm:$0xf0]  ;;  %v4841_v46 = vor.u32 %v5409_v36, %v4840_v35 }
  0x90   : > { %1156 = vmatpush.bf16.msrb.mxu1 %v4857_v24  ;;  %v4849_v28 = vor.u32 %v5411_v26, %v4848_v25  ;;  %v4708_v38 = vld [vmem:[%s5933_s23 + $0x138] sm:$0xf]  ;;  %9144 = vst [vmem:[#allocation23_spill] sm:$0xff] %v6235_v40  ;;  %v4832_v49 = vld [vmem:[%s9012_s1 + $0xb0] sm:$0xf] }
  0x91   : > { %1337 = vmatpush.bf16.msrb.mxu3 %v4773_v47  ;;  %9145 = vst [vmem:[#allocation24_spill] sm:$0xff] %v6237_v45  ;;  %v6239_v47 = vor.u32 %v5349_v37, %v4600_v34  ;;  %v6241_v48 = vor.u32 %v5376_v39, %v4708_v38  ;;  %v5407_v50 = vld [vmem:[%s9012_s1 + $0xb4] sm:$0xf0]  ;;  %v4824_v52 = vld [vmem:[%s9012_s1 + $0xa0] sm:$0xf] }
  0x92   : > { %v4833_v51 = vor.u32 %v5407_v50, %v4832_v49  ;;  %v5405_v53 = vld [vmem:[%s9012_s1 + $0xa4] sm:$0xf0]  ;;  %v4818_v55 = vld [vmem:[%s9012_s1 + $0x98] sm:$0xf0]  ;;  %v4874_v57 = vld [vmem:[%s9012_s1 + $0x108] sm:$0xf0] }
  0x93   : > { %9146 = vst [vmem:[#allocation25_spill] sm:$0xff] %v6241_v48  ;;  %v4825_v0 = vor.u32 %v5405_v53, %v4824_v52  ;;  %v4816_v1 = vld [vmem:[%s9012_s1 + $0x90] sm:$0xf]  ;;  %v5403_v2 = vld [vmem:[%s9012_s1 + $0x94] sm:$0xf0] }
  0x94   : > { %1157 = vmatpush.bf16.msrb.mxu1 %v4849_v28  ;;  %v5356_v4 = vld [vmem:[%s5933_s23 + $0xa0] sm:$0xf0]  ;;  %v4817_v5 = vor.u32 %v5403_v2, %v4816_v1  ;;  %v4612_v6 = vld [vmem:[%s5933_s23 + $0x78] sm:$0xf]  ;;  %v4808_v7 = vld [vmem:[%s9012_s1 + $0x80] sm:$0xf] }
  0x95   : > { %1338 = vmatpush.bf16.msrb.mxu3 %v4765_v54  ;;  %v5402_v54 = vld [vmem:[%s9012_s1 + $0x94] sm:$0xf]  ;;  %v5401_v16 = vld [vmem:[%s9012_s1 + $0x84] sm:$0xf0]  ;;  %v5352_v17 = vld [vmem:[%s5933_s23 + $0x80] sm:$0xf0] }
  0x96   : > { %v4821_v58 = vor.u32 %v5402_v54, %v4818_v55  ;;  %v4720_v18 = vld [vmem:[%s5933_s23 + $0x150] sm:$0xf]  ;;  %v5379_v19 = vld [vmem:[%s5933_s23 + $0x158] sm:$0xf0]  ;;  %v4809_v21 = vor.u32 %v5401_v16, %v4808_v7  ;;  %v6293_v22 = vor.u32 %v5352_v17, %v4612_v6  ;;  %v4732_v28 = vld [vmem:[%s5933_s23 + $0x168] sm:$0xf] }
  0x97   : > { %v6295_v23 = vor.u32 %v5379_v19, %v4720_v18  ;;  %v4644_v24 = vld [vmem:[%s5933_s23 + $0xb0] sm:$0xf]  ;;  %v5359_v25 = vld [vmem:[%s5933_s23 + $0xb8] sm:$0xf0]  ;;  %v5382_v29 = vld [vmem:[%s5933_s23 + $0x170] sm:$0xf0] }
  0x98   : > { %4906 = vmatmul.msk.bf16.gmra.mxu3 %vm1010_vm1, %v6081_v13  ;;  %1158 = vmatpush.bf16.msrb.mxu1 %v4841_v46  ;;  %v4624_v26 = vld [vmem:[%s5933_s23 + $0x90] sm:$0xf]  ;;  %v5355_v27 = vld [vmem:[%s5933_s23 + $0x98] sm:$0xf0]  ;;  %v5400_v32 = vld [vmem:[%s9012_s1 + $0x84] sm:$0xf]  ;;  %v6314_v34 = vor.u32 %v5359_v25, %v4644_v24  ;;  %v6318_v37 = vor.u32 %v5382_v29, %v4732_v28 }
  0x99   : > { %4896 = vmatmul.msk.bf16.gmra.mxu2 %vm1010_vm1, %v6079_v12  ;;  %1339 = vmatpush.bf16.msrb.mxu3 %v4757_v56  ;;  %v5416_v56 = vld [vmem:[%s9012_s1 + $0x104] sm:$0xf]  ;;  %9148 = vst [vmem:[#allocation27_spill] sm:$0xff] %v6295_v23  ;;  %v4810_v33 = vld [vmem:[%s9012_s1 + $0x88] sm:$0xf0]  ;;  %v6316_v36 = vor.u32 %v5355_v27, %v4624_v26 }
  0x9a   : > { %1079 = vmatmul.bf16.gmra.mxu0 %v6083_v14  ;;  %1124 = vmatmul.bf16.gmra.mxu1 %v6085_v15  ;;  %v4877_v59 = vor.u32 %v5416_v56, %v4874_v57  ;;  %9149 = vst [vmem:[#allocation28_spill] sm:$0xff] %v6314_v34  ;;  %v4813_v35 = vor.u32 %v5400_v32, %v4810_v33  ;;  %v4656_v38 = vld [vmem:[%s5933_s23 + $0xc8] sm:$0xf]  ;;  %v5362_v39 = vld [vmem:[%s5933_s23 + $0xd0] sm:$0xf0] }
  0x9b   : > { %1428 = vmatpush.bf16.msrb.mxu2 %v4821_v58  ;;  %9150 = vst [vmem:[#allocation29_spill] sm:$0xff] %v6316_v36  ;;  %v4636_v46 = vld [vmem:[%s5933_s23 + $0xa8] sm:$0xf]  ;;  %v5358_v49 = vld [vmem:[%s5933_s23 + $0xb0] sm:$0xf0]  ;;  %v6331_v52 = vor.u32 %v5362_v39, %v4656_v38 }
  0x9c   : > { %1159 = vmatpush.bf16.msrb.mxu1 %v4833_v51  ;;  %1518 = vmatpush.bf16.msrb.mxu0 %v4877_v59  ;;  %9151 = vst [vmem:[#allocation30_spill] sm:$0xff] %v6318_v37  ;;  %v5336_v50 = vld [vmem:[%s5933_s23 + $0x4] sm:$0xf]  ;;  %v4554_v51 = vld [vmem:[%s5933_s23 + $0xc] sm:$0xf0]  ;;  %v6333_v53 = vor.u32 %v5358_v49, %v4636_v46 }
  0x9d   : > { %1340 = vmatpush.bf16.msrb.mxu3 %v4749_v3  ;;  %v4632_v3 = vld [vmem:[%s5933_s23 + $0x98] sm:$0xf]  ;;  %9152 = vst [vmem:[#allocation31_spill] sm:$0xff] %v6331_v52  ;;  %v6335_v54 = vor.u32 %v5336_v50, %v4554_v51  ;;  %v5086_v55 = vld [vmem:[%s9012_s1 + $0x220] sm:$0xf] }
  0x9e   : > { %v6291_v20 = vor.u32 %v5356_v4, %v4632_v3  ;;  %9153 = vst [vmem:[#allocation32_spill] sm:$0xff] %v6333_v53  ;;  %v5453_v56 = vld [vmem:[%s9012_s1 + $0x224] sm:$0xf0]  ;;  %v5110_v57 = vld [vmem:[%s9012_s1 + $0x250] sm:$0xf] }
  0x9f   : > { %1429 = vmatpush.bf16.msrb.mxu2 %v4813_v35  ;;  %9154 = vst [vmem:[#allocation33_spill] sm:$0xff] %v6335_v54  ;;  %v5087_v58 = vor.u32 %v5453_v56, %v5086_v55  ;;  %v5459_v59 = vld [vmem:[%s9012_s1 + $0x254] sm:$0x30]  ;;  %v5436_v4 = vld [vmem:[%s9012_s1 + $0x1a4] sm:$0xf] }
  0xa0   : > { %1160 = vmatpush.bf16.msrb.mxu1 %v4825_v0  ;;  %9147 = vst [vmem:[#allocation26_spill] sm:$0xff] %v6291_v20  ;;  %v5111_v0 = vor.u32 %v5459_v59, %v5110_v57  ;;  %v4668_v7 = vld [vmem:[%s5933_s23 + $0xe0] sm:$0xf]  ;;  %v5365_v16 = vld [vmem:[%s5933_s23 + $0xe8] sm:$0xf0] }
  0xa1   : > { %1922 = vmatpush.bf16.msra.mxu3 %v5087_v58  ;;  %v4648_v17 = vld [vmem:[%s5933_s23 + $0xc0] sm:$0xf]  ;;  %v5339_v24 = vld [vmem:[%s5933_s23 + $0x1c] sm:$0xf]  ;;  %v4566_v25 = vld [vmem:[%s5933_s23 + $0x24] sm:$0xf0]  ;;  %v6375_v26 = vor.u32 %v5365_v16, %v4668_v7 }
  0xa2   : > { %v1828_v3 = vsel %vm1059_vm0, %v5111_v0, 0  ;;  %v6379_v28 = vor.u32 %v5339_v24, %v4566_v25  ;;  %v5342_v50 = vld [vmem:[%s5933_s23 + $0x34] sm:$0xf]  ;;  %v4578_v51 = vld [vmem:[%s5933_s23 + $0x3c] sm:$0xf0] }
  0xa3   : > { %2016 = vmatpush.bf16.msra.mxu2 %v1828_v3  ;;  %9159 = vst [vmem:[#allocation38_spill] sm:$0xff] %v6375_v26  ;;  %v6404_v55 = vor.u32 %v5342_v50, %v4578_v51  ;;  %v5078_v58 = vld [vmem:[%s9012_s1 + $0x210] sm:$0xf]  ;;  %v5451_v59 = vld [vmem:[%s9012_s1 + $0x214] sm:$0xf0] }
  0xa4   : > { %1161 = vmatpush.bf16.msrb.mxu1 %v4817_v5  ;;  %v5024_v5 = vld [vmem:[%s9012_s1 + $0x1a8] sm:$0xf0]  ;;  %9161 = vst [vmem:[#allocation40_spill] sm:$0xff] %v6379_v28  ;;  %v5079_v0 = vor.u32 %v5451_v59, %v5078_v58  ;;  %v5434_v7 = vld [vmem:[%s9012_s1 + $0x194] sm:$0xf] }
  0xa5   : > { %v5027_v6 = vor.u32 %v5436_v4, %v5024_v5  ;;  %9170 = vst [vmem:[#allocation49_spill] sm:$0xff] %v6404_v55  ;;  %v5016_v16 = vld [vmem:[%s9012_s1 + $0x198] sm:$0xf0]  ;;  %v5345_v25 = vld [vmem:[%s5933_s23 + $0x4c] sm:$0xf] }
  0xa6   : > { %1923 = vmatpush.bf16.msra.mxu3 %v5079_v0  ;;  %v4590_v50 = vld [vmem:[%s5933_s23 + $0x54] sm:$0xf0] }
  0xa7   : > { %2100 = vmatpush.bf16.msra.mxu0 %v5027_v6  ;;  %v6441_v51 = vor.u32 %v5345_v25, %v4590_v50 }
  0xa8   : > { %4907 = vmatmul.msk.bf16.gmra.mxu3 %vm1010_vm1, %v6133_v42  ;;  %1162 = vmatpush.bf16.msrb.mxu1 %v4809_v21  ;;  %v5361_v21 = vld [vmem:[%s5933_s23 + $0xc8] sm:$0xf0] }
  0xa9   : > { %4897 = vmatmul.msk.bf16.gmra.mxu2 %vm1010_vm1, %v6131_v41  ;;  %v6377_v27 = vor.u32 %v5361_v21, %v4648_v17  ;;  %v5019_v17 = vor.u32 %v5434_v7, %v5016_v16 }
  0xaa   : > { %1084 = vmatmul.bf16.gmra.mxu0 %v6135_v43  ;;  %1129 = vmatmul.bf16.gmra.mxu1 %v6137_v44 }
  0xab   : > { %9160 = vst [vmem:[#allocation39_spill] sm:$0xff] %v6377_v27  ;;  %2101 = vmatpush.bf16.msra.mxu0 %v5019_v17 }
  0xb8   : > { %4908 = vmatmul.msk.bf16.gmra.mxu3 %vm1010_vm1, %v6185_v9 }
  0xb9   : > { %4898 = vmatmul.msk.bf16.gmra.mxu2 %vm1010_vm1, %v6183_v8 }
  0xba   : > { %1089 = vmatmul.bf16.gmra.mxu0 %v6187_v10  ;;  %1134 = vmatmul.bf16.gmra.mxu1 %v6189_v11 }
  0xc8   : > { %4909 = vmatmul.msk.bf16.gmra.mxu3 %vm1010_vm1, %v6237_v45 }
  0xc9   : > { %4899 = vmatmul.msk.bf16.gmra.mxu2 %vm1010_vm1, %v6235_v40 }
  0xca   : > { %1094 = vmatmul.bf16.gmra.mxu0 %v6239_v47  ;;  %1139 = vmatmul.bf16.gmra.mxu1 %v6241_v48 }
  0xd8   : > { %1341 = vmatmul.bf16.vlgmr.msrb.gmra.mxu3 %v6054_v62 }
  0xd9   : > { %4900 = vmatmul.msk.bf16.gmra.mxu2 %vm1010_vm1, %v6291_v20 }
  0xda   : > { %1099 = vmatmul.bf16.gmra.mxu0 %v6293_v22  ;;  %1144 = vmatmul.bf16.gmra.mxu1 %v6295_v23 }
  0xe8   : > { %1346 = vmatmul.bf16.gmra.mxu3 %v6083_v14 }
  0xe9   : > { %4901 = vmatmul.msk.bf16.gmra.mxu2 %vm1010_vm1, %v6314_v34 }
  0xea   : > { %1104 = vmatmul.bf16.gmra.mxu0 %v6316_v36  ;;  %1149 = vmatmul.bf16.gmra.mxu1 %v6318_v37 }
  0xf8   : > { %1351 = vmatmul.bf16.gmra.mxu3 %v6135_v43 }
  0xf9   : > { %4902 = vmatmul.msk.bf16.gmra.mxu2 %vm1010_vm1, %v6331_v52 }
  0xfa   : > { %1109 = vmatmul.bf16.gmra.mxu0 %v6333_v53  ;;  %1163 = vmatmul.bf16.vlgmr.msrb.gmra.mxu1 %v6335_v54 }
  0xfb   : > { %v6356_v2 = vpop.f32.mrf.mxu3 }
  0xfc   : > { %v6354_v1 = vpop.f32.mrf.mxu2  ;;  %9156 = vst [vmem:[#allocation35_spill] sm:$0xff] %v6356_v2 }
  0xfd   : > { %9155 = vst [vmem:[#allocation34_spill] sm:$0xff] %v6354_v1 }
 0x103   : > { %v6370_v19 = vpop.f32.mrf.mxu3 }
 0x104   : > { %v6368_v18 = vpop.f32.mrf.mxu2  ;;  %9158 = vst [vmem:[#allocation37_spill] sm:$0xff] %v6370_v19 }
 0x105   : > { %9157 = vst [vmem:[#allocation36_spill] sm:$0xff] %v6368_v18 }
 0x107   : > { %v6381_v29 = vpop.f32.mrf.mxu0  ;;  %v6383_v32 = vpop.f32.mrf.mxu1 }
 0x108   : > { %9162 = vst [vmem:[#allocation41_spill] sm:$0xff] %v6381_v29  ;;  %1356 = vmatmul.bf16.gmra.mxu3 %v6187_v10 }
 0x109   : > { %9163 = vst [vmem:[#allocation42_spill] sm:$0xff] %v6383_v32  ;;  %4903 = vmatmul.msk.bf16.gmra.mxu2 %vm1010_vm1, %v6375_v26 }
 0x10a   : > { %1114 = vmatmul.bf16.gmra.mxu0 %v6377_v27  ;;  %1168 = vmatmul.bf16.gmra.mxu1 %v6379_v28 }
 0x10b   : > { %v6392_v35 = vpop.f32.mrf.mxu3 }
 0x10c   : > { %v6390_v33 = vpop.f32.mrf.mxu2  ;;  %9165 = vst [vmem:[#allocation44_spill] sm:$0xff] %v6392_v35 }
 0x10d   : > { %9164 = vst [vmem:[#allocation43_spill] sm:$0xff] %v6390_v33  ;;  %v4674_v33 = vld [vmem:[%s5933_s23 + $0xfc] sm:$0xf0] }
 0x10f   : > { %v6394_v38 = vpop.f32.mrf.mxu0  ;;  %v6396_v39 = vpop.f32.mrf.mxu1 }
 0x110   : > { %9166 = vst [vmem:[#allocation45_spill] sm:$0xff] %v6394_v38  ;;  %v5426_v38 = vld [vmem:[%s9012_s1 + $0x154] sm:$0xf] }
 0x111   : > { %9167 = vst [vmem:[#allocation46_spill] sm:$0xff] %v6396_v39 }
 0x113   : > { %v6400_v49 = vpop.f32.mrf.mxu3 }
 0x114   : > { %v6398_v46 = vpop.f32.mrf.mxu2  ;;  %9169 = vst [vmem:[#allocation48_spill] sm:$0xff] %v6400_v49 }
 0x115   : > { %9168 = vst [vmem:[#allocation47_spill] sm:$0xff] %v6398_v46 }
 0x117   : > { %v6406_v56 = vpop.f32.mrf.mxu0  ;;  %v6408_v57 = vpop.f32.mrf.mxu1 }
 0x118   : > { %9171 = vst [vmem:[#allocation50_spill] sm:$0xff] %v6406_v56  ;;  %1361 = vmatmul.bf16.gmra.mxu3 %v6239_v47  ;;  %v5014_v56 = vld [vmem:[%s9012_s1 + $0x190] sm:$0xf] }
 0x119   : > { %9172 = vst [vmem:[#allocation51_spill] sm:$0xff] %v6408_v57  ;;  %1430 = vmatmul.bf16.vlgmr.msrb.gmra.mxu2 %v6335_v54 }
 0x11a   : > { %1173 = vmatmul.bf16.gmra.mxu1 %v6404_v55  ;;  %4910 = vmatmul.msk.bf16.vlgmr.msrb.gmra.mxu0 %vm1010_vm1, %v5995_v30 }
 0x11b   : > { %v6423_v4 = vpop.f32.mrf.mxu3 }
 0x11c   : > { %v6421_v3 = vpop.f32.mrf.mxu2  ;;  %9174 = vst [vmem:[#allocation53_spill] sm:$0xff] %v6423_v4  ;;  %v4602_v4 = vld [vmem:[%s5933_s23 + $0x6c] sm:$0xf0] }
 0x11d   : > { %9173 = vst [vmem:[#allocation52_spill] sm:$0xff] %v6421_v3  ;;  %v4992_v3 = vld [vmem:[%s9012_s1 + $0x168] sm:$0xf0] }
 0x11f   : > { %v6425_v5 = vpop.f32.mrf.mxu0  ;;  %v6427_v6 = vpop.f32.mrf.mxu1 }
 0x120   : > { %9175 = vst [vmem:[#allocation54_spill] sm:$0xff] %v6425_v5  ;;  %v4662_v5 = vld [vmem:[%s5933_s23 + $0xe4] sm:$0xf0] }
 0x121   : > { %9176 = vst [vmem:[#allocation55_spill] sm:$0xff] %v6427_v6  ;;  %v5432_v6 = vld [vmem:[%s9012_s1 + $0x184] sm:$0xf] }
 0x123   : > { %v6437_v24 = vpop.f32.mrf.mxu3 }
 0x124   : > { %v6435_v21 = vpop.f32.mrf.mxu2  ;;  %9178 = vst [vmem:[#allocation57_spill] sm:$0xff] %v6437_v24  ;;  %v5348_v24 = vld [vmem:[%s5933_s23 + $0x64] sm:$0xf] }
 0x125   : > { %9177 = vst [vmem:[#allocation56_spill] sm:$0xff] %v6435_v21  ;;  %v6466_v49 = vor.u32 %v5348_v24, %v4602_v4 }
 0x127   : > { %v6443_v58 = vpop.f32.mrf.mxu0  ;;  %v6445_v59 = vpop.f32.mrf.mxu1  ;;  %9187 = vst [vmem:[#allocation66_spill] sm:$0xff] %v6466_v49 }
 0x128   : > { %9179 = vst [vmem:[#allocation58_spill] sm:$0xff] %v6443_v58  ;;  %1366 = vmatmul.bf16.gmra.mxu3 %v6293_v22 }
 0x129   : > { %9180 = vst [vmem:[#allocation59_spill] sm:$0xff] %v6445_v59  ;;  %1435 = vmatmul.bf16.gmra.mxu2 %v6379_v28 }
 0x12a   : > { %1178 = vmatmul.bf16.gmra.mxu1 %v6441_v51  ;;  %4911 = vmatmul.msk.bf16.gmra.mxu0 %vm1010_vm1, %v6050_v60 }
 0x12b   : > { %v6454_v7 = vpop.f32.mrf.mxu3 }
 0x12c   : > { %v6452_v0 = vpop.f32.mrf.mxu2  ;;  %9182 = vst [vmem:[#allocation61_spill] sm:$0xff] %v6454_v7  ;;  %v5070_v7 = vld [vmem:[%s9012_s1 + $0x200] sm:$0xf] }
 0x12d   : > { %9181 = vst [vmem:[#allocation60_spill] sm:$0xff] %v6452_v0  ;;  %v5022_v0 = vld [vmem:[%s9012_s1 + $0x1a0] sm:$0xf] }
 0x12f   : > { %v6456_v16 = vpop.f32.mrf.mxu0  ;;  %v6458_v17 = vpop.f32.mrf.mxu1 }
 0x130   : > { %9183 = vst [vmem:[#allocation62_spill] sm:$0xff] %v6456_v16  ;;  %v5428_v16 = vld [vmem:[%s9012_s1 + $0x164] sm:$0xf] }
 0x131   : > { %9184 = vst [vmem:[#allocation63_spill] sm:$0xff] %v6458_v17 }
 0x133   : > { %v6462_v50 = vpop.f32.mrf.mxu3 }
 0x134   : > { %v6460_v25 = vpop.f32.mrf.mxu2  ;;  %9186 = vst [vmem:[#allocation65_spill] sm:$0xff] %v6462_v50  ;;  %v5449_v50 = vld [vmem:[%s9012_s1 + $0x204] sm:$0xf0] }
 0x135   : > { %9185 = vst [vmem:[#allocation64_spill] sm:$0xff] %v6460_v25  ;;  %v5071_v4 = vor.u32 %v5449_v50, %v5070_v7  ;;  %v5008_v7 = vld [vmem:[%s9012_s1 + $0x188] sm:$0xf0] }
 0x136   : > { %v5011_v50 = vor.u32 %v5432_v6, %v5008_v7 }
 0x137   : > { %v6468_v35 = vpop.f32.mrf.mxu0  ;;  %v6470_v59 = vpop.f32.mrf.mxu1  ;;  %1924 = vmatpush.bf16.msra.mxu3 %v5071_v4  ;;  %v4614_v4 = vld [vmem:[%s5933_s23 + $0x84] sm:$0xf0] }
 0x138   : > { %9188 = vst [vmem:[#allocation67_spill] sm:$0xff] %v6468_v35  ;;  %1371 = vmatmul.bf16.gmra.mxu3 %v6316_v36  ;;  %2102 = vmatpush.bf16.msra.mxu0 %v5011_v50  ;;  %v5457_v50 = vld [vmem:[%s9012_s1 + $0x244] sm:$0xf0] }
 0x139   : > { %9189 = vst [vmem:[#allocation68_spill] sm:$0xff] %v6470_v59  ;;  %1440 = vmatmul.bf16.gmra.mxu2 %v6404_v55 }
 0x13a   : > { %1183 = vmatmul.bf16.gmra.mxu1 %v6466_v49  ;;  %4912 = vmatmul.msk.bf16.gmra.mxu0 %vm1010_vm1, %v6079_v12 }
 0x13b   : > { %v6485_v59 = vpop.f32.mrf.mxu3 }
 0x13c   : > { %v6483_v24 = vpop.f32.mrf.mxu2  ;;  %9191 = vst [vmem:[#allocation70_spill] sm:$0xff] %v6485_v59  ;;  %v5351_v59 = vld [vmem:[%s5933_s23 + $0x7c] sm:$0xf] }
 0x13d   : > { %9190 = vst [vmem:[#allocation69_spill] sm:$0xff] %v6483_v24  ;;  %v6503_v39 = vor.u32 %v5351_v59, %v4614_v4  ;;  %v5102_v59 = vld [vmem:[%s9012_s1 + $0x240] sm:$0xf] }
 0x13e   : > { %v5103_v4 = vor.u32 %v5457_v50, %v5102_v59 }
 0x13f   : > { %v6487_v17 = vpop.f32.mrf.mxu0  ;;  %v6489_v19 = vpop.f32.mrf.mxu1  ;;  %9196 = vst [vmem:[#allocation75_spill] sm:$0xff] %v6503_v39 }
 0x140   : > { %9192 = vst [vmem:[#allocation71_spill] sm:$0xff] %v6487_v17  ;;  %2017 = vmatpush.bf16.msra.mxu2 %v5103_v4 }
 0x141   : > { %9193 = vst [vmem:[#allocation72_spill] sm:$0xff] %v6489_v19 }
 0x143   : > { %v6499_v57 = vpop.f32.mrf.mxu3 }
 0x144   : > { %v6497_v2 = vpop.f32.mrf.mxu2  ;;  %9195 = vst [vmem:[#allocation74_spill] sm:$0xff] %v6499_v57 }
 0x145   : > { %9194 = vst [vmem:[#allocation73_spill] sm:$0xff] %v6497_v2 }
 0x147   : > { %v6505_v32 = vpop.f32.mrf.mxu0  ;;  %v6507_v19 = vpop.f32.mrf.mxu1 }
 0x148   : > { %9197 = vst [vmem:[#allocation76_spill] sm:$0xff] %v6505_v32  ;;  %1376 = vmatmul.bf16.gmra.mxu3 %v6333_v53 }
 0x149   : > { %9198 = vst [vmem:[#allocation77_spill] sm:$0xff] %v6507_v19  ;;  %1445 = vmatmul.bf16.gmra.mxu2 %v6441_v51 }
 0x14a   : > { %1188 = vmatmul.bf16.gmra.mxu1 %v6503_v39  ;;  %4913 = vmatmul.msk.bf16.gmra.mxu0 %vm1010_vm1, %v6131_v41 }
 0x14b   : > { %v6516_v7 = vpop.f32.mrf.mxu3 }
 0x14c   : > { %v6514_v6 = vpop.f32.mrf.mxu2  ;;  %9200 = vst [vmem:[#allocation79_spill] sm:$0xff] %v6516_v7  ;;  %v4626_v7 = vld [vmem:[%s5933_s23 + $0x9c] sm:$0xf0] }
 0x14d   : > { %9199 = vst [vmem:[#allocation78_spill] sm:$0xff] %v6514_v6  ;;  %v5354_v6 = vld [vmem:[%s5933_s23 + $0x94] sm:$0xf] }
 0x14e   : > { %v6534_v32 = vor.u32 %v5354_v6, %v4626_v7  ;;  %v5062_v6 = vld [vmem:[%s9012_s1 + $0x1f0] sm:$0xf]  ;;  %v5447_v7 = vld [vmem:[%s9012_s1 + $0x1f4] sm:$0xf0] }
 0x14f   : > { %v6524_v57 = vpop.f32.mrf.mxu0  ;;  %v6526_v19 = vpop.f32.mrf.mxu1  ;;  %v5063_v4 = vor.u32 %v5447_v7, %v5062_v6  ;;  %v4638_v6 = vld [vmem:[%s5933_s23 + $0xb4] sm:$0xf0] }
 0x150   : > { %9201 = vst [vmem:[#allocation80_spill] sm:$0xff] %v6524_v57 }
 0x151   : > { %9202 = vst [vmem:[#allocation81_spill] sm:$0xff] %v6526_v19  ;;  %1925 = vmatpush.bf16.msra.mxu3 %v5063_v4  ;;  %v5430_v19 = vld [vmem:[%s9012_s1 + $0x174] sm:$0xf] }
 0x152   : > { %9205 = vst [vmem:[#allocation84_spill] sm:$0xff] %v6534_v32 }
 0x153   : > { %v6530_v24 = vpop.f32.mrf.mxu3 }
 0x154   : > { %v6528_v2 = vpop.f32.mrf.mxu2  ;;  %9204 = vst [vmem:[#allocation83_spill] sm:$0xff] %v6530_v24 }
 0x155   : > { %9203 = vst [vmem:[#allocation82_spill] sm:$0xff] %v6528_v2  ;;  %v5000_v2 = vld [vmem:[%s9012_s1 + $0x178] sm:$0xf0] }
 0x156   : > { %v5003_v7 = vor.u32 %v5430_v19, %v5000_v2 }
 0x157   : > { %v6536_v25 = vpop.f32.mrf.mxu0  ;;  %v6538_v17 = vpop.f32.mrf.mxu1 }
 0x158   : > { %9206 = vst [vmem:[#allocation85_spill] sm:$0xff] %v6536_v25  ;;  %1381 = vmatmul.bf16.gmra.mxu3 %v6377_v27  ;;  %2103 = vmatpush.bf16.msra.mxu0 %v5003_v7 }
 0x159   : > { %9207 = vst [vmem:[#allocation86_spill] sm:$0xff] %v6538_v17  ;;  %1450 = vmatmul.bf16.gmra.mxu2 %v6466_v49 }
 0x15a   : > { %1193 = vmatmul.bf16.gmra.mxu1 %v6534_v32  ;;  %4914 = vmatmul.msk.bf16.gmra.mxu0 %vm1010_vm1, %v6183_v8 }
 0x15b   : > { %v6553_v50 = vpop.f32.mrf.mxu3 }
 0x15c   : > { %v6551_v59 = vpop.f32.mrf.mxu2 }
 0x15d   : > { %9208 = vst [vmem:[#allocation87_spill] sm:$0xff] %v6551_v59  ;;  %v5357_v59 = vld [vmem:[%s5933_s23 + $0xac] sm:$0xf] }
 0x15e   : > { %v6571_v4 = vor.u32 %v5357_v59, %v4638_v6  ;;  %v5360_v6 = vld [vmem:[%s5933_s23 + $0xc4] sm:$0xf] }
 0x15f   : > { %v6555_v24 = vpop.f32.mrf.mxu0  ;;  %v6557_v17 = vpop.f32.mrf.mxu1 }
 0x160   : > { %9209 = vst [vmem:[#allocation88_spill] sm:$0xff] %v6555_v24 }
 0x161   : > { %9210 = vst [vmem:[#allocation89_spill] sm:$0xff] %v6557_v17 }
 0x162   : > { %9212 = vst [vmem:[#allocation91_spill] sm:$0xff] %v6571_v4 }
 0x163   : > { %v6567_v57 = vpop.f32.mrf.mxu3 }
 0x164   : > { %v6565_v25 = vpop.f32.mrf.mxu2 }
 0x165   : > { %9211 = vst [vmem:[#allocation90_spill] sm:$0xff] %v6565_v25 }
 0x167   : > { %v6573_v17 = vpop.f32.mrf.mxu0  ;;  %v6575_v24 = vpop.f32.mrf.mxu1 }
 0x168   : > { %9213 = vst [vmem:[#allocation92_spill] sm:$0xff] %v6573_v17  ;;  %1386 = vmatmul.bf16.gmra.mxu3 %v6056_v63  ;;  %v4650_v17 = vld [vmem:[%s5933_s23 + $0xcc] sm:$0xf0] }
 0x169   : > { %9214 = vst [vmem:[#allocation93_spill] sm:$0xff] %v6575_v24  ;;  %1455 = vmatmul.bf16.gmra.mxu2 %v6503_v39  ;;  %v6602_v21 = vor.u32 %v5360_v6, %v4650_v17 }
 0x16a   : > { %1198 = vmatmul.bf16.gmra.mxu1 %v6571_v4  ;;  %4915 = vmatmul.msk.bf16.gmra.mxu0 %vm1010_vm1, %v6235_v40 }
 0x16b   : > { %v6584_v2 = vpop.f32.mrf.mxu3  ;;  %9219 = vst [vmem:[#allocation98_spill] sm:$0xff] %v6602_v21 }
 0x16c   : > { %v6582_v25 = vpop.f32.mrf.mxu2 }
 0x16d   : > { %9215 = vst [vmem:[#allocation94_spill] sm:$0xff] %v6582_v25  ;;  %v5437_v25 = vld [vmem:[%s9012_s1 + $0x1a4] sm:$0xf0] }
 0x16e   : > { %v5023_v35 = vor.u32 %v5437_v25, %v5022_v0  ;;  %v5054_v0 = vld [vmem:[%s9012_s1 + $0x1e0] sm:$0xf] }
 0x16f   : > { %v6586_v19 = vpop.f32.mrf.mxu0  ;;  %v6588_v59 = vpop.f32.mrf.mxu1 }
 0x170   : > { %9216 = vst [vmem:[#allocation95_spill] sm:$0xff] %v6586_v19  ;;  %1833 = vmatpush.bf16.msra.mxu1 %v5023_v35  ;;  %v5445_v35 = vld [vmem:[%s9012_s1 + $0x1e4] sm:$0xf0] }
 0x171   : > { %9217 = vst [vmem:[#allocation96_spill] sm:$0xff] %v6588_v59  ;;  %v5055_v6 = vor.u32 %v5445_v35, %v5054_v0  ;;  %v4995_v0 = vor.u32 %v5428_v16, %v4992_v3 }
 0x173   : > { %v6593_v24 = vpop.f32.mrf.mxu3  ;;  %1926 = vmatpush.bf16.msra.mxu3 %v5055_v6  ;;  %2104 = vmatpush.bf16.msra.mxu0 %v4995_v0 }
 0x174   : > { %v6591_v7 = vpop.f32.mrf.mxu2 }
 0x175   : > { %9218 = vst [vmem:[#allocation97_spill] sm:$0xff] %v6591_v7 }
 0x177   : > { %v6604_v19 = vpop.f32.mrf.mxu0  ;;  %v6606_v59 = vpop.f32.mrf.mxu1 }
 0x178   : > { %9220 = vst [vmem:[#allocation99_spill] sm:$0xff] %v6604_v19  ;;  %1391 = vmatmul.bf16.gmra.mxu3 %v6085_v15 }
 0x179   : > { %9221 = vst [vmem:[#allocation100_spill] sm:$0xff] %v6606_v59  ;;  %1460 = vmatmul.bf16.gmra.mxu2 %v6534_v32 }
 0x17a   : > { %1203 = vmatmul.bf16.gmra.mxu1 %v6602_v21  ;;  %4916 = vmatmul.msk.bf16.gmra.mxu0 %vm1010_vm1, %v6291_v20 }
 0x17b   : > { %v6621_v25 = vpop.f32.mrf.mxu3 }
 0x17c   : > { %v6619_v17 = vpop.f32.mrf.mxu2 }
 0x17d   : > { %9222 = vst [vmem:[#allocation101_spill] sm:$0xff] %v6619_v17  ;;  %v5363_v17 = vld [vmem:[%s5933_s23 + $0xdc] sm:$0xf] }
 0x17e   : > { %v6639_v35 = vor.u32 %v5363_v17, %v4662_v5 }
 0x17f   : > { %v6623_v7 = vpop.f32.mrf.mxu0  ;;  %v6625_v19 = vpop.f32.mrf.mxu1 }
 0x180   : > { %9223 = vst [vmem:[#allocation102_spill] sm:$0xff] %v6623_v7 }
 0x181   : > { %9224 = vst [vmem:[#allocation103_spill] sm:$0xff] %v6625_v19 }
 0x182   : > { %9226 = vst [vmem:[#allocation105_spill] sm:$0xff] %v6639_v35 }
 0x183   : > { %v6635_v46 = vpop.f32.mrf.mxu3 }
 0x184   : > { %v6633_v58 = vpop.f32.mrf.mxu2 }
 0x185   : > { %9225 = vst [vmem:[#allocation104_spill] sm:$0xff] %v6633_v58 }
 0x187   : > { %v6641_v6 = vpop.f32.mrf.mxu0  ;;  %v6643_v7 = vpop.f32.mrf.mxu1 }
 0x188   : > { %9227 = vst [vmem:[#allocation106_spill] sm:$0xff] %v6641_v6  ;;  %1396 = vmatmul.bf16.gmra.mxu3 %v6137_v44  ;;  %v5366_v6 = vld [vmem:[%s5933_s23 + $0xf4] sm:$0xf]  ;;  %v4984_v44 = vld [vmem:[%s9012_s1 + $0x158] sm:$0xf0] }
 0x189   : > { %9228 = vst [vmem:[#allocation107_spill] sm:$0xff] %v6643_v7  ;;  %1465 = vmatmul.bf16.gmra.mxu2 %v6571_v4  ;;  %v6664_v7 = vor.u32 %v5366_v6, %v4674_v33  ;;  %v5046_v33 = vld [vmem:[%s9012_s1 + $0x1d0] sm:$0xf] }
 0x18a   : > { %1208 = vmatmul.bf16.gmra.mxu1 %v6639_v35  ;;  %4917 = vmatmul.msk.bf16.gmra.mxu0 %vm1010_vm1, %v6314_v34 }
 0x18b   : > { %v6652_v3 = vpop.f32.mrf.mxu3  ;;  %9233 = vst [vmem:[#allocation112_spill] sm:$0xff] %v6664_v7 }
 0x18c   : > { %v6650_v58 = vpop.f32.mrf.mxu2 }
 0x18d   : > { %9229 = vst [vmem:[#allocation108_spill] sm:$0xff] %v6650_v58  ;;  %v5435_v58 = vld [vmem:[%s9012_s1 + $0x194] sm:$0xf0] }
 0x18f   : > { %v6654_v16 = vpop.f32.mrf.mxu0  ;;  %v6656_v5 = vpop.f32.mrf.mxu1 }
 0x190   : > { %9230 = vst [vmem:[#allocation109_spill] sm:$0xff] %v6654_v16 }
 0x191   : > { %9231 = vst [vmem:[#allocation110_spill] sm:$0xff] %v6656_v5  ;;  %v5015_v5 = vor.u32 %v5435_v58, %v5014_v56  ;;  %v5443_v56 = vld [vmem:[%s9012_s1 + $0x1d4] sm:$0xf0] }
 0x193   : > { %v6660_v0 = vpop.f32.mrf.mxu3  ;;  %1834 = vmatpush.bf16.msra.mxu1 %v5015_v5 }
 0x194   : > { %v6658_v17 = vpop.f32.mrf.mxu2 }
 0x195   : > { %9232 = vst [vmem:[#allocation111_spill] sm:$0xff] %v6658_v17  ;;  %v5047_v17 = vor.u32 %v5443_v56, %v5046_v33  ;;  %v5369_v33 = vld [vmem:[%s5933_s23 + $0x10c] sm:$0xf]  ;;  %v4686_v56 = vld [vmem:[%s5933_s23 + $0x114] sm:$0xf0] }
 0x197   : > { %v6672_v18 = vpop.f32.mrf.mxu1  ;;  %v1520_v16 = vpop.f32.mrf.mxu0  ;;  %1927 = vmatpush.bf16.msra.mxu3 %v5047_v17 }
 0x198   : > { %9234 = vst [vmem:[#allocation113_spill] sm:$0xff] %v6672_v18  ;;  %1401 = vmatmul.bf16.gmra.mxu3 %v6189_v11 }
 0x199   : > { %1470 = vmatmul.bf16.gmra.mxu2 %v6602_v21 }
 0x19a   : > { %1213 = vmatmul.bf16.gmra.mxu1 %v6664_v7  ;;  %4918 = vmatmul.msk.bf16.gmra.mxu0 %vm1010_vm1, %v6331_v52 }
 0x19b   : > { %v6685_v58 = vpop.f32.mrf.mxu3 }
 0x19c   : > { %v1431_v6 = vpop.f32.mrf.mxu2 }
 0x19d   : > { %v1432_v5 = vadd.f32 %v1431_v6, %v6553_v50  ;;  %v4987_v50 = vor.u32 %v5426_v38, %v4984_v44  ;;  %v6705_v6 = vor.u32 %v5369_v33, %v4686_v56 }
 0x19f   : > { %v6688_v18 = vadd.f32 %v1520_v16, %v1432_v5  ;;  %v6690_v11 = vpop.f32.mrf.mxu1  ;;  %v1522_v19 = vpop.f32.mrf.mxu0  ;;  %2105 = vmatpush.bf16.msra.mxu0 %v4987_v50  ;;  %9238 = vst [vmem:[#allocation117_spill] sm:$0xff] %v6705_v6  ;;  %v5094_v5 = vld [vmem:[%s9012_s1 + $0x230] sm:$0xf] }
 0x1a0   : > { %9236 = vst [vmem:[#allocation115_spill] sm:$0xff] %v6690_v11  ;;  %v5030_v50 = vld [vmem:[%s9012_s1 + $0x1b0] sm:$0xf] }
 0x1a1   : > { %9235 = vst [vmem:[#allocation114_spill] sm:$0xff] %v6688_v18  ;;  %v5455_v18 = vld [vmem:[%s9012_s1 + $0x234] sm:$0xf0] }
 0x1a2   : > { %v5095_v15 = vor.u32 %v5455_v18, %v5094_v5  ;;  %v5038_v18 = vld [vmem:[%s9012_s1 + $0x1c0] sm:$0xf]  ;;  %v5372_v5 = vld [vmem:[%s5933_s23 + $0x124] sm:$0xf] }
 0x1a3   : > { %v6698_v1 = vpop.f32.mrf.mxu3 }
 0x1a4   : > { %v1433_v59 = vpop.f32.mrf.mxu2  ;;  %2018 = vmatpush.bf16.msra.mxu2 %v5095_v15  ;;  %v5441_v15 = vld [vmem:[%s9012_s1 + $0x1c4] sm:$0xf0] }
 0x1a5   : > { %v1434_v16 = vadd.f32 %v1433_v59, %v6567_v57  ;;  %v5039_v56 = vor.u32 %v5441_v15, %v5038_v18  ;;  %v5006_v15 = vld [vmem:[%s9012_s1 + $0x180] sm:$0xf] }
 0x1a7   : > { %v6703_v17 = vadd.f32 %v1522_v19, %v1434_v16  ;;  %v6713_v11 = vpop.f32.mrf.mxu1  ;;  %v1525_v29 = vpop.f32.mrf.mxu0  ;;  %1928 = vmatpush.bf16.msra.mxu3 %v5039_v56  ;;  %v5433_v56 = vld [vmem:[%s9012_s1 + $0x184] sm:$0xf0] }
 0x1a8   : > { %9239 = vst [vmem:[#allocation118_spill] sm:$0xff] %v6713_v11  ;;  %1406 = vmatmul.bf16.gmra.mxu3 %v6241_v48  ;;  %v5007_v48 = vor.u32 %v5433_v56, %v5006_v15  ;;  %v5375_v15 = vld [vmem:[%s5933_s23 + $0x13c] sm:$0xf]  ;;  %v4710_v56 = vld [vmem:[%s5933_s23 + $0x144] sm:$0xf0] }
 0x1a9   : > { %9237 = vst [vmem:[#allocation116_spill] sm:$0xff] %v6703_v17  ;;  %1475 = vmatmul.bf16.gmra.mxu2 %v6639_v35 }
 0x1aa   : > { %1218 = vmatmul.bf16.gmra.mxu1 %v6705_v6  ;;  %4919 = vmatmul.msk.bf16.gmra.mxu0 %vm1010_vm1, %v6375_v26 }
 0x1ab   : > { %v6720_v44 = vpop.f32.mrf.mxu3  ;;  %1835 = vmatpush.bf16.msra.mxu1 %v5007_v48  ;;  %v4976_v48 = vld [vmem:[%s9012_s1 + $0x148] sm:$0xf0] }
 0x1ac   : > { %v1436_v38 = vpop.f32.mrf.mxu2 }
 0x1ad   : > { %v1437_v57 = vadd.f32 %v1436_v38, %v6584_v2  ;;  %v4698_v38 = vld [vmem:[%s5933_s23 + $0x12c] sm:$0xf0] }
 0x1ae   : > { %v6746_v18 = vor.u32 %v5372_v5, %v4698_v38  ;;  %v5424_v5 = vld [vmem:[%s9012_s1 + $0x144] sm:$0xf] }
 0x1af   : > { %v6723_v19 = vadd.f32 %v1525_v29, %v1437_v57  ;;  %v6731_v59 = vpop.f32.mrf.mxu1  ;;  %v1527_v33 = vpop.f32.mrf.mxu0  ;;  %v5439_v29 = vld [vmem:[%s9012_s1 + $0x1b4] sm:$0xf0] }
 0x1b0   : > { %9241 = vst [vmem:[#allocation120_spill] sm:$0xff] %v6731_v59  ;;  %v5031_v57 = vor.u32 %v5439_v29, %v5030_v50 }
 0x1b1   : > { %9240 = vst [vmem:[#allocation119_spill] sm:$0xff] %v6723_v19 }
 0x1b2   : > { %1929 = vmatpush.bf16.msra.mxu3 %v5031_v57  ;;  %9243 = vst [vmem:[#allocation122_spill] sm:$0xff] %v6746_v18 }
 0x1b3   : > { %v6739_v2 = vpop.f32.mrf.mxu3 }
 0x1b4   : > { %v1438_v16 = vpop.f32.mrf.mxu2 }
 0x1b5   : > { %v1439_v19 = vadd.f32 %v1438_v16, %v6593_v24 }
 0x1b7   : > { %v6744_v17 = vadd.f32 %v1527_v33, %v1439_v19  ;;  %v6754_v59 = vpop.f32.mrf.mxu1  ;;  %v1530_v11 = vpop.f32.mrf.mxu0 }
 0x1b8   : > { %9244 = vst [vmem:[#allocation123_spill] sm:$0xff] %v6754_v59  ;;  %1411 = vmatmul.bf16.gmra.mxu3 %v6295_v23 }
 0x1b9   : > { %9242 = vst [vmem:[#allocation121_spill] sm:$0xff] %v6744_v17  ;;  %1480 = vmatmul.bf16.gmra.mxu2 %v6664_v7  ;;  %v4979_v17 = vor.u32 %v5424_v5, %v4976_v48 }
 0x1ba   : > { %1223 = vmatmul.bf16.gmra.mxu1 %v6746_v18  ;;  %4920 = vmatmul.msk.bf16.gmra.mxu0 %vm1010_vm1, %v5997_v31 }
 0x1bb   : > { %v6761_v24 = vpop.f32.mrf.mxu3  ;;  %2106 = vmatpush.bf16.msra.mxu0 %v4979_v17  ;;  %v5429_v17 = vld [vmem:[%s9012_s1 + $0x164] sm:$0xf0] }
 0x1bc   : > { %v1441_v19 = vpop.f32.mrf.mxu2 }
 0x1bd   : > { %v1442_v33 = vadd.f32 %v1441_v19, %v6621_v25  ;;  %v4998_v25 = vld [vmem:[%s9012_s1 + $0x170] sm:$0xf]  ;;  %v5431_v19 = vld [vmem:[%s9012_s1 + $0x174] sm:$0xf0] }
 0x1bf   : > { %v6764_v50 = vadd.f32 %v1530_v11, %v1442_v33  ;;  %v6766_v29 = vpop.f32.mrf.mxu1  ;;  %v1532_v16 = vpop.f32.mrf.mxu0 }
 0x1c0   : > { %9246 = vst [vmem:[#allocation125_spill] sm:$0xff] %v6766_v29  ;;  %v4999_v29 = vor.u32 %v5431_v19, %v4998_v25 }
 0x1c1   : > { %9245 = vst [vmem:[#allocation124_spill] sm:$0xff] %v6764_v50  ;;  %v6787_v50 = vor.u32 %v5375_v15, %v4710_v56  ;;  %v5427_v15 = vld [vmem:[%s9012_s1 + $0x154] sm:$0xf0] }
 0x1c2   : > { %1836 = vmatpush.bf16.msra.mxu1 %v4999_v29 }
 0x1c3   : > { %v6774_v38 = vpop.f32.mrf.mxu3  ;;  %9248 = vst [vmem:[#allocation127_spill] sm:$0xff] %v6787_v50 }
 0x1c4   : > { %v1443_v57 = vpop.f32.mrf.mxu2 }
 0x1c5   : > { %v1444_v11 = vadd.f32 %v1443_v57, %v6635_v46  ;;  %v4990_v46 = vld [vmem:[%s9012_s1 + $0x160] sm:$0xf]  ;;  %v4982_v57 = vld [vmem:[%s9012_s1 + $0x150] sm:$0xf] }
 0x1c7   : > { %v6785_v33 = vadd.f32 %v1532_v16, %v1444_v11  ;;  %v6789_v59 = vpop.f32.mrf.mxu1  ;;  %v1535_v23 = vpop.f32.mrf.mxu0  ;;  %v4991_v16 = vor.u32 %v5429_v17, %v4990_v46  ;;  %v4983_v11 = vor.u32 %v5427_v15, %v4982_v57  ;;  %v5425_v46 = vld [vmem:[%s9012_s1 + $0x144] sm:$0xf0]  ;;  %v4966_v57 = vld [vmem:[%s9012_s1 + $0x130] sm:$0xf]  ;;  %v5423_v15 = vld [vmem:[%s9012_s1 + $0x134] sm:$0xf0] }
 0x1c8   : > { %1416 = vmatmul.bf16.gmra.mxu3 %v6318_v37 }
 0x1c9   : > { %9247 = vst [vmem:[#allocation126_spill] sm:$0xff] %v6785_v33  ;;  %1485 = vmatmul.bf16.gmra.mxu2 %v6705_v6  ;;  %1837 = vmatpush.bf16.msra.mxu1 %v4991_v16  ;;  %v5378_v33 = vld [vmem:[%s5933_s23 + $0x154] sm:$0xf] }
 0x1ca   : > { %1228 = vmatmul.bf16.gmra.mxu1 %v6787_v50  ;;  %4921 = vmatmul.msk.bf16.gmra.mxu0 %vm1010_vm1, %v6052_v61 }
 0x1cb   : > { %v6802_v5 = vpop.f32.mrf.mxu3 }
 0x1cc   : > { %v1446_v48 = vpop.f32.mrf.mxu2 }
 0x1cd   : > { %v1447_v29 = vadd.f32 %v1446_v48, %v6652_v3  ;;  %1838 = vmatpush.bf16.msra.mxu1 %v4983_v11  ;;  %v4974_v3 = vld [vmem:[%s9012_s1 + $0x140] sm:$0xf] }
 0x1ce   : > { %v4975_v17 = vor.u32 %v5425_v46, %v4974_v3  ;;  %v4967_v3 = vor.u32 %v5423_v15, %v4966_v57  ;;  %v4968_v57 = vld [vmem:[%s9012_s1 + $0x138] sm:$0xf0] }
 0x1cf   : > { %v6811_v56 = vadd.f32 %v1535_v23, %v1447_v29  ;;  %v6813_v25 = vpop.f32.mrf.mxu1  ;;  %v1537_v19 = vpop.f32.mrf.mxu0  ;;  %v4722_v23 = vld [vmem:[%s5933_s23 + $0x15c] sm:$0xf0] }
 0x1d0   : > { %9250 = vst [vmem:[#allocation129_spill] sm:$0xff] %v6813_v25 }
 0x1d1   : > { %9249 = vst [vmem:[#allocation128_spill] sm:$0xff] %v6811_v56  ;;  %1839 = vmatpush.bf16.msra.mxu1 %v4975_v17  ;;  %v6834_v56 = vor.u32 %v5378_v33, %v4722_v23 }
 0x1d3   : > { %v6821_v16 = vpop.f32.mrf.mxu3  ;;  %9252 = vst [vmem:[#allocation131_spill] sm:$0xff] %v6834_v56 }
 0x1d4   : > { %v1448_v48 = vpop.f32.mrf.mxu2 }
 0x1d5   : > { %v1449_v29 = vadd.f32 %v1448_v48, %v6660_v0  ;;  %1840 = vmatpush.bf16.msra.mxu1 %v4967_v3 }
 0x1d7   : > { %v6832_v11 = vadd.f32 %v1537_v19, %v1449_v29  ;;  %v6836_v46 = vpop.f32.mrf.mxu1  ;;  %v1540_v25 = vpop.f32.mrf.mxu0  ;;  %v5422_v29 = vld [vmem:[%s9012_s1 + $0x134] sm:$0xf] }
 0x1d8   : > { %9253 = vst [vmem:[#allocation132_spill] sm:$0xff] %v6836_v46  ;;  %1930 = vmatmul.bf16.vlgmr.msra.gmra.mxu3 %v6335_v54  ;;  %v4734_v46 = vld [vmem:[%s5933_s23 + $0x174] sm:$0xf0]  ;;  %v4971_v54 = vor.u32 %v5422_v29, %v4968_v57 }
 0x1d9   : > { %9251 = vst [vmem:[#allocation130_spill] sm:$0xff] %v6832_v11  ;;  %1490 = vmatmul.bf16.gmra.mxu2 %v6746_v18  ;;  %v5381_v11 = vld [vmem:[%s5933_s23 + $0x16c] sm:$0xf] }
 0x1da   : > { %1233 = vmatmul.bf16.gmra.mxu1 %v6834_v56  ;;  %4922 = vmatmul.msk.bf16.gmra.mxu0 %vm1010_vm1, %v6081_v13 }
 0x1db   : > { %v6843_v0 = vpop.f32.mrf.mxu3  ;;  %2107 = vmatpush.bf16.msra.mxu0 %v4971_v54 }
 0x1dc   : > { %v1451_v33 = vpop.f32.mrf.mxu2 }
 0x1dd   : > { %v1452_v19 = vadd.f32 %v1451_v33, %v6685_v58  ;;  %v6863_v33 = vor.u32 %v5381_v11, %v4734_v46 }
 0x1df   : > { %v6846_v17 = vadd.f32 %v1540_v25, %v1452_v19  ;;  %v6848_v48 = vpop.f32.mrf.mxu1  ;;  %v1542_v23 = vpop.f32.mrf.mxu0  ;;  %9257 = vst [vmem:[#allocation136_spill] sm:$0xff] %v6863_v33 }
 0x1e0   : > { %9255 = vst [vmem:[#allocation134_spill] sm:$0xff] %v6848_v48 }
 0x1e1   : > { %9254 = vst [vmem:[#allocation133_spill] sm:$0xff] %v6846_v17 }
 0x1e3   : > { %v6856_v15 = vpop.f32.mrf.mxu3 }
 0x1e4   : > { %v1453_v3 = vpop.f32.mrf.mxu2 }
 0x1e5   : > { %v1454_v58 = vadd.f32 %v1453_v3, %v6698_v1 }
 0x1e7   : > { %v6861_v25 = vadd.f32 %v1542_v23, %v1454_v58  ;;  %v6865_v19 = vpop.f32.mrf.mxu1  ;;  %v1545_v17 = vpop.f32.mrf.mxu0 }
 0x1e8   : > { %9258 = vst [vmem:[#allocation137_spill] sm:$0xff] %v6865_v19  ;;  %1935 = vmatmul.bf16.gmra.mxu3 %v6379_v28 }
 0x1e9   : > { %9256 = vst [vmem:[#allocation135_spill] sm:$0xff] %v6861_v25  ;;  %1495 = vmatmul.bf16.gmra.mxu2 %v6787_v50 }
 0x1ea   : > { %1238 = vmatmul.bf16.gmra.mxu1 %v6863_v33  ;;  %4923 = vmatmul.msk.bf16.gmra.mxu0 %vm1010_vm1, %v6133_v42 }
 0x1eb   : > { %v6872_v29 = vpop.f32.mrf.mxu3 }
 0x1ec   : > { %v1456_v1 = vpop.f32.mrf.mxu2 }
 0x1ed   : > { %v1457_v54 = vadd.f32 %v1456_v1, %v6720_v44  ;;  %v5458_v44 = vld [vmem:[%s9012_s1 + $0x254] sm:$0xf] }
 0x1ef   : > { %v6875_v23 = vadd.f32 %v1545_v17, %v1457_v54  ;;  %v6877_v11 = vpop.f32.mrf.mxu1  ;;  %v1547_v46 = vpop.f32.mrf.mxu0  ;;  %v5467_v17 = vld [vmem:[%s9013_s2 + $0x38] sm:$0xff] }
 0x1f0   : > { %9260 = vst [vmem:[#allocation139_spill] sm:$0xff] %v6877_v11  ;;  %2716 = vmatpush.bf16.msrb.mxu2 %v5467_v17  ;;  %v5475_v11 = vld [vmem:[%s9013_s2 + $0x78] sm:$0xff] }
 0x1f1   : > { %9259 = vst [vmem:[#allocation138_spill] sm:$0xff] %v6875_v23  ;;  %2805 = vmatpush.bf16.msrb.mxu0 %v5475_v11 }
 0x1f3   : > { %v6879_v57 = vpop.f32.mrf.mxu3 }
 0x1f4   : > { %v1458_v3 = vpop.f32.mrf.mxu2 }
 0x1f5   : > { %v1459_v58 = vadd.f32 %v1458_v3, %v6739_v2  ;;  %v5112_v2 = vld [vmem:[%s9012_s1 + $0x258] sm:$0x30] }
 0x1f7   : > { %v6882_v25 = vadd.f32 %v1547_v46, %v1459_v58  ;;  %v6884_v19 = vpop.f32.mrf.mxu1  ;;  %v1550_v48 = vpop.f32.mrf.mxu0  ;;  %v5115_v46 = vor.u32 %v5458_v44, %v5112_v2 }
 0x1f8   : > { %9262 = vst [vmem:[#allocation141_spill] sm:$0xff] %v6884_v19  ;;  %1940 = vmatmul.bf16.gmra.mxu3 %v6404_v55 }
 0x1f9   : > { %9261 = vst [vmem:[#allocation140_spill] sm:$0xff] %v6882_v25  ;;  %1500 = vmatmul.bf16.gmra.mxu2 %v6834_v56  ;;  %v1831_v58 = vsel %vm1059_vm0, %v5115_v46, 0 }
 0x1fa   : > { %4924 = vmatmul.msk.bf16.gmra.mxu0 %vm1010_vm1, %v6185_v9  ;;  %1841 = vmatmul.bf16.vlgmr.msra.gmra.mxu1 %v6054_v62 }
 0x1fb   : > { %v6900_v1 = vpop.f32.mrf.mxu3  ;;  %2283 = vmatpush.bf16.msrb.mxu3 %v1831_v58 }
 0x1fc   : > { %v1461_v54 = vpop.f32.mrf.mxu2 }
 0x1fd   : > { %v1462_v3 = vadd.f32 %v1461_v54, %v6761_v24 }
 0x1ff   : > { %v6904_v25 = vadd.f32 %v1550_v48, %v1462_v3  ;;  %v6906_v23 = vpop.f32.mrf.mxu1  ;;  %v1552_v19 = vpop.f32.mrf.mxu0 }
 0x201   : > { %9263 = vst [vmem:[#allocation142_spill] sm:$0xff] %v6904_v25 }
 0x203   : > { %v6911_v55 = vpop.f32.mrf.mxu3 }
 0x204   : > { %v1463_v28 = vpop.f32.mrf.mxu2 }
 0x205   : > { %v1464_v44 = vadd.f32 %v1463_v28, %v6774_v38 }
 0x207   : > { %v6914_v24 = vadd.f32 %v1552_v19, %v1464_v44  ;;  %v6916_v2 = vpop.f32.mrf.mxu1  ;;  %v1555_v48 = vpop.f32.mrf.mxu0 }
 0x208   : > { %1945 = vmatmul.bf16.gmra.mxu3 %v6441_v51 }
 0x209   : > { %9264 = vst [vmem:[#allocation143_spill] sm:$0xff] %v6914_v24  ;;  %1505 = vmatmul.bf16.gmra.mxu2 %v6863_v33 }
 0x20a   : > { %4925 = vmatmul.msk.bf16.gmra.mxu0 %vm1010_vm1, %v6237_v45  ;;  %1846 = vmatmul.bf16.gmra.mxu1 %v6083_v14 }
 0x20b   : > { %v6923_v17 = vpop.f32.mrf.mxu3 }
 0x20c   : > { %v1466_v54 = vpop.f32.mrf.mxu2 }
 0x20d   : > { %v1467_v28 = vadd.f32 %v1466_v54, %v6802_v5  ;;  %v5466_v5 = vld [vmem:[%s9013_s2 + $0x30] sm:$0xff] }
 0x20e   : > { %2717 = vmatpush.bf16.msrb.mxu2 %v5466_v5 }
 0x20f   : > { %v6926_v38 = vadd.f32 %v1555_v48, %v1467_v28  ;;  %v6928_v19 = vpop.f32.mrf.mxu1  ;;  %v1557_v11 = vpop.f32.mrf.mxu0 }
 0x210   : > { %9266 = vst [vmem:[#allocation145_spill] sm:$0xff] %v6928_v19 }
 0x211   : > { %9265 = vst [vmem:[#allocation144_spill] sm:$0xff] %v6926_v38 }
 0x213   : > { %v6930_v46 = vpop.f32.mrf.mxu3 }
 0x214   : > { %v1468_v3 = vpop.f32.mrf.mxu2 }
 0x215   : > { %v1469_v58 = vadd.f32 %v1468_v3, %v6821_v16 }
 0x217   : > { %v6933_v44 = vadd.f32 %v1557_v11, %v1469_v58  ;;  %v6935_v24 = vpop.f32.mrf.mxu1  ;;  %v1560_v25 = vpop.f32.mrf.mxu0  ;;  %v5474_v58 = vld [vmem:[%s9013_s2 + $0x70] sm:$0xff] }
 0x218   : > { %9268 = vst [vmem:[#allocation147_spill] sm:$0xff] %v6935_v24  ;;  %1950 = vmatmul.bf16.gmra.mxu3 %v6466_v49  ;;  %2806 = vmatpush.bf16.msrb.mxu0 %v5474_v58 }
 0x219   : > { %9267 = vst [vmem:[#allocation146_spill] sm:$0xff] %v6933_v44  ;;  %5116 = vmatmul.msk.bf16.vlgmr.msra.gmra.mxu2 %vm1010_vm1, %v5995_v30 }
 0x21a   : > { %1851 = vmatmul.bf16.gmra.mxu1 %v6135_v43  ;;  %2108 = vmatmul.bf16.vlgmr.msra.gmra.mxu0 %v6054_v62 }
 0x21b   : > { %v6945_v48 = vpop.f32.mrf.mxu3 }
 0x21c   : > { %v1471_v16 = vpop.f32.mrf.mxu2 }
 0x21d   : > { %v1472_v54 = vadd.f32 %v1471_v16, %v6843_v0 }
 0x21f   : > { %v6948_v28 = vadd.f32 %v1560_v25, %v1472_v54  ;;  %v6950_v11 = vpop.f32.mrf.mxu1  ;;  %v1562_v3 = vpop.f32.mrf.mxu0 }
 0x221   : > { %9269 = vst [vmem:[#allocation148_spill] sm:$0xff] %v6948_v28 }
 0x223   : > { %v6955_v44 = vpop.f32.mrf.mxu3 }
 0x224   : > { %v1473_v38 = vpop.f32.mrf.mxu2 }
 0x225   : > { %v1474_v24 = vadd.f32 %v1473_v38, %v6856_v15 }
 0x227   : > { %v6958_v19 = vadd.f32 %v1562_v3, %v1474_v24  ;;  %v6960_v49 = vpop.f32.mrf.mxu1  ;;  %v1565_v0 = vpop.f32.mrf.mxu0 }
 0x228   : > { %9271 = vst [vmem:[#allocation150_spill] sm:$0xff] %v6960_v49  ;;  %1955 = vmatmul.bf16.gmra.mxu3 %v6503_v39 }
 0x229   : > { %9270 = vst [vmem:[#allocation149_spill] sm:$0xff] %v6958_v19  ;;  %5117 = vmatmul.msk.bf16.gmra.mxu2 %vm1010_vm1, %v6050_v60 }
 0x22a   : > { %1856 = vmatmul.bf16.gmra.mxu1 %v6187_v10  ;;  %2113 = vmatmul.bf16.gmra.mxu0 %v6083_v14 }
 0x22b   : > { %v6967_v25 = vpop.f32.mrf.mxu3 }
 0x22c   : > { %v1476_v5 = vpop.f32.mrf.mxu2 }
 0x22d   : > { %v1477_v15 = vadd.f32 %v1476_v5, %v6872_v29  ;;  %v5465_v29 = vld [vmem:[%s9013_s2 + $0x28] sm:$0xff] }
 0x22e   : > { %2718 = vmatpush.bf16.msrb.mxu2 %v5465_v29 }
 0x22f   : > { %v6970_v38 = vadd.f32 %v1565_v0, %v1477_v15  ;;  %v6972_v24 = vpop.f32.mrf.mxu1  ;;  %v1567_v16 = vpop.f32.mrf.mxu0 }
 0x230   : > { %9273 = vst [vmem:[#allocation152_spill] sm:$0xff] %v6972_v24 }
 0x231   : > { %9272 = vst [vmem:[#allocation151_spill] sm:$0xff] %v6970_v38 }
 0x233   : > { %v6974_v54 = vpop.f32.mrf.mxu3 }
 0x234   : > { %v1478_v3 = vpop.f32.mrf.mxu2 }
 0x235   : > { %v1479_v58 = vadd.f32 %v1478_v3, %v6879_v57 }
 0x237   : > { %v6977_v19 = vadd.f32 %v1567_v16, %v1479_v58  ;;  %v6979_v28 = vpop.f32.mrf.mxu1  ;;  %v1570_v49 = vpop.f32.mrf.mxu0  ;;  %v5473_v58 = vld [vmem:[%s9013_s2 + $0x68] sm:$0xff] }
 0x238   : > { %9275 = vst [vmem:[#allocation154_spill] sm:$0xff] %v6979_v28  ;;  %1960 = vmatmul.bf16.gmra.mxu3 %v6534_v32  ;;  %2807 = vmatpush.bf16.msrb.mxu0 %v5473_v58 }
 0x239   : > { %9274 = vst [vmem:[#allocation153_spill] sm:$0xff] %v6977_v19  ;;  %5118 = vmatmul.msk.bf16.gmra.mxu2 %vm1010_vm1, %v6079_v12 }
 0x23a   : > { %1861 = vmatmul.bf16.gmra.mxu1 %v6239_v47  ;;  %2118 = vmatmul.bf16.gmra.mxu0 %v6135_v43 }
 0x23b   : > { %v6989_v0 = vpop.f32.mrf.mxu3 }
 0x23c   : > { %v1481_v57 = vpop.f32.mrf.mxu2 }
 0x23d   : > { %v1482_v5 = vadd.f32 %v1481_v57, %v6900_v1  ;;  %v5104_v57 = vld [vmem:[%s9012_s1 + $0x248] sm:$0xf0] }
 0x23f   : > { %v6992_v15 = vadd.f32 %v1570_v49, %v1482_v5  ;;  %v6994_v16 = vpop.f32.mrf.mxu1  ;;  %v1572_v3 = vpop.f32.mrf.mxu0 }
 0x241   : > { %9276 = vst [vmem:[#allocation155_spill] sm:$0xff] %v6992_v15 }
 0x243   : > { %v6999_v19 = vpop.f32.mrf.mxu3 }
 0x244   : > { %v1483_v38 = vpop.f32.mrf.mxu2 }
 0x245   : > { %v1484_v28 = vadd.f32 %v1483_v38, %v6911_v55 }
 0x247   : > { %v7002_v24 = vadd.f32 %v1572_v3, %v1484_v28  ;;  %v7004_v32 = vpop.f32.mrf.mxu1  ;;  %v1575_v1 = vpop.f32.mrf.mxu0  ;;  %v5456_v28 = vld [vmem:[%s9012_s1 + $0x244] sm:$0xf] }
 0x248   : > { %9278 = vst [vmem:[#allocation157_spill] sm:$0xff] %v7004_v32  ;;  %1965 = vmatmul.bf16.gmra.mxu3 %v6571_v4  ;;  %v5107_v58 = vor.u32 %v5456_v28, %v5104_v57  ;;  %v5464_v28 = vld [vmem:[%s9013_s2 + $0x20] sm:$0xff] }
 0x249   : > { %9277 = vst [vmem:[#allocation156_spill] sm:$0xff] %v7002_v24  ;;  %5119 = vmatmul.msk.bf16.gmra.mxu2 %vm1010_vm1, %v6131_v41 }
 0x24a   : > { %1866 = vmatmul.bf16.gmra.mxu1 %v6293_v22  ;;  %2123 = vmatmul.bf16.gmra.mxu0 %v6187_v10 }
 0x24b   : > { %v7011_v49 = vpop.f32.mrf.mxu3  ;;  %2284 = vmatpush.bf16.msrb.mxu3 %v5107_v58  ;;  %2719 = vmatpush.bf16.msrb.mxu2 %v5464_v28 }
 0x24c   : > { %v1486_v29 = vpop.f32.mrf.mxu2 }
 0x24d   : > { %v1487_v55 = vadd.f32 %v1486_v29, %v6923_v17 }
 0x24f   : > { %v7014_v38 = vadd.f32 %v1575_v1, %v1487_v55  ;;  %v7022_v5 = vpop.f32.mrf.mxu1  ;;  %v1577_v3 = vpop.f32.mrf.mxu0 }
 0x250   : > { %9280 = vst [vmem:[#allocation159_spill] sm:$0xff] %v7022_v5 }
 0x251   : > { %9279 = vst [vmem:[#allocation158_spill] sm:$0xff] %v7014_v38 }
 0x253   : > { %v7024_v24 = vpop.f32.mrf.mxu3 }
 0x254   : > { %v1488_v15 = vpop.f32.mrf.mxu2 }
 0x255   : > { %v1489_v17 = vadd.f32 %v1488_v15, %v6930_v46 }
 0x257   : > { %v7027_v1 = vadd.f32 %v1577_v3, %v1489_v17  ;;  %v7029_v29 = vpop.f32.mrf.mxu1  ;;  %v1580_v55 = vpop.f32.mrf.mxu0 }
 0x258   : > { %9282 = vst [vmem:[#allocation161_spill] sm:$0xff] %v7029_v29  ;;  %1970 = vmatmul.bf16.gmra.mxu3 %v6602_v21 }
 0x259   : > { %9281 = vst [vmem:[#allocation160_spill] sm:$0xff] %v7027_v1  ;;  %5120 = vmatmul.msk.bf16.gmra.mxu2 %vm1010_vm1, %v6183_v8  ;;  %v5472_v1 = vld [vmem:[%s9013_s2 + $0x60] sm:$0xff] }
 0x25a   : > { %1871 = vmatmul.bf16.gmra.mxu1 %v6316_v36  ;;  %2128 = vmatmul.bf16.gmra.mxu0 %v6239_v47 }
 0x25b   : > { %v1931_v46 = vpop.f32.mrf.mxu3  ;;  %2808 = vmatpush.bf16.msrb.mxu0 %v5472_v1 }
 0x25c   : > { %v1491_v57 = vpop.f32.mrf.mxu2 }
 0x25d   : > { %v1492_v15 = vadd.f32 %v1491_v57, %v6945_v48 }
 0x25f   : > { %v7040_v3 = vadd.f32 %v1580_v55, %v1492_v15  ;;  %v7042_v58 = vpop.f32.mrf.mxu1  ;;  %v1582_v17 = vpop.f32.mrf.mxu0 }
 0x260   : > { %9284 = vst [vmem:[#allocation163_spill] sm:$0xff] %v7042_v58 }
 0x261   : > { %9283 = vst [vmem:[#allocation162_spill] sm:$0xff] %v7040_v3  ;;  %v5452_v3 = vld [vmem:[%s9012_s1 + $0x224] sm:$0xf] }
 0x263   : > { %v1933_v29 = vpop.f32.mrf.mxu3 }
 0x264   : > { %v1493_v38 = vpop.f32.mrf.mxu2 }
 0x265   : > { %v1494_v5 = vadd.f32 %v1493_v38, %v6955_v44 }
 0x267   : > { %v7048_v21 = vadd.f32 %v1582_v17, %v1494_v5  ;;  %v7050_v32 = vpop.f32.mrf.mxu1  ;;  %v1585_v28 = vpop.f32.mrf.mxu0 }
 0x268   : > { %9286 = vst [vmem:[#allocation165_spill] sm:$0xff] %v7050_v32  ;;  %1975 = vmatmul.bf16.gmra.mxu3 %v6639_v35  ;;  %v5088_v32 = vld [vmem:[%s9012_s1 + $0x228] sm:$0xf0] }
 0x269   : > { %9285 = vst [vmem:[#allocation164_spill] sm:$0xff] %v7048_v21  ;;  %5121 = vmatmul.msk.bf16.gmra.mxu2 %vm1010_vm1, %v6235_v40 }
 0x26a   : > { %1876 = vmatmul.bf16.gmra.mxu1 %v6333_v53  ;;  %2133 = vmatmul.bf16.gmra.mxu0 %v6293_v22 }
 0x26b   : > { %v1936_v1 = vpop.f32.mrf.mxu3 }
 0x26c   : > { %v1496_v48 = vpop.f32.mrf.mxu2 }
 0x26d   : > { %v1497_v55 = vadd.f32 %v1496_v48, %v6967_v25  ;;  %v5091_v48 = vor.u32 %v5452_v3, %v5088_v32 }
 0x26f   : > { %v7058_v57 = vadd.f32 %v1585_v28, %v1497_v55  ;;  %v7060_v44 = vpop.f32.mrf.mxu1  ;;  %v1587_v38 = vpop.f32.mrf.mxu0  ;;  %2189 = vmatpush.bf16.msrb.mxu1 %v5091_v48 }
 0x270   : > { %9288 = vst [vmem:[#allocation167_spill] sm:$0xff] %v7060_v44 }
 0x271   : > { %9287 = vst [vmem:[#allocation166_spill] sm:$0xff] %v7058_v57 }
 0x273   : > { %v1938_v15 = vpop.f32.mrf.mxu3 }
 0x274   : > { %v1498_v5 = vpop.f32.mrf.mxu2 }
 0x275   : > { %v1499_v17 = vadd.f32 %v1498_v5, %v6974_v54  ;;  %v5463_v54 = vld [vmem:[%s9013_s2 + $0x18] sm:$0xff] }
 0x276   : > { %2720 = vmatpush.bf16.msrb.mxu2 %v5463_v54 }
 0x277   : > { %v7063_v21 = vadd.f32 %v1587_v38, %v1499_v17  ;;  %v1590_v25 = vpop.f32.mrf.mxu0  ;;  %v1842_v28 = vpop.f32.mrf.mxu1 }
 0x278   : > { %v1932_v55 = vadd.f32 %v1931_v46, %v1842_v28  ;;  %1980 = vmatmul.bf16.gmra.mxu3 %v6664_v7 }
 0x279   : > { %9289 = vst [vmem:[#allocation168_spill] sm:$0xff] %v7063_v21  ;;  %5122 = vmatmul.msk.bf16.gmra.mxu2 %vm1010_vm1, %v6291_v20  ;;  %v5471_v21 = vld [vmem:[%s9013_s2 + $0x58] sm:$0xff] }
 0x27a   : > { %1881 = vmatmul.bf16.gmra.mxu1 %v6377_v27  ;;  %2138 = vmatmul.bf16.gmra.mxu0 %v6316_v36 }
 0x27b   : > { %v1941_v5 = vpop.f32.mrf.mxu3  ;;  %2809 = vmatpush.bf16.msrb.mxu0 %v5471_v21 }
 0x27c   : > { %v1501_v38 = vpop.f32.mrf.mxu2 }
 0x27d   : > { %v1502_v32 = vadd.f32 %v1501_v38, %v6989_v0 }
 0x27f   : > { %v7080_v46 = vadd.f32 %v1590_v25, %v1502_v32  ;;  %v1592_v3 = vpop.f32.mrf.mxu0  ;;  %v1844_v17 = vpop.f32.mrf.mxu1 }
 0x280   : > { %v1934_v28 = vadd.f32 %v1933_v29, %v1844_v17 }
 0x281   : > { %9290 = vst [vmem:[#allocation169_spill] sm:$0xff] %v7080_v46 }
 0x283   : > { %v1943_v57 = vpop.f32.mrf.mxu3 }
 0x284   : > { %v1503_v48 = vpop.f32.mrf.mxu2 }
 0x285   : > { %v1504_v7 = vadd.f32 %v1503_v48, %v6999_v19 }
 0x287   : > { %v7086_v44 = vadd.f32 %v1592_v3, %v1504_v7  ;;  %v1595_v58 = vpop.f32.mrf.mxu0  ;;  %v1847_v54 = vpop.f32.mrf.mxu1 }
 0x288   : > { %v7088_v35 = vadd.f32 %v1936_v1, %v1847_v54  ;;  %1985 = vmatmul.bf16.gmra.mxu3 %v6705_v6 }
 0x289   : > { %9291 = vst [vmem:[#allocation170_spill] sm:$0xff] %v7086_v44  ;;  %5123 = vmatmul.msk.bf16.gmra.mxu2 %vm1010_vm1, %v6314_v34 }
 0x28a   : > { %1886 = vmatmul.bf16.gmra.mxu1 %v6056_v63  ;;  %2143 = vmatmul.bf16.gmra.mxu0 %v6333_v53  ;;  %v9305_v53 = vld [vmem:[#allocation36_spill] sm:$0xff] }
 0x28b   : > { %v1946_v0 = vpop.f32.mrf.mxu3 }
 0x28c   : > { %v1506_v21 = vpop.f32.mrf.mxu2 }
 0x28d   : > { %v1507_v29 = vadd.f32 %v1506_v21, %v7011_v49  ;;  %v5450_v49 = vld [vmem:[%s9012_s1 + $0x214] sm:$0xf] }
 0x28f   : > { %v7096_v19 = vadd.f32 %v1595_v58, %v1507_v29  ;;  %v1597_v7 = vpop.f32.mrf.mxu0  ;;  %v1849_v25 = vpop.f32.mrf.mxu1  ;;  %v5462_v58 = vld [vmem:[%s9013_s2 + $0x10] sm:$0xff] }
 0x290   : > { %v7098_v38 = vadd.f32 %v1938_v15, %v1849_v25  ;;  %2721 = vmatpush.bf16.msrb.mxu2 %v5462_v58  ;;  %v9046_v25 = vlaneseq }
 0x291   : > { %9292 = vst [vmem:[#allocation171_spill] sm:$0xff] %v7096_v19  ;;  %v9298_v19 = vld [vmem:[#allocation100_spill] sm:$0xff] }
 0x293   : > { %v1948_v32 = vpop.f32.mrf.mxu3 }
 0x294   : > { %v1508_v1 = vpop.f32.mrf.mxu2 }
 0x295   : > { %v1509_v3 = vadd.f32 %v1508_v1, %v7024_v24  ;;  %v5080_v24 = vld [vmem:[%s9012_s1 + $0x218] sm:$0xf0] }
 0x296   : > { %v5083_v15 = vor.u32 %v5450_v49, %v5080_v24  ;;  %v5470_v49 = vld [vmem:[%s9013_s2 + $0x50] sm:$0xff] }
 0x297   : > { %v7101_v17 = vadd.f32 %v1597_v7, %v1509_v3  ;;  %v1852_v48 = vpop.f32.mrf.mxu1  ;;  %v7103_v54 = vpop.f32.mrf.mxu0  ;;  %v9297_v24 = vld [vmem:[#allocation41_spill] sm:$0xff]  ;;  %2810 = vmatpush.bf16.msrb.mxu0 %v5470_v49 }
 0x298   : > { %v7105_v44 = vadd.f32 %v1941_v5, %v1852_v48  ;;  %1990 = vmatmul.bf16.gmra.mxu3 %v6746_v18  ;;  %v9294_v5 = vld [vmem:[#allocation16_spill] sm:$0xff]  ;;  %2190 = vmatpush.bf16.msrb.mxu1 %v5083_v15  ;;  %v1165_v46 = vadd.f32 %v9298_v19, %v9297_v24 }
 0x299   : > { %9293 = vst [vmem:[#allocation172_spill] sm:$0xff] %v7101_v17  ;;  %5124 = vmatmul.msk.bf16.gmra.mxu2 %vm1010_vm1, %v6331_v52  ;;  %v7128_v17 = vshrl.u32 %v9046_v25, 7 }
 0x29a   : > { %1891 = vmatmul.bf16.gmra.mxu1 %v9294_v5  ;;  %2148 = vmatmul.bf16.gmra.mxu0 %v6377_v27 }
 0x29b   : > { %v1951_v21 = vpop.f32.mrf.mxu3  ;;  %vm2433_vm2 = vcmp.lt.s32.totalorder %v7128_v17, 7  ;;  %vm3015_vm10 = vcmp.lt.s32.totalorder %v7128_v17, 6  ;;  %vm3533_vm11 = vcmp.lt.s32.totalorder %v7128_v17, 5  ;;  %v4314_v17 = vld [vmem:[#allocation3 + $0x188] sm:$0xff] }
 0x29c   : > { %v2020_v29 = vpop.f32.mrf.mxu2 }
 0x29d   : > { %v7121_v7 = vadd.f32 %v2020_v29, %v1932_v55 }
 0x29f   : > { %9295 = vst [vmem:[#allocation173_spill] sm:$0xff] %v7121_v7  ;;  %v1854_v1 = vpop.f32.mrf.mxu1  ;;  %v7123_v3 = vpop.f32.mrf.mxu0 }
 0x2a0   : > { %9296 = vst [vmem:[#allocation174_spill] sm:$0xff] %v7123_v3  ;;  %v7125_v48 = vadd.f32 %v1943_v57, %v1854_v1  ;;  %v9051_v57 = vrot.slane %v7121_v7, 1  ;;  %v9299_v1 = vld [vmem:[#allocation34_spill] sm:$0xff] }
 0x2a1   : > { %v1254_v25 = vadd.f32 %v9299_v1, %v1165_v46  ;;  %v5096_v46 = vld [vmem:[%s9012_s1 + $0x238] sm:$0xf0] }
 0x2a3   : > { %v7135_v15 = vpop.f32.mrf.mxu3 }
 0x2a4   : > { %v2022_v55 = vpop.f32.mrf.mxu2 }
 0x2a5   : > { %v2023_v58 = vadd.f32 %v2022_v55, %v1934_v28  ;;  %v5454_v28 = vld [vmem:[%s9012_s1 + $0x234] sm:$0xf] }
 0x2a6   : > { %v5099_v49 = vor.u32 %v5454_v28, %v5096_v46  ;;  %v9307_v46 = vld [vmem:[#allocation50_spill] sm:$0xff] }
 0x2a7   : > { %v2369_v29 = vrot.slane %v2023_v58, 1  ;;  %v1857_v18 = vpop.f32.mrf.mxu1  ;;  %v7140_v6 = vpop.f32.mrf.mxu0  ;;  %v9302_v58 = vld [vmem:[#allocation19_spill] sm:$0xff] }
 0x2a8   : > { %9300 = vst [vmem:[#allocation41_spill] sm:$0xff] %v7140_v6  ;;  %v7146_v24 = vadd.f32 %v1946_v0, %v1857_v18  ;;  %1995 = vmatmul.bf16.gmra.mxu3 %v6787_v50  ;;  %v9303_v18 = vld [vmem:[#allocation45_spill] sm:$0xff]  ;;  %v9304_v0 = vld [vmem:[#allocation103_spill] sm:$0xff] }
 0x2a9   : > { %v2494_v19 = vsel %vm2433_vm2, %v9051_v57, %v2369_v29  ;;  %5125 = vmatmul.msk.bf16.gmra.mxu2 %vm1010_vm1, %v6375_v26  ;;  %v1167_v1 = vadd.f32 %v9304_v0, %v9303_v18  ;;  %2285 = vmatpush.bf16.msrb.mxu3 %v5099_v49  ;;  %v9308_v18 = vld [vmem:[#allocation107_spill] sm:$0xff] }
 0x2aa   : > { %v7157_v55 = vadd.f32 %v2494_v19, %v1254_v25  ;;  %1896 = vmatmul.bf16.gmra.mxu1 %v9302_v58  ;;  %2153 = vmatmul.bf16.gmra.mxu0 %v6056_v63  ;;  %v1170_v0 = vadd.f32 %v9308_v18, %v9307_v46  ;;  %v9312_v46 = vld [vmem:[#allocation54_spill] sm:$0xff] }
 0x2ab   : > { %v1956_v57 = vpop.f32.mrf.mxu3  ;;  %v1256_v6 = vadd.f32 %v9305_v53, %v1167_v1  ;;  %v9309_v53 = vld [vmem:[#allocation43_spill] sm:$0xff]  ;;  %v9313_v18 = vld [vmem:[#allocation110_spill] sm:$0xff] }
 0x2ac   : > { %9301 = vst [vmem:[#allocation100_spill] sm:$0xff] %v7157_v55  ;;  %v2025_v50 = vpop.f32.mrf.mxu2 }
 0x2ad   : > { %v2026_v27 = vadd.f32 %v2025_v50, %v7088_v35  ;;  %v1259_v50 = vadd.f32 %v9309_v53, %v1170_v0  ;;  %v1172_v0 = vadd.f32 %v9313_v18, %v9312_v46 }
 0x2af   : > { %v2371_v7 = vrot.slane %v2026_v27, 1  ;;  %v1859_v3 = vpop.f32.mrf.mxu1  ;;  %v7165_v36 = vpop.f32.mrf.mxu0 }
 0x2b0   : > { %v7169_v19 = vadd.f32 %v1948_v32, %v1859_v3 }
 0x2b1   : > { %v2492_v25 = vsel %vm2433_vm2, %v2369_v29, %v2371_v7  ;;  %v5461_v29 = vld [vmem:[%s9013_s2 + $0x8] sm:$0xff] }
 0x2b2   : > { %v7171_v28 = vadd.f32 %v2492_v25, %v1256_v6  ;;  %v5448_v6 = vld [vmem:[%s9012_s1 + $0x204] sm:$0xf]  ;;  %v9311_v25 = vld [vmem:[#allocation22_spill] sm:$0xff]  ;;  %2722 = vmatpush.bf16.msrb.mxu2 %v5461_v29  ;;  %v5469_v29 = vld [vmem:[%s9013_s2 + $0x48] sm:$0xff] }
 0x2b3   : > { %v7175_v55 = vpop.f32.mrf.mxu3  ;;  %2811 = vmatpush.bf16.msrb.mxu0 %v5469_v29 }
 0x2b4   : > { %9306 = vst [vmem:[#allocation34_spill] sm:$0xff] %v7171_v28  ;;  %v2027_v49 = vpop.f32.mrf.mxu2  ;;  %v9314_v28 = vld [vmem:[#allocation47_spill] sm:$0xff] }
 0x2b5   : > { %v2028_v27 = vadd.f32 %v2027_v49, %v7098_v38  ;;  %v5072_v38 = vld [vmem:[%s9012_s1 + $0x208] sm:$0xf0] }
 0x2b7   : > { %v2373_v35 = vrot.slane %v2028_v27, 1  ;;  %v1862_v1 = vpop.f32.mrf.mxu1  ;;  %v7179_v63 = vpop.f32.mrf.mxu0 }
 0x2b8   : > { %v7183_v3 = vadd.f32 %v1951_v21, %v1862_v1  ;;  %2000 = vmatmul.bf16.gmra.mxu3 %v6834_v56  ;;  %v1261_v56 = vadd.f32 %v9314_v28, %v1172_v0 }
 0x2b9   : > { %v2490_v32 = vsel %vm2433_vm2, %v2371_v7, %v2373_v35  ;;  %5126 = vmatmul.msk.bf16.gmra.mxu2 %vm1010_vm1, %v5997_v31  ;;  %v5075_v7 = vor.u32 %v5448_v6, %v5072_v38 }
 0x2ba   : > { %v7197_v21 = vadd.f32 %v2490_v32, %v1259_v50  ;;  %1901 = vmatmul.bf16.gmra.mxu1 %v9311_v25  ;;  %2158 = vmatmul.bf16.gmra.mxu0 %v9294_v5 }
 0x2bb   : > { %v7203_v49 = vpop.f32.mrf.mxu3  ;;  %2191 = vmatpush.bf16.msrb.mxu1 %v5075_v7  ;;  %v9316_v7 = vld [vmem:[#allocation58_spill] sm:$0xff] }
 0x2bc   : > { %9310 = vst [vmem:[#allocation45_spill] sm:$0xff] %v7197_v21  ;;  %v2030_v27 = vpop.f32.mrf.mxu2  ;;  %v5442_v21 = vld [vmem:[%s9012_s1 + $0x1d4] sm:$0xf] }
 0x2bd   : > { %v2031_v53 = vadd.f32 %v2030_v27, %v7105_v44  ;;  %v9317_v44 = vld [vmem:[#allocation113_spill] sm:$0xff] }
 0x2be   : > { %v1175_v18 = vadd.f32 %v9317_v44, %v9316_v7 }
 0x2bf   : > { %v2375_v1 = vrot.slane %v2031_v53, 1  ;;  %v1864_v6 = vpop.f32.mrf.mxu1  ;;  %v7207_v50 = vpop.f32.mrf.mxu0 }
 0x2c0   : > { %v7212_v38 = vadd.f32 %v7135_v15, %v1864_v6  ;;  %v5446_v15 = vld [vmem:[%s9012_s1 + $0x1f4] sm:$0xf]  ;;  %v9318_v6 = vld [vmem:[#allocation52_spill] sm:$0xff] }
 0x2c1   : > { %v2488_v32 = vsel %vm2433_vm2, %v2373_v35, %v2375_v1 }
 0x2c2   : > { %v7214_v46 = vadd.f32 %v2488_v32, %v1261_v56  ;;  %v5064_v56 = vld [vmem:[%s9012_s1 + $0x1f8] sm:$0xf0]  ;;  %v1264_v32 = vadd.f32 %v9318_v6, %v1175_v18  ;;  %v5056_v18 = vld [vmem:[%s9012_s1 + $0x1e8] sm:$0xf0] }
 0x2c3   : > { %v7221_v27 = vpop.f32.mrf.mxu3  ;;  %v5067_v53 = vor.u32 %v5446_v15, %v5064_v56 }
 0x2c4   : > { %9315 = vst [vmem:[#allocation103_spill] sm:$0xff] %v7214_v46  ;;  %v2032_v28 = vpop.f32.mrf.mxu2 }
 0x2c5   : > { %v2033_v0 = vadd.f32 %v2032_v28, %v7125_v48  ;;  %2192 = vmatpush.bf16.msrb.mxu1 %v5067_v53  ;;  %v5444_v48 = vld [vmem:[%s9012_s1 + $0x1e4] sm:$0xf] }
 0x2c7   : > { %v2377_v35 = vrot.slane %v2033_v0, 1  ;;  %v1867_v46 = vpop.f32.mrf.mxu1  ;;  %v7231_v7 = vpop.f32.mrf.mxu0  ;;  %v9320_v0 = vld [vmem:[#allocation25_spill] sm:$0xff] }
 0x2c8   : > { %v7235_v44 = vadd.f32 %v1956_v57, %v1867_v46  ;;  %2005 = vmatmul.bf16.gmra.mxu3 %v6863_v33  ;;  %v5059_v57 = vor.u32 %v5444_v48, %v5056_v18  ;;  %v9322_v46 = vld [vmem:[#allocation115_spill] sm:$0xff]  ;;  %v9323_v48 = vld [vmem:[#allocation56_spill] sm:$0xff] }
 0x2c9   : > { %v2486_v29 = vsel %vm2433_vm2, %v2375_v1, %v2377_v35  ;;  %5127 = vmatmul.msk.bf16.gmra.mxu2 %vm1010_vm1, %v6052_v61  ;;  %v9321_v1 = vld [vmem:[#allocation62_spill] sm:$0xff] }
 0x2ca   : > { %v7246_v28 = vadd.f32 %v2486_v29, %v1264_v32  ;;  %1906 = vmatmul.bf16.gmra.mxu1 %v9320_v0  ;;  %2163 = vmatmul.bf16.gmra.mxu0 %v9302_v58  ;;  %v1177_v15 = vadd.f32 %v9322_v46, %v9321_v1  ;;  %v5048_v32 = vld [vmem:[%s9012_s1 + $0x1d8] sm:$0xf0] }
 0x2cb   : > { %v7252_v56 = vpop.f32.mrf.mxu3  ;;  %2193 = vmatpush.bf16.msrb.mxu1 %v5059_v57 }
 0x2cc   : > { %9319 = vst [vmem:[#allocation36_spill] sm:$0xff] %v7246_v28  ;;  %v2035_v53 = vpop.f32.mrf.mxu2  ;;  %v5051_v28 = vor.u32 %v5442_v21, %v5048_v32  ;;  %v1266_v18 = vadd.f32 %v9323_v48, %v1177_v15  ;;  %v5040_v21 = vld [vmem:[%s9012_s1 + $0x1c8] sm:$0xf0]  ;;  %v9327_v32 = vld [vmem:[#allocation118_spill] sm:$0xff] }
 0x2cd   : > { %v2036_v6 = vadd.f32 %v2035_v53, %v7146_v24  ;;  %v5440_v53 = vld [vmem:[%s9012_s1 + $0x1c4] sm:$0xf] }
 0x2ce   : > { %v5043_v15 = vor.u32 %v5440_v53, %v5040_v21 }
 0x2cf   : > { %v2379_v29 = vrot.slane %v2036_v6, 1  ;;  %v1869_v33 = vpop.f32.mrf.mxu1  ;;  %v7262_v1 = vpop.f32.mrf.mxu0  ;;  %2194 = vmatpush.bf16.msrb.mxu1 %v5051_v28  ;;  %v9326_v6 = vld [vmem:[#allocation67_spill] sm:$0xff]  ;;  %v5032_v28 = vld [vmem:[%s9012_s1 + $0x1b8] sm:$0xf0] }
 0x2d0   : > { %9324 = vst [vmem:[#allocation50_spill] sm:$0xff] %v7262_v1  ;;  %v7267_v24 = vadd.f32 %v7175_v55, %v1869_v33  ;;  %v1180_v48 = vadd.f32 %v9327_v32, %v9326_v6  ;;  %v5438_v55 = vld [vmem:[%s9012_s1 + $0x1b4] sm:$0xf]  ;;  %v9331_v32 = vld [vmem:[#allocation27_spill] sm:$0xff] }
 0x2d1   : > { %v2484_v46 = vsel %vm2433_vm2, %v2377_v35, %v2379_v29 }
 0x2d2   : > { %v7269_v57 = vadd.f32 %v2484_v46, %v1266_v18  ;;  %v5035_v46 = vor.u32 %v5438_v55, %v5032_v28 }
 0x2d3   : > { %v1968_v58 = vpop.f32.mrf.mxu3  ;;  %2195 = vmatpush.bf16.msrb.mxu1 %v5043_v15  ;;  %v5460_v15 = vld [vmem:[%s9013_s2] sm:$0xff] }
 0x2d4   : > { %9325 = vst [vmem:[#allocation107_spill] sm:$0xff] %v7269_v57  ;;  %v2037_v35 = vpop.f32.mrf.mxu2  ;;  %v9328_v57 = vld [vmem:[#allocation60_spill] sm:$0xff]  ;;  %2723 = vmatpush.bf16.msrb.mxu2 %v5460_v15  ;;  %v5468_v15 = vld [vmem:[%s9013_s2 + $0x40] sm:$0xff] }
 0x2d5   : > { %v2038_v33 = vadd.f32 %v2037_v35, %v7169_v19  ;;  %v1269_v53 = vadd.f32 %v9328_v57, %v1180_v48  ;;  %2812 = vmatpush.bf16.msrb.mxu0 %v5468_v15 }
 0x2d7   : > { %v2381_v18 = vrot.slane %v2038_v33, 1  ;;  %v1872_v21 = vpop.f32.mrf.mxu1  ;;  %v7287_v5 = vpop.f32.mrf.mxu0  ;;  %2196 = vmatpush.bf16.msrb.mxu1 %v5035_v46 }
 0x2d8   : > { %9329 = vst [vmem:[#allocation43_spill] sm:$0xff] %v7287_v5  ;;  %v7292_v19 = vadd.f32 %v7203_v49, %v1872_v21  ;;  %5132 = vmatmul.msk.bf16.vlgmr.msrb.gmra.mxu3 %vm1010_vm1, %v5995_v30  ;;  %v9333_v49 = vld [vmem:[#allocation120_spill] sm:$0xff] }
 0x2d9   : > { %v2482_v6 = vsel %vm2433_vm2, %v2379_v29, %v2381_v18  ;;  %5128 = vmatmul.msk.bf16.gmra.mxu2 %vm1010_vm1, %v6081_v13  ;;  %v9332_v29 = vld [vmem:[#allocation71_spill] sm:$0xff]  ;;  %v9334_v21 = vld [vmem:[#allocation64_spill] sm:$0xff] }
 0x2da   : > { %v7301_v57 = vadd.f32 %v2482_v6, %v1269_v53  ;;  %1911 = vmatmul.bf16.gmra.mxu1 %v9331_v32  ;;  %2168 = vmatmul.bf16.gmra.mxu0 %v9311_v25  ;;  %v1182_v48 = vadd.f32 %v9333_v49, %v9332_v29  ;;  %v9336_v29 = vld [vmem:[#allocation76_spill] sm:$0xff] }
 0x2db   : > { %v1971_v35 = vpop.f32.mrf.mxu3 }
 0x2dc   : > { %9330 = vst [vmem:[#allocation54_spill] sm:$0xff] %v7301_v57  ;;  %v2040_v33 = vpop.f32.mrf.mxu2  ;;  %v1271_v30 = vadd.f32 %v9334_v21, %v1182_v48  ;;  %v9338_v57 = vld [vmem:[#allocation69_spill] sm:$0xff] }
 0x2dd   : > { %v2041_v55 = vadd.f32 %v2040_v33, %v7183_v3  ;;  %v9337_v3 = vld [vmem:[#allocation123_spill] sm:$0xff] }
 0x2de   : > { %v1185_v49 = vadd.f32 %v9337_v3, %v9336_v29  ;;  %v9342_v3 = vld [vmem:[#allocation73_spill] sm:$0xff] }
 0x2df   : > { %v2383_v28 = vrot.slane %v2041_v55, 1  ;;  %v1874_v5 = vpop.f32.mrf.mxu1  ;;  %v7309_v1 = vpop.f32.mrf.mxu0 }
 0x2e0   : > { %v7314_v53 = vadd.f32 %v7221_v27, %v1874_v5 }
 0x2e1   : > { %v2480_v46 = vsel %vm2433_vm2, %v2381_v18, %v2383_v28  ;;  %v1274_v18 = vadd.f32 %v9338_v57, %v1185_v49  ;;  %v9341_v57 = vld [vmem:[#allocation125_spill] sm:$0xff] }
 0x2e2   : > { %v7316_v6 = vadd.f32 %v2480_v46, %v1271_v30 }
 0x2e3   : > { %v1973_v33 = vpop.f32.mrf.mxu3 }
 0x2e4   : > { %9335 = vst [vmem:[#allocation110_spill] sm:$0xff] %v7316_v6  ;;  %v2042_v48 = vpop.f32.mrf.mxu2  ;;  %v9344_v6 = vld [vmem:[#allocation85_spill] sm:$0xff] }
 0x2e5   : > { %v2043_v55 = vadd.f32 %v2042_v48, %v7212_v38  ;;  %v9340_v38 = vld [vmem:[#allocation80_spill] sm:$0xff] }
 0x2e6   : > { %v1187_v15 = vadd.f32 %v9341_v57, %v9340_v38  ;;  %v1190_v38 = vadd.f32 %v6789_v59, %v9344_v6  ;;  %v5494_v59 = vld [vmem:[%s9014_s3 + $0x78] sm:$0xff]  ;;  %v9348_v6 = vld [vmem:[#allocation88_spill] sm:$0xff] }
 0x2e7   : > { %v2385_v21 = vrot.slane %v2043_v55, 1  ;;  %v1877_v25 = vpop.f32.mrf.mxu1  ;;  %v7325_v5 = vpop.f32.mrf.mxu0  ;;  %3323 = vmatpush.bf16.msra.mxu2 %v5494_v59 }
 0x2e8   : > { %v7330_v27 = vadd.f32 %v7252_v56, %v1877_v25  ;;  %5133 = vmatmul.msk.bf16.gmra.mxu3 %vm1010_vm1, %v6050_v60  ;;  %v1276_v49 = vadd.f32 %v9342_v3, %v1187_v15 }
 0x2e9   : > { %v2478_v30 = vsel %vm2433_vm2, %v2383_v28, %v2385_v21  ;;  %5129 = vmatmul.msk.bf16.gmra.mxu2 %vm1010_vm1, %v6133_v42 }
 0x2ea   : > { %v7336_v46 = vadd.f32 %v2478_v30, %v1274_v18  ;;  %1916 = vmatmul.bf16.gmra.mxu1 %v6318_v37  ;;  %2173 = vmatmul.bf16.gmra.mxu0 %v9320_v0 }
 0x2eb   : > { %v1976_v29 = vpop.f32.mrf.mxu3 }
 0x2ec   : > { %9339 = vst [vmem:[#allocation47_spill] sm:$0xff] %v7336_v46  ;;  %v2045_v28 = vpop.f32.mrf.mxu2 }
 0x2ed   : > { %v2046_v25 = vadd.f32 %v2045_v28, %v7235_v44 }
 0x2ef   : > { %v2387_v56 = vrot.slane %v2046_v25, 1  ;;  %v1879_v48 = vpop.f32.mrf.mxu1  ;;  %v7344_v55 = vpop.f32.mrf.mxu0  ;;  %v9345_v25 = vld [vmem:[#allocation78_spill] sm:$0xff] }
 0x2f0   : > { %v7348_v30 = vadd.f32 %v1968_v58, %v1879_v48  ;;  %v1279_v15 = vadd.f32 %v9345_v25, %v1190_v38  ;;  %v9350_v25 = vld [vmem:[#allocation82_spill] sm:$0xff] }
 0x2f1   : > { %v2476_v18 = vsel %vm2433_vm2, %v2385_v21, %v2387_v56 }
 0x2f2   : > { %v7350_v46 = vadd.f32 %v2476_v18, %v1276_v49 }
 0x2f3   : > { %v1978_v57 = vpop.f32.mrf.mxu3 }
 0x2f4   : > { %9343 = vst [vmem:[#allocation58_spill] sm:$0xff] %v7350_v46  ;;  %v2047_v60 = vpop.f32.mrf.mxu2 }
 0x2f5   : > { %v2048_v44 = vadd.f32 %v2047_v60, %v7267_v24  ;;  %v5486_v60 = vld [vmem:[%s9014_s3 + $0x38] sm:$0xff] }
 0x2f6   : > { %3234 = vmatpush.bf16.msra.mxu3 %v5486_v60  ;;  %v5314_v60 = vld [vmem:[%s9014_s3 + $0x90] sm:$0xf] }
 0x2f7   : > { %v2389_v28 = vrot.slane %v2048_v44, 1  ;;  %v1882_v3 = vpop.f32.mrf.mxu1  ;;  %v7356_v0 = vpop.f32.mrf.mxu0 }
 0x2f8   : > { %v7360_v58 = vadd.f32 %v1971_v35, %v1882_v3  ;;  %5134 = vmatmul.msk.bf16.gmra.mxu3 %vm1010_vm1, %v6079_v12  ;;  %v9347_v35 = vld [vmem:[#allocation33_spill] sm:$0xff] }
 0x2f9   : > { %v2474_v21 = vsel %vm2433_vm2, %v2387_v56, %v2389_v28  ;;  %5130 = vmatmul.msk.bf16.gmra.mxu2 %vm1010_vm1, %v6185_v9  ;;  %v9349_v56 = vld [vmem:[#allocation129_spill] sm:$0xff] }
 0x2fa   : > { %v7372_v24 = vadd.f32 %v2474_v21, %v1279_v15  ;;  %2178 = vmatmul.bf16.gmra.mxu0 %v9331_v32  ;;  %2197 = vmatmul.bf16.vlgmr.msrb.gmra.mxu1 %v9347_v35  ;;  %v1192_v49 = vadd.f32 %v9349_v56, %v9348_v6  ;;  %v9353_v6 = vld [vmem:[#allocation92_spill] sm:$0xff] }
 0x2fb   : > { %v1981_v48 = vpop.f32.mrf.mxu3  ;;  %v9354_v56 = vld [vmem:[#allocation132_spill] sm:$0xff] }
 0x2fc   : > { %9346 = vst [vmem:[#allocation113_spill] sm:$0xff] %v7372_v24  ;;  %v2050_v18 = vpop.f32.mrf.mxu2  ;;  %v1281_v3 = vadd.f32 %v9350_v25, %v1192_v49  ;;  %v1195_v49 = vadd.f32 %v9354_v56, %v9353_v6  ;;  %v9355_v25 = vld [vmem:[#allocation87_spill] sm:$0xff]  ;;  %v9360_v6 = vld [vmem:[#allocation134_spill] sm:$0xff] }
 0x2fd   : > { %v2051_v38 = vadd.f32 %v2050_v18, %v7292_v19  ;;  %v5497_v19 = vld [vmem:[%s9014_s3 + $0x90] sm:$0x30] }
 0x2fe   : > { %v5315_v59 = vor.u32 %v5497_v19, %v5314_v60  ;;  %v9358_v19 = vld [vmem:[#allocation40_spill] sm:$0xff] }
 0x2ff   : > { %v2391_v44 = vrot.slane %v2051_v38, 1  ;;  %v1884_v46 = vpop.f32.mrf.mxu1  ;;  %v7380_v12 = vpop.f32.mrf.mxu0 }
 0x300   : > { %9351 = vst [vmem:[#allocation52_spill] sm:$0xff] %v7380_v12  ;;  %v7384_v21 = vadd.f32 %v1973_v33, %v1884_v46  ;;  %v3232_v33 = vsel %vm1059_vm0, %v5315_v59, 0  ;;  %v9359_v59 = vld [vmem:[#allocation95_spill] sm:$0xff] }
 0x301   : > { %v2472_v15 = vsel %vm2433_vm2, %v2389_v28, %v2391_v44  ;;  %3417 = vmatpush.bf16.msra.mxu0 %v3232_v33  ;;  %v1197_v56 = vadd.f32 %v9360_v6, %v9359_v59 }
 0x302   : > { %v7386_v24 = vadd.f32 %v2472_v15, %v1281_v3  ;;  %v1284_v3 = vadd.f32 %v9355_v25, %v1195_v49 }
 0x303   : > { %v1983_v18 = vpop.f32.mrf.mxu3 }
 0x304   : > { %9352 = vst [vmem:[#allocation62_spill] sm:$0xff] %v7386_v24  ;;  %v2052_v38 = vpop.f32.mrf.mxu2 }
 0x305   : > { %v2053_v28 = vadd.f32 %v2052_v38, %v7314_v53 }
 0x307   : > { %v2393_v46 = vrot.slane %v2053_v28, 1  ;;  %v1887_v15 = vpop.f32.mrf.mxu1  ;;  %v7399_v24 = vpop.f32.mrf.mxu0  ;;  %v9361_v28 = vld [vmem:[#allocation90_spill] sm:$0xff] }
 0x308   : > { %9356 = vst [vmem:[#allocation115_spill] sm:$0xff] %v7399_v24  ;;  %v7403_v60 = vadd.f32 %v1976_v29, %v1887_v15  ;;  %5135 = vmatmul.msk.bf16.gmra.mxu3 %vm1010_vm1, %v6131_v41  ;;  %v1286_v33 = vadd.f32 %v9361_v28, %v1197_v56  ;;  %v9364_v41 = vld [vmem:[#allocation99_spill] sm:$0xff] }
 0x309   : > { %v2470_v32 = vsel %vm2433_vm2, %v2391_v44, %v2393_v46  ;;  %5131 = vmatmul.msk.bf16.gmra.mxu2 %vm1010_vm1, %v6237_v45 }
 0x30a   : > { %v7409_v53 = vadd.f32 %v2470_v32, %v1284_v3  ;;  %2183 = vmatmul.bf16.gmra.mxu0 %v6318_v37  ;;  %2202 = vmatmul.bf16.gmra.mxu1 %v9358_v19  ;;  %v9365_v37 = vld [vmem:[#allocation137_spill] sm:$0xff] }
 0x30b   : > { %v1986_v49 = vpop.f32.mrf.mxu3  ;;  %v1200_v24 = vadd.f32 %v9365_v37, %v9364_v41  ;;  %v5485_v41 = vld [vmem:[%s9014_s3 + $0x30] sm:$0xff] }
 0x30c   : > { %9357 = vst [vmem:[#allocation56_spill] sm:$0xff] %v7409_v53  ;;  %v2055_v38 = vpop.f32.mrf.mxu2  ;;  %3235 = vmatpush.bf16.msra.mxu3 %v5485_v41 }
 0x30d   : > { %v2056_v29 = vadd.f32 %v2055_v38, %v7330_v27  ;;  %v9366_v38 = vld [vmem:[#allocation94_spill] sm:$0xff] }
 0x30f   : > { %v2395_v44 = vrot.slane %v2056_v29, 1  ;;  %v1889_v25 = vpop.f32.mrf.mxu1  ;;  %v7417_v15 = vpop.f32.mrf.mxu0  ;;  %v1289_v29 = vadd.f32 %v9366_v38, %v1200_v24  ;;  %v9370_v24 = vld [vmem:[#allocation139_spill] sm:$0xff] }
 0x310   : > { %9362 = vst [vmem:[#allocation67_spill] sm:$0xff] %v7417_v15  ;;  %v1979_v3 = vadd.f32 %v1978_v57, %v1889_v25  ;;  %v9369_v57 = vld [vmem:[#allocation102_spill] sm:$0xff] }
 0x311   : > { %v2468_v32 = vsel %vm2433_vm2, %v2393_v46, %v2395_v44 }
 0x312   : > { %v7421_v53 = vadd.f32 %v2468_v32, %v1286_v33 }
 0x313   : > { %v1988_v59 = vpop.f32.mrf.mxu3 }
 0x314   : > { %9363 = vst [vmem:[#allocation118_spill] sm:$0xff] %v7421_v53  ;;  %v2057_v6 = vpop.f32.mrf.mxu2 }
 0x315   : > { %v2058_v12 = vadd.f32 %v2057_v6, %v7348_v30  ;;  %v9368_v30 = vld [vmem:[#allocation49_spill] sm:$0xff] }
 0x316   : > { %v9371_v6 = vld [vmem:[#allocation97_spill] sm:$0xff] }
 0x317   : > { %v2397_v27 = vrot.slane %v2058_v12, 1  ;;  %v1892_v56 = vpop.f32.mrf.mxu1  ;;  %v7427_v28 = vpop.f32.mrf.mxu0  ;;  %v5493_v12 = vld [vmem:[%s9014_s3 + $0x70] sm:$0xff] }
 0x318   : > { %v7431_v46 = vadd.f32 %v1981_v48, %v1892_v56  ;;  %5136 = vmatmul.msk.bf16.gmra.mxu3 %vm1010_vm1, %v6183_v8  ;;  %v1202_v48 = vadd.f32 %v9370_v24, %v9369_v57  ;;  %3324 = vmatpush.bf16.msra.mxu2 %v5493_v12  ;;  %v9374_v8 = vld [vmem:[#allocation106_spill] sm:$0xff]  ;;  %v9375_v57 = vld [vmem:[#allocation141_spill] sm:$0xff] }
 0x319   : > { %v2466_v15 = vsel %vm2433_vm2, %v2395_v44, %v2397_v27  ;;  %2724 = vmatmul.bf16.vlgmr.msrb.gmra.mxu2 %v6054_v62  ;;  %v1205_v24 = vadd.f32 %v9375_v57, %v9374_v8 }
 0x31a   : > { %v7442_v37 = vadd.f32 %v2466_v15, %v1289_v29  ;;  %2207 = vmatmul.bf16.gmra.mxu1 %v9368_v30  ;;  %2813 = vmatmul.bf16.vlgmr.msrb.gmra.mxu0 %v9347_v35  ;;  %v1291_v38 = vadd.f32 %v9371_v6, %v1202_v48 }
 0x31b   : > { %v1991_v44 = vpop.f32.mrf.mxu3 }
 0x31c   : > { %9367 = vst [vmem:[#allocation60_spill] sm:$0xff] %v7442_v37  ;;  %v2060_v33 = vpop.f32.mrf.mxu2 }
 0x31d   : > { %v2061_v25 = vadd.f32 %v2060_v33, %v7360_v58  ;;  %v9376_v33 = vld [vmem:[#allocation101_spill] sm:$0xff] }
 0x31f   : > { %v2399_v32 = vrot.slane %v2061_v25, 1  ;;  %v1894_v56 = vpop.f32.mrf.mxu1  ;;  %v7450_v53 = vpop.f32.mrf.mxu0  ;;  %v1294_v25 = vadd.f32 %v9376_v33, %v1205_v24 }
 0x320   : > { %9372 = vst [vmem:[#allocation71_spill] sm:$0xff] %v7450_v53  ;;  %v1984_v29 = vadd.f32 %v1983_v18, %v1894_v56 }
 0x321   : > { %v2464_v15 = vsel %vm2433_vm2, %v2397_v27, %v2399_v32 }
 0x322   : > { %v7454_v37 = vadd.f32 %v2464_v15, %v1291_v38  ;;  %v9379_v15 = vld [vmem:[#allocation104_spill] sm:$0xff] }
 0x323   : > { %v1993_v35 = vpop.f32.mrf.mxu3 }
 0x324   : > { %9373 = vst [vmem:[#allocation120_spill] sm:$0xff] %v7454_v37  ;;  %v2062_v41 = vpop.f32.mrf.mxu2 }
 0x325   : > { %v2063_v12 = vadd.f32 %v2062_v41, %v7384_v21  ;;  %v9378_v21 = vld [vmem:[#allocation109_spill] sm:$0xff] }
 0x326   : > { %v1207_v18 = vadd.f32 %v6906_v23, %v9378_v21 }
 0x327   : > { %v2401_v58 = vrot.slane %v2063_v12, 1  ;;  %v1897_v48 = vpop.f32.mrf.mxu1  ;;  %v7460_v6 = vpop.f32.mrf.mxu0 }
 0x328   : > { %v7464_v27 = vadd.f32 %v1986_v49, %v1897_v48  ;;  %5137 = vmatmul.msk.bf16.gmra.mxu3 %vm1010_vm1, %v6235_v40  ;;  %v1296_v57 = vadd.f32 %v9379_v15, %v1207_v18 }
 0x329   : > { %v2462_v53 = vsel %vm2433_vm2, %v2399_v32, %v2401_v58  ;;  %2729 = vmatmul.bf16.gmra.mxu2 %v6083_v14 }
 0x32a   : > { %v7469_v8 = vadd.f32 %v2462_v53, %v1294_v25  ;;  %2212 = vmatmul.bf16.gmra.mxu1 %v6441_v51  ;;  %2818 = vmatmul.bf16.gmra.mxu0 %v9358_v19  ;;  %v9381_v25 = vld [vmem:[#allocation42_spill] sm:$0xff] }
 0x32b   : > { %v1996_v38 = vpop.f32.mrf.mxu3  ;;  %v1210_v48 = vadd.f32 %v6916_v2, %v9381_v25  ;;  %v5484_v2 = vld [vmem:[%s9014_s3 + $0x28] sm:$0xff] }
 0x32c   : > { %9377 = vst [vmem:[#allocation64_spill] sm:$0xff] %v7469_v8  ;;  %v2065_v56 = vpop.f32.mrf.mxu2  ;;  %3236 = vmatpush.bf16.msra.mxu3 %v5484_v2 }
 0x32d   : > { %v2066_v32 = vadd.f32 %v2065_v56, %v7403_v60  ;;  %v9382_v60 = vld [vmem:[#allocation108_spill] sm:$0xff] }
 0x32e   : > { %v1299_v56 = vadd.f32 %v9382_v60, %v1210_v48  ;;  %v9387_v48 = vld [vmem:[#allocation111_spill] sm:$0xff] }
 0x32f   : > { %v2403_v49 = vrot.slane %v2066_v32, 1  ;;  %v1899_v24 = vpop.f32.mrf.mxu1  ;;  %v7477_v41 = vpop.f32.mrf.mxu0 }
 0x330   : > { %v1989_v12 = vadd.f32 %v1988_v59, %v1899_v24 }
 0x331   : > { %v2460_v53 = vsel %vm2433_vm2, %v2401_v58, %v2403_v49  ;;  %v9384_v58 = vld [vmem:[#allocation66_spill] sm:$0xff] }
 0x332   : > { %v7481_v33 = vadd.f32 %v2460_v53, %v1296_v57 }
 0x333   : > { %v1998_v23 = vpop.f32.mrf.mxu3 }
 0x334   : > { %9380 = vst [vmem:[#allocation76_spill] sm:$0xff] %v7481_v33  ;;  %v2067_v21 = vpop.f32.mrf.mxu2 }
 0x335   : > { %v2068_v8 = vadd.f32 %v2067_v21, %v1979_v3  ;;  %v5492_v3 = vld [vmem:[%s9014_s3 + $0x68] sm:$0xff] }
 0x336   : > { %3325 = vmatpush.bf16.msra.mxu2 %v5492_v3 }
 0x337   : > { %v2405_v37 = vrot.slane %v2068_v8, 1  ;;  %v1902_v32 = vpop.f32.mrf.mxu1  ;;  %v7486_v18 = vpop.f32.mrf.mxu0  ;;  %v9386_v8 = vld [vmem:[#allocation145_spill] sm:$0xff] }
 0x338   : > { %v7490_v40 = vadd.f32 %v1991_v44, %v1902_v32  ;;  %5138 = vmatmul.msk.bf16.gmra.mxu3 %vm1010_vm1, %v6291_v20  ;;  %v9385_v44 = vld [vmem:[#allocation46_spill] sm:$0xff] }
 0x339   : > { %v2458_v15 = vsel %vm2433_vm2, %v2403_v49, %v2405_v37  ;;  %2734 = vmatmul.bf16.gmra.mxu2 %v6135_v43  ;;  %v1212_v49 = vadd.f32 %v9386_v8, %v9385_v44  ;;  %v9389_v44 = vld [vmem:[#allocation51_spill] sm:$0xff] }
 0x33a   : > { %v7501_v59 = vadd.f32 %v2458_v15, %v1299_v56  ;;  %2217 = vmatmul.bf16.gmra.mxu1 %v9384_v58  ;;  %2823 = vmatmul.bf16.gmra.mxu0 %v9368_v30  ;;  %v9390_v8 = vld [vmem:[#allocation147_spill] sm:$0xff] }
 0x33b   : > { %v2001_v57 = vpop.f32.mrf.mxu3  ;;  %v1301_v21 = vadd.f32 %v9387_v48, %v1212_v49  ;;  %v1215_v33 = vadd.f32 %v9390_v8, %v9389_v44 }
 0x33c   : > { %9383 = vst [vmem:[#allocation123_spill] sm:$0xff] %v7501_v59  ;;  %v2070_v24 = vpop.f32.mrf.mxu2 }
 0x33d   : > { %v2071_v53 = vadd.f32 %v2070_v24, %v7431_v46  ;;  %v9391_v24 = vld [vmem:[#allocation35_spill] sm:$0xff] }
 0x33f   : > { %v2407_v25 = vrot.slane %v2071_v53, 1  ;;  %v1904_v60 = vpop.f32.mrf.mxu1  ;;  %v7509_v32 = vpop.f32.mrf.mxu0  ;;  %v1304_v53 = vadd.f32 %v9391_v24, %v1215_v33 }
 0x340   : > { %v7513_v15 = vadd.f32 %v1993_v35, %v1904_v60  ;;  %v9394_v60 = vld [vmem:[#allocation37_spill] sm:$0xff] }
 0x341   : > { %v2456_v56 = vsel %vm2433_vm2, %v2405_v37, %v2407_v25 }
 0x342   : > { %v7515_v59 = vadd.f32 %v2456_v56, %v1301_v21 }
 0x343   : > { %v2003_v2 = vpop.f32.mrf.mxu3 }
 0x344   : > { %9388 = vst [vmem:[#allocation69_spill] sm:$0xff] %v7515_v59  ;;  %v2072_v3 = vpop.f32.mrf.mxu2 }
 0x345   : > { %v2073_v20 = vadd.f32 %v2072_v3, %v1984_v29 }
 0x347   : > { %v2409_v46 = vrot.slane %v2073_v20, 1  ;;  %v1907_v49 = vpop.f32.mrf.mxu1  ;;  %v7520_v48 = vpop.f32.mrf.mxu0  ;;  %v9393_v20 = vld [vmem:[#allocation55_spill] sm:$0xff] }
 0x348   : > { %v7524_v37 = vadd.f32 %v1996_v38, %v1907_v49  ;;  %5139 = vmatmul.msk.bf16.gmra.mxu3 %vm1010_vm1, %v6314_v34  ;;  %v1217_v29 = vadd.f32 %v6950_v11, %v9393_v20  ;;  %v9397_v49 = vld [vmem:[#allocation150_spill] sm:$0xff] }
 0x349   : > { %v2454_v30 = vsel %vm2433_vm2, %v2407_v25, %v2409_v46  ;;  %2739 = vmatmul.bf16.gmra.mxu2 %v6187_v10 }
 0x34a   : > { %v7529_v35 = vadd.f32 %v2454_v30, %v1304_v53  ;;  %2222 = vmatmul.bf16.gmra.mxu1 %v6503_v39  ;;  %2828 = vmatmul.bf16.gmra.mxu0 %v6441_v51  ;;  %v1306_v56 = vadd.f32 %v9394_v60, %v1217_v29  ;;  %v9396_v53 = vld [vmem:[#allocation59_spill] sm:$0xff] }
 0x34b   : > { %v2006_v33 = vpop.f32.mrf.mxu3  ;;  %v1220_v11 = vadd.f32 %v9397_v49, %v9396_v53  ;;  %v5483_v53 = vld [vmem:[%s9014_s3 + $0x20] sm:$0xff] }
 0x34c   : > { %9392 = vst [vmem:[#allocation80_spill] sm:$0xff] %v7529_v35  ;;  %v2075_v21 = vpop.f32.mrf.mxu2  ;;  %3237 = vmatpush.bf16.msra.mxu3 %v5483_v53 }
 0x34d   : > { %v2076_v25 = vadd.f32 %v2075_v21, %v7464_v27  ;;  %v9398_v21 = vld [vmem:[#allocation44_spill] sm:$0xff] }
 0x34f   : > { %v2411_v38 = vrot.slane %v2076_v25, 1  ;;  %v1909_v44 = vpop.f32.mrf.mxu1  ;;  %v7537_v8 = vpop.f32.mrf.mxu0  ;;  %v1309_v25 = vadd.f32 %v9398_v21, %v1220_v11  ;;  %v9403_v11 = vld [vmem:[#allocation48_spill] sm:$0xff] }
 0x350   : > { %v7541_v3 = vadd.f32 %v1998_v23, %v1909_v44 }
 0x351   : > { %v2452_v30 = vsel %vm2433_vm2, %v2409_v46, %v2411_v38 }
 0x352   : > { %v7543_v24 = vadd.f32 %v2452_v30, %v1306_v56  ;;  %v9402_v56 = vld [vmem:[#allocation152_spill] sm:$0xff] }
 0x353   : > { %v2008_v20 = vpop.f32.mrf.mxu3 }
 0x354   : > { %9395 = vst [vmem:[#allocation125_spill] sm:$0xff] %v7543_v24  ;;  %v2077_v35 = vpop.f32.mrf.mxu2 }
 0x355   : > { %v2078_v59 = vadd.f32 %v2077_v35, %v1989_v12  ;;  %v5496_v12 = vld [vmem:[%s9014_s3 + $0x88] sm:$0xff]  ;;  %v9401_v35 = vld [vmem:[#allocation63_spill] sm:$0xff] }
 0x356   : > { %3418 = vmatpush.bf16.msra.mxu0 %v5496_v12 }
 0x357   : > { %v2413_v27 = vrot.slane %v2078_v59, 1  ;;  %v1912_v29 = vpop.f32.mrf.mxu1  ;;  %v7548_v60 = vpop.f32.mrf.mxu0  ;;  %v9400_v59 = vld [vmem:[#allocation84_spill] sm:$0xff] }
 0x358   : > { %v7552_v46 = vadd.f32 %v2001_v57, %v1912_v29  ;;  %5140 = vmatmul.msk.bf16.gmra.mxu3 %vm1010_vm1, %v6331_v52 }
 0x359   : > { %v2450_v34 = vsel %vm2433_vm2, %v2411_v38, %v2413_v27  ;;  %2744 = vmatmul.bf16.gmra.mxu2 %v6239_v47  ;;  %v1222_v38 = vadd.f32 %v9402_v56, %v9401_v35  ;;  %v9405_v56 = vld [vmem:[#allocation68_spill] sm:$0xff] }
 0x35a   : > { %v7560_v23 = vadd.f32 %v2450_v34, %v1309_v25  ;;  %2227 = vmatmul.bf16.gmra.mxu1 %v9400_v59  ;;  %2833 = vmatmul.bf16.gmra.mxu0 %v9384_v58  ;;  %v5491_v34 = vld [vmem:[%s9014_s3 + $0x60] sm:$0xff] }
 0x35b   : > { %v2287_v44 = vpop.f32.mrf.mxu3  ;;  %3326 = vmatpush.bf16.msra.mxu2 %v5491_v34  ;;  %v1311_v21 = vadd.f32 %v9403_v11, %v1222_v38  ;;  %v9407_v34 = vld [vmem:[#allocation53_spill] sm:$0xff] }
 0x35c   : > { %9399 = vst [vmem:[#allocation73_spill] sm:$0xff] %v7560_v23  ;;  %v2080_v57 = vpop.f32.mrf.mxu2 }
 0x35d   : > { %v2081_v30 = vadd.f32 %v2080_v57, %v7490_v40  ;;  %v9406_v57 = vld [vmem:[#allocation154_spill] sm:$0xff] }
 0x35e   : > { %v1225_v23 = vadd.f32 %v9406_v57, %v9405_v56 }
 0x35f   : > { %v2415_v49 = vrot.slane %v2081_v30, 1  ;;  %v1914_v25 = vpop.f32.mrf.mxu1  ;;  %v7574_v29 = vpop.f32.mrf.mxu0 }
 0x360   : > { %v7578_v40 = vadd.f32 %v2003_v2, %v1914_v25  ;;  %v1314_v38 = vadd.f32 %v9407_v34, %v1225_v23 }
 0x361   : > { %v2448_v12 = vsel %vm2433_vm2, %v2413_v27, %v2415_v49 }
 0x362   : > { %v7580_v35 = vadd.f32 %v2448_v12, %v1311_v21  ;;  %v9410_v12 = vld [vmem:[#allocation57_spill] sm:$0xff] }
 0x363   : > { %v2289_v52 = vpop.f32.mrf.mxu3 }
 0x364   : > { %9404 = vst [vmem:[#allocation85_spill] sm:$0xff] %v7580_v35  ;;  %v2082_v24 = vpop.f32.mrf.mxu2 }
 0x365   : > { %v2083_v30 = vadd.f32 %v2082_v24, %v7513_v15  ;;  %v9409_v15 = vld [vmem:[#allocation72_spill] sm:$0xff] }
 0x366   : > { %v1227_v24 = vadd.f32 %v6994_v16, %v9409_v15 }
 0x367   : > { %v2417_v53 = vrot.slane %v2083_v30, 1  ;;  %v1917_v11 = vpop.f32.mrf.mxu1  ;;  %v7586_v58 = vpop.f32.mrf.mxu0 }
 0x368   : > { %v7590_v2 = vadd.f32 %v2006_v33, %v1917_v11  ;;  %5141 = vmatmul.msk.bf16.gmra.mxu3 %vm1010_vm1, %v6375_v26  ;;  %v1316_v56 = vadd.f32 %v9410_v12, %v1227_v24  ;;  %v9415_v24 = vld [vmem:[#allocation61_spill] sm:$0xff] }
 0x369   : > { %v2446_v27 = vsel %vm2433_vm2, %v2415_v49, %v2417_v53  ;;  %2749 = vmatmul.bf16.gmra.mxu2 %v6293_v22 }
 0x36a   : > { %v7595_v21 = vadd.f32 %v2446_v27, %v1314_v38  ;;  %2232 = vmatmul.bf16.gmra.mxu1 %v6571_v4  ;;  %2838 = vmatmul.bf16.gmra.mxu0 %v6503_v39  ;;  %v9413_v27 = vld [vmem:[#allocation77_spill] sm:$0xff] }
 0x36b   : > { %v2292_v25 = vpop.f32.mrf.mxu3 }
 0x36c   : > { %9408 = vst [vmem:[#allocation78_spill] sm:$0xff] %v7595_v21  ;;  %v2085_v23 = vpop.f32.mrf.mxu2  ;;  %v9414_v21 = vld [vmem:[#allocation157_spill] sm:$0xff] }
 0x36d   : > { %v2086_v49 = vadd.f32 %v2085_v23, %v7524_v37  ;;  %v1230_v16 = vadd.f32 %v9414_v21, %v9413_v27  ;;  %v9417_v21 = vld [vmem:[#allocation29_spill] sm:$0xff]  ;;  %v9422_v27 = vld [vmem:[#allocation159_spill] sm:$0xff] }
 0x36f   : > { %v2419_v33 = vrot.slane %v2086_v49, 1  ;;  %v1919_v57 = vpop.f32.mrf.mxu1  ;;  %v7603_v30 = vpop.f32.mrf.mxu0  ;;  %v1319_v49 = vadd.f32 %v9415_v24, %v1230_v16 }
 0x370   : > { %9411 = vst [vmem:[#allocation88_spill] sm:$0xff] %v7603_v30  ;;  %v7607_v38 = vadd.f32 %v2008_v20, %v1919_v57 }
 0x371   : > { %v2444_v34 = vsel %vm2433_vm2, %v2417_v53, %v2419_v33 }
 0x372   : > { %v7609_v11 = vadd.f32 %v2444_v34, %v1316_v56  ;;  %v9421_v34 = vld [vmem:[#allocation81_spill] sm:$0xff] }
 0x373   : > { %v7613_v35 = vpop.f32.mrf.mxu3  ;;  %v1232_v16 = vadd.f32 %v9422_v27, %v9421_v34  ;;  %v5222_v34 = vld [vmem:[%s9013_s2 + $0x90] sm:$0xf] }
 0x374   : > { %9412 = vst [vmem:[#allocation129_spill] sm:$0xff] %v7609_v11  ;;  %v2087_v15 = vpop.f32.mrf.mxu2 }
 0x375   : > { %v2088_v37 = vadd.f32 %v2087_v15, %v7541_v3  ;;  %v9420_v3 = vld [vmem:[#allocation98_spill] sm:$0xff] }
 0x377   : > { %v2421_v23 = vrot.slane %v2088_v37, 1  ;;  %v7617_v12 = vpop.f32.mrf.mxu0  ;;  %v2198_v26 = vpop.f32.mrf.mxu1  ;;  %v9423_v37 = vld [vmem:[#allocation65_spill] sm:$0xff] }
 0x378   : > { %9416 = vst [vmem:[#allocation82_spill] sm:$0xff] %v7617_v12  ;;  %v2199_v53 = vadd.f32 %v2198_v26, %v7103_v54  ;;  %5142 = vmatmul.msk.bf16.gmra.mxu3 %vm1010_vm1, %v5997_v31  ;;  %v1321_v24 = vadd.f32 %v9423_v37, %v1232_v16 }
 0x379   : > { %v2442_v20 = vsel %vm2433_vm2, %v2419_v33, %v2421_v23  ;;  %2754 = vmatmul.bf16.gmra.mxu2 %v9417_v21 }
 0x37a   : > { %v7625_v56 = vadd.f32 %v2442_v20, %v1319_v49  ;;  %v7627_v57 = vadd.f32 %v2287_v44, %v2199_v53  ;;  %2237 = vmatmul.bf16.gmra.mxu1 %v9420_v3  ;;  %2843 = vmatmul.bf16.gmra.mxu0 %v9400_v59  ;;  %v9425_v20 = vld [vmem:[#allocation174_spill] sm:$0xff] }
 0x37b   : > { %v7633_v33 = vpop.f32.mrf.mxu3 }
 0x37c   : > { %9418 = vst [vmem:[#allocation92_spill] sm:$0xff] %v7625_v56  ;;  %v2090_v15 = vpop.f32.mrf.mxu2 }
 0x37d   : > { %9419 = vst [vmem:[#allocation132_spill] sm:$0xff] %v7627_v57  ;;  %v2091_v26 = vadd.f32 %v2090_v15, %v7552_v46  ;;  %v5478_v46 = vld [vmem:[%s9013_s2 + $0x90] sm:$0x30]  ;;  %v9427_v15 = vld [vmem:[#allocation86_spill] sm:$0xff] }
 0x37e   : > { %v5223_v16 = vor.u32 %v5478_v46, %v5222_v34  ;;  %v9430_v46 = vld [vmem:[#allocation114_spill] sm:$0xff] }
 0x37f   : > { %v2423_v54 = vrot.slane %v2091_v26, 1  ;;  %v7637_v11 = vpop.f32.mrf.mxu0  ;;  %v2200_v49 = vpop.f32.mrf.mxu1  ;;  %v9428_v26 = vld [vmem:[#allocation161_spill] sm:$0xff] }
 0x380   : > { %9424 = vst [vmem:[#allocation87_spill] sm:$0xff] %v7637_v11  ;;  %v2201_v53 = vadd.f32 %v2200_v49, %v9425_v20  ;;  %v1235_v37 = vadd.f32 %v9428_v26, %v9427_v15 }
 0x381   : > { %v2440_v44 = vsel %vm2433_vm2, %v2421_v23, %v2423_v54  ;;  %v9100_v23 = vrot.slane %v7627_v57, 1 }
 0x382   : > { %v7642_v56 = vadd.f32 %v2440_v44, %v1321_v24  ;;  %v2290_v27 = vadd.f32 %v2289_v52, %v2201_v53  ;;  %v2714_v44 = vsel %vm1059_vm0, %v5223_v16, 0  ;;  %v9429_v53 = vld [vmem:[#allocation70_spill] sm:$0xff]  ;;  %v9433_v16 = vld [vmem:[#allocation32_spill] sm:$0xff] }
 0x383   : > { %v7652_v59 = vpop.f32.mrf.mxu3  ;;  %2899 = vmatpush.bf16.msra.mxu1 %v2714_v44  ;;  %v1324_v34 = vadd.f32 %v9429_v53, %v1235_v37  ;;  %v9436_v37 = vld [vmem:[#allocation89_spill] sm:$0xff] }
 0x384   : > { %9426 = vst [vmem:[#allocation40_spill] sm:$0xff] %v7642_v56  ;;  %v2092_v31 = vpop.f32.mrf.mxu2  ;;  %v2370_v24 = vrot.slane %v2290_v27, 1 }
 0x385   : > { %v2093_v49 = vadd.f32 %v2092_v31, %v7578_v40  ;;  %v9432_v31 = vld [vmem:[#allocation41_spill] sm:$0xff] }
 0x386   : > { %v2495_v52 = vsel %vm2433_vm2, %v9100_v23, %v2370_v24  ;;  %v9435_v23 = vld [vmem:[#allocation105_spill] sm:$0xff] }
 0x387   : > { %v2425_v20 = vrot.slane %v2093_v49, 1  ;;  %v2530_v15 = vadd.f32 %v2495_v52, %v9430_v46  ;;  %v7663_v26 = vpop.f32.mrf.mxu0  ;;  %v2203_v56 = vpop.f32.mrf.mxu1  ;;  %v9437_v52 = vld [vmem:[#allocation163_spill] sm:$0xff] }
 0x388   : > { %9431 = vst [vmem:[#allocation95_spill] sm:$0xff] %v7663_v26  ;;  %v2204_v40 = vadd.f32 %v2203_v56, %v9432_v31  ;;  %5143 = vmatmul.msk.bf16.gmra.mxu3 %vm1010_vm1, %v6052_v61  ;;  %v1237_v53 = vadd.f32 %v9437_v52, %v9436_v37  ;;  %v7683_v31 = vld [vmem:[%s9016_s5 + $0x8] sm:$0xff]  ;;  %v9442_v26 = vld [vmem:[#allocation93_spill] sm:$0xff] }
 0x389   : > { %v2438_v27 = vsel %vm2433_vm2, %v2423_v54, %v2425_v20  ;;  %2759 = vmatmul.bf16.gmra.mxu2 %v9433_v16  ;;  %v9439_v52 = vld [vmem:[#allocation116_spill] sm:$0xff] }
 0x38a   : > { %v7671_v44 = vadd.f32 %v2438_v27, %v1324_v34  ;;  %v2293_v49 = vadd.f32 %v2292_v25, %v2204_v40  ;;  %2242 = vmatmul.bf16.gmra.mxu1 %v9435_v23  ;;  %2848 = vmatmul.bf16.gmra.mxu0 %v6571_v4  ;;  %v7690_v34 = vld [vmem:[%s9016_s5 + $0x18] sm:$0xff] }
 0x38b   : > { %v7677_v57 = vpop.f32.mrf.mxu3  ;;  %v9438_v40 = vld [vmem:[#allocation74_spill] sm:$0xff] }
 0x38c   : > { %9434 = vst [vmem:[#allocation134_spill] sm:$0xff] %v7671_v44  ;;  %v2095_v46 = vpop.f32.mrf.mxu2  ;;  %v2372_v54 = vrot.slane %v2293_v49, 1  ;;  %v1326_v37 = vadd.f32 %v9438_v40, %v1237_v53  ;;  %v9443_v53 = vld [vmem:[#allocation165_spill] sm:$0xff] }
 0x38d   : > { %v2096_v56 = vadd.f32 %v2095_v46, %v7590_v2  ;;  %v1240_v40 = vadd.f32 %v9443_v53, %v9442_v26  ;;  %v9446_v26 = vld [vmem:[#allocation79_spill] sm:$0xff] }
 0x38e   : > { %v2493_v25 = vsel %vm2433_vm2, %v2370_v24, %v2372_v54  ;;  %v3829_v24 = vadd.f32 %v7683_v31, %v2530_v15 }
 0x38f   : > { %v2427_v27 = vrot.slane %v2096_v56, 1  ;;  %v2531_v49 = vadd.f32 %v2493_v25, %v9439_v52  ;;  %v7694_v44 = vpop.f32.mrf.mxu0  ;;  %v2205_v2 = vpop.f32.mrf.mxu1  ;;  %v9444_v25 = vld [vmem:[#allocation96_spill] sm:$0xff]  ;;  %v9445_v52 = vld [vmem:[#allocation167_spill] sm:$0xff] }
 0x390   : > { %9440 = vst [vmem:[#allocation90_spill] sm:$0xff] %v7694_v44  ;;  %v2206_v61 = vadd.f32 %v2205_v2, %v7165_v36  ;;  %v1242_v44 = vadd.f32 %v9445_v52, %v9444_v25  ;;  %v5482_v36 = vld [vmem:[%s9014_s3 + $0x18] sm:$0xff] }
 0x391   : > { %v2436_v46 = vsel %vm2433_vm2, %v2425_v20, %v2427_v27  ;;  %v3830_v4 = vadd.f32 %v7690_v34, %v2531_v49  ;;  %v5490_v20 = vld [vmem:[%s9014_s3 + $0x58] sm:$0xff]  ;;  %3238 = vmatpush.bf16.msra.mxu3 %v5482_v36  ;;  %v9447_v49 = vld [vmem:[#allocation83_spill] sm:$0xff] }
 0x392   : > { %v7701_v39 = vadd.f32 %v2436_v46, %v1326_v37  ;;  %v2295_v56 = vadd.f32 %v7613_v35, %v2206_v61  ;;  %3327 = vmatpush.bf16.msra.mxu2 %v5490_v20  ;;  %v1329_v37 = vadd.f32 %v9446_v26, %v1240_v40  ;;  %v1331_v2 = vadd.f32 %v9447_v49, %v1242_v44  ;;  %v9448_v46 = vld [vmem:[#allocation119_spill] sm:$0xff]  ;;  %v9454_v20 = vld [vmem:[#allocation112_spill] sm:$0xff] }
 0x393   : > { %v3993_v11 = vmax.f32 %v3829_v24, %v3830_v4  ;;  %v7708_v30 = vpop.f32.mrf.mxu3 }
 0x394   : > { %9441 = vst [vmem:[#allocation99_spill] sm:$0xff] %v7701_v39  ;;  %v2097_v12 = vpop.f32.mrf.mxu2  ;;  %v2374_v15 = vrot.slane %v2295_v56, 1  ;;  %v9449_v56 = vld [vmem:[#allocation173_spill] sm:$0xff] }
 0x395   : > { %v2098_v61 = vadd.f32 %v2097_v12, %v7607_v38  ;;  %v9450_v39 = vrot.slane %v9449_v56, 1 }
 0x396   : > { %v2491_v35 = vsel %vm2433_vm2, %v2372_v54, %v2374_v15  ;;  %v9451_v54 = vld [vmem:[#allocation39_spill] sm:$0xff] }
 0x397   : > { %v2429_v4 = vrot.slane %v2098_v61, 1  ;;  %v2532_v24 = vadd.f32 %v2491_v35, %v9448_v46  ;;  %v2208_v53 = vpop.f32.mrf.mxu1  ;;  %v2814_v25 = vpop.f32.mrf.mxu0 }
 0x398   : > { %v2209_v12 = vadd.f32 %v2208_v53, %v7179_v63  ;;  %5144 = vmatmul.msk.bf16.gmra.mxu3 %vm1010_vm1, %v6081_v13 }
 0x399   : > { %v2434_v52 = vsel %vm2433_vm2, %v2427_v27, %v2429_v4  ;;  %v2496_v38 = vsel %vm2433_vm2, %v2429_v4, %v9450_v39  ;;  %2764 = vmatmul.bf16.gmra.mxu2 %v9451_v54  ;;  %v3994_v27 = vrot.slane %v3993_v11, 4  ;;  %v3831_v53 = vadd.f32 %v7683_v31, %v2532_v24 }
 0x39a   : > { %v7732_v44 = vadd.f32 %v2434_v52, %v1329_v37  ;;  %v7734_v40 = vadd.f32 %v2496_v38, %v1331_v2  ;;  %v2298_v36 = vadd.f32 %v7633_v33, %v2209_v12  ;;  %2247 = vmatmul.bf16.gmra.mxu1 %v9454_v20  ;;  %2853 = vmatmul.bf16.gmra.mxu0 %v9420_v3  ;;  %v9455_v37 = vld [vmem:[#allocation121_spill] sm:$0xff] }
 0x39b   : > { %v7739_v61 = vpop.f32.mrf.mxu3  ;;  %v3995_v26 = vmax.f32 %v3993_v11, %v3994_v27 }
 0x39c   : > { %9452 = vst [vmem:[#allocation137_spill] sm:$0xff] %v7732_v44  ;;  %v2725_v39 = vpop.f32.mrf.mxu2  ;;  %v2376_v63 = vrot.slane %v2298_v36, 1 }
 0x39d   : > { %9453 = vst [vmem:[#allocation94_spill] sm:$0xff] %v7734_v40  ;;  %v7741_v35 = vadd.f32 %v2814_v25, %v2725_v39  ;;  %v3996_v38 = vrot.slane %v3995_v26, 2 }
 0x39e   : > { %v2489_v4 = vsel %vm2433_vm2, %v2374_v15, %v2376_v63 }
 0x39f   : > { %v2533_v49 = vadd.f32 %v2489_v4, %v9455_v37  ;;  %v2210_v2 = vpop.f32.mrf.mxu1  ;;  %v2816_v46 = vpop.f32.mrf.mxu0  ;;  %v3997_v4 = vmax.f32 %v3995_v26, %v3996_v38  ;;  %v9456_v37 = vld [vmem:[#allocation124_spill] sm:$0xff] }
 0x3a0   : > { %v2211_v33 = vadd.f32 %v2210_v2, %v7207_v50 }
 0x3a1   : > { %v3832_v52 = vadd.f32 %v7690_v34, %v2533_v49 }
 0x3a2   : > { %v2300_v56 = vadd.f32 %v7652_v59, %v2211_v33  ;;  %v9457_v33 = vld [vmem:[#allocation13_spill] sm:$0xff] }
 0x3a3   : > { %v4000_v12 = vmax.f32 %v3831_v53, %v3832_v52  ;;  %v7750_v25 = vpop.f32.mrf.mxu3  ;;  %v9458_v52 = vld [vmem:[#allocation117_spill] sm:$0xff] }
 0x3a4   : > { %v2727_v36 = vpop.f32.mrf.mxu2  ;;  %v2378_v39 = vrot.slane %v2300_v56, 1 }
 0x3a5   : > { %v7752_v15 = vadd.f32 %v2816_v46, %v2727_v36  ;;  %v4001_v11 = vrot.slane %v4000_v12, 4 }
 0x3a6   : > { %v2487_v27 = vsel %vm2433_vm2, %v2376_v63, %v2378_v39  ;;  %v3998_v63 = vrot.slane %v3997_v4, 1 }
 0x3a7   : > { %v4002_v50 = vmax.f32 %v4000_v12, %v4001_v11  ;;  %v2534_v24 = vadd.f32 %v2487_v27, %v9456_v37  ;;  %v2213_v2 = vpop.f32.mrf.mxu1  ;;  %v2819_v49 = vpop.f32.mrf.mxu0 }
 0x3a8   : > { %v2214_v59 = vadd.f32 %v2213_v2, %v7231_v7  ;;  %5145 = vmatmul.msk.bf16.gmra.mxu3 %vm1010_vm1, %v6133_v42  ;;  %v5481_v7 = vld [vmem:[%s9014_s3 + $0x10] sm:$0xff]  ;;  %v3999_v27 = vmax.f32 %v3997_v4, %v3998_v63  ;;  %v9459_v2 = vld [vmem:[#allocation126_spill] sm:$0xff] }
 0x3a9   : > { %2769 = vmatmul.bf16.gmra.mxu2 %v9457_v33  ;;  %v4003_v53 = vrot.slane %v4002_v50, 2  ;;  %3239 = vmatpush.bf16.msra.mxu3 %v5481_v7 }
 0x3aa   : > { %v2303_v46 = vadd.f32 %v7677_v57, %v2214_v59  ;;  %2252 = vmatmul.bf16.gmra.mxu1 %v9458_v52  ;;  %2858 = vmatmul.bf16.gmra.mxu0 %v9435_v23 }
 0x3ab   : > { %v4004_v26 = vmax.f32 %v4002_v50, %v4003_v53  ;;  %v7764_v56 = vpop.f32.mrf.mxu3  ;;  %v7776_v50 = vld [vmem:[%s9015_s4 + $0x1] ss:$0 sm:$0xff] }
 0x3ac   : > { %v2730_v38 = vpop.f32.mrf.mxu2  ;;  %v2380_v12 = vrot.slane %v2303_v46, 1  ;;  %v5480_v46 = vld [vmem:[%s9014_s3 + $0x8] sm:$0xff] }
 0x3ad   : > { %v7769_v36 = vadd.f32 %v2819_v49, %v2730_v38  ;;  %v4005_v11 = vrot.slane %v4004_v26, 1  ;;  %v5489_v49 = vld [vmem:[%s9014_s3 + $0x50] sm:$0xff]  ;;  %v3833_v38 = vadd.f32 %v7683_v31, %v2534_v24  ;;  %3240 = vmatpush.bf16.msra.mxu3 %v5480_v46  ;;  %v9461_v46 = vld [vmem:[#allocation128_spill] sm:$0xff] }
 0x3ae   : > { %v2485_v57 = vsel %vm2433_vm2, %v2378_v39, %v2380_v12  ;;  %v9460_v39 = vld [vmem:[#allocation50_spill] sm:$0xff]  ;;  %3328 = vmatpush.bf16.msra.mxu2 %v5489_v49 }
 0x3af   : > { %v4006_v37 = vmax.f32 %v4004_v26, %v4005_v11  ;;  %v2535_v59 = vadd.f32 %v2485_v57, %v9459_v2  ;;  %v2215_v53 = vpop.f32.mrf.mxu1  ;;  %v2821_v40 = vpop.f32.mrf.mxu0  ;;  %v4109_v11 = vadd.f32 %v7776_v50, %v3999_v27 }
 0x3b0   : > { %v2216_v4 = vadd.f32 %v2215_v53, %v9460_v39 }
 0x3b1   : > { %v4110_v63 = vadd.f32 %v7776_v50, %v4006_v37  ;;  %v3834_v26 = vadd.f32 %v7690_v34, %v2535_v59  ;;  %v5479_v37 = vld [vmem:[%s9014_s3] sm:$0xff] }
 0x3b2   : > { %v2305_v7 = vadd.f32 %v7708_v30, %v2216_v4  ;;  %3241 = vmatpush.bf16.msra.mxu3 %v5479_v37  ;;  %v9464_v37 = vld [vmem:[#allocation122_spill] sm:$0xff] }
 0x3b3   : > { %v4166_v57 = vrot.slane %v4110_v63, 7  ;;  %v4007_v2 = vmax.f32 %v3833_v38, %v3834_v26  ;;  %v7791_v44 = vpop.f32.mrf.mxu3  ;;  %v9462_v38 = vld [vmem:[#allocation43_spill] sm:$0xff] }
 0x3b4   : > { %v2732_v42 = vpop.f32.mrf.mxu2  ;;  %v2382_v53 = vrot.slane %v2305_v7, 1  ;;  %v9463_v7 = vld [vmem:[#allocation16_spill] sm:$0xff] }
 0x3b5   : > { %v7796_v24 = vadd.f32 %v2821_v40, %v2732_v42  ;;  %v4008_v59 = vrot.slane %v4007_v2, 4  ;;  %v4168_v49 = vsel %vm4167_vm3, %v4166_v57, %v4109_v11 }
 0x3b6   : > { %v2483_v30 = vsel %vm2433_vm2, %v2380_v12, %v2382_v53 }
 0x3b7   : > { %v4009_v27 = vmax.f32 %v4007_v2, %v4008_v59  ;;  %v2536_v39 = vadd.f32 %v2483_v30, %v9461_v46  ;;  %v2218_v4 = vpop.f32.mrf.mxu1  ;;  %v2824_v63 = vpop.f32.mrf.mxu0 }
 0x3b8   : > { %v2219_v26 = vadd.f32 %v2218_v4, %v9462_v38  ;;  %5146 = vmatmul.msk.bf16.gmra.mxu3 %vm1010_vm1, %v6185_v9  ;;  %v9465_v38 = vld [vmem:[#allocation130_spill] sm:$0xff] }
 0x3b9   : > { %2774 = vmatmul.bf16.gmra.mxu2 %v9463_v7  ;;  %v4010_v42 = vrot.slane %v4009_v27, 2 }
 0x3ba   : > { %v2308_v40 = vadd.f32 %v7739_v61, %v2219_v26  ;;  %2257 = vmatmul.bf16.gmra.mxu1 %v9464_v37  ;;  %2863 = vmatmul.bf16.gmra.mxu0 %v9454_v20  ;;  %v5495_v26 = vld [vmem:[%s9014_s3 + $0x80] sm:$0xff] }
 0x3bb   : > { %v4011_v12 = vmax.f32 %v4009_v27, %v4010_v42  ;;  %v7809_v11 = vpop.f32.mrf.mxu3  ;;  %3419 = vmatpush.bf16.msra.mxu0 %v5495_v26 }
 0x3bc   : > { %v2735_v57 = vpop.f32.mrf.mxu2  ;;  %v2384_v2 = vrot.slane %v2308_v40, 1 }
 0x3bd   : > { %v7811_v59 = vadd.f32 %v2824_v63, %v2735_v57  ;;  %v4012_v30 = vrot.slane %v4011_v12, 1  ;;  %v3835_v63 = vadd.f32 %v7683_v31, %v2536_v39 }
 0x3be   : > { %v2481_v46 = vsel %vm2433_vm2, %v2382_v53, %v2384_v2 }
 0x3bf   : > { %v4013_v4 = vmax.f32 %v4011_v12, %v4012_v30  ;;  %v2537_v9 = vadd.f32 %v2481_v46, %v9465_v38  ;;  %v2220_v13 = vpop.f32.mrf.mxu1  ;;  %v2826_v61 = vpop.f32.mrf.mxu0 }
 0x3c0   : > { %v2221_v27 = vadd.f32 %v2220_v13, %v7309_v1 }
 0x3c1   : > { %v4111_v42 = vadd.f32 %v7776_v50, %v4013_v4  ;;  %v3836_v40 = vadd.f32 %v7690_v34, %v2537_v9  ;;  %v9466_v9 = vld [vmem:[#allocation133_spill] sm:$0xff] }
 0x3c2   : > { %v2310_v53 = vadd.f32 %v7750_v25, %v2221_v27 }
 0x3c3   : > { %v4169_v12 = vrot.slane %v4111_v42, 6  ;;  %v4014_v57 = vmax.f32 %v3835_v63, %v3836_v40  ;;  %v7824_v30 = vpop.f32.mrf.mxu3  ;;  %v9467_v42 = vld [vmem:[#allocation19_spill] sm:$0xff] }
 0x3c4   : > { %v2737_v46 = vpop.f32.mrf.mxu2  ;;  %v2386_v38 = vrot.slane %v2310_v53, 1  ;;  %v9468_v40 = vld [vmem:[#allocation127_spill] sm:$0xff] }
 0x3c5   : > { %v7826_v20 = vadd.f32 %v2826_v61, %v2737_v46  ;;  %v4015_v23 = vrot.slane %v4014_v57, 4  ;;  %v4171_v13 = vsel %vm4170_vm4, %v4169_v12, %v4168_v49 }
 0x3c6   : > { %v2479_v1 = vsel %vm2433_vm2, %v2384_v2, %v2386_v38 }
 0x3c7   : > { %v4016_v39 = vmax.f32 %v4014_v57, %v4015_v23  ;;  %v2538_v4 = vadd.f32 %v2479_v1, %v9466_v9  ;;  %v2223_v26 = vpop.f32.mrf.mxu1  ;;  %v2829_v25 = vpop.f32.mrf.mxu0  ;;  %v5488_v57 = vld [vmem:[%s9014_s3 + $0x48] sm:$0xff]  ;;  %v9469_v1 = vld [vmem:[#allocation135_spill] sm:$0xff] }
 0x3c8   : > { %v2224_v27 = vadd.f32 %v2223_v26, %v7325_v5  ;;  %5147 = vmatmul.msk.bf16.gmra.mxu3 %vm1010_vm1, %v6237_v45  ;;  %3329 = vmatpush.bf16.msra.mxu2 %v5488_v57 }
 0x3c9   : > { %2779 = vmatmul.bf16.gmra.mxu2 %v9467_v42  ;;  %v4017_v61 = vrot.slane %v4016_v39, 2 }
 0x3ca   : > { %v2313_v63 = vadd.f32 %v7764_v56, %v2224_v27  ;;  %2262 = vmatmul.bf16.gmra.mxu1 %v9468_v40  ;;  %2868 = vmatmul.bf16.gmra.mxu0 %v9458_v52 }
 0x3cb   : > { %v4018_v49 = vmax.f32 %v4016_v39, %v4017_v61  ;;  %v7839_v23 = vpop.f32.mrf.mxu3  ;;  %v3837_v61 = vadd.f32 %v7683_v31, %v2538_v4 }
 0x3cc   : > { %v2740_v2 = vpop.f32.mrf.mxu2  ;;  %v2388_v53 = vrot.slane %v2313_v63, 1 }
 0x3cd   : > { %v7841_v12 = vadd.f32 %v2829_v25, %v2740_v2  ;;  %v4019_v5 = vrot.slane %v4018_v49, 1 }
 0x3ce   : > { %v2477_v46 = vsel %vm2433_vm2, %v2386_v38, %v2388_v53  ;;  %v5477_v38 = vld [vmem:[%s9013_s2 + $0x88] sm:$0xff] }
 0x3cf   : > { %v4020_v56 = vmax.f32 %v4018_v49, %v4019_v5  ;;  %v2539_v9 = vadd.f32 %v2477_v46, %v9469_v1  ;;  %v2225_v26 = vpop.f32.mrf.mxu1  ;;  %v2831_v27 = vpop.f32.mrf.mxu0  ;;  %2900 = vmatpush.bf16.msra.mxu1 %v5477_v38 }
 0x3d0   : > { %v2226_v39 = vadd.f32 %v2225_v26, %v7344_v55 }
 0x3d1   : > { %v3838_v25 = vadd.f32 %v7690_v34, %v2539_v9  ;;  %v4112_v63 = vadd.f32 %v7776_v50, %v4020_v56  ;;  %v5476_v56 = vld [vmem:[%s9013_s2 + $0x80] sm:$0xff] }
 0x3d2   : > { %v2315_v2 = vadd.f32 %v7791_v44, %v2226_v39  ;;  %v9471_v39 = vld [vmem:[#allocation138_spill] sm:$0xff] }
 0x3d3   : > { %v4021_v49 = vmax.f32 %v3837_v61, %v3838_v25  ;;  %v7857_v5 = vpop.f32.mrf.mxu3  ;;  %v4172_v57 = vrot.slane %v4112_v63, 5  ;;  %2901 = vmatpush.bf16.msra.mxu1 %v5476_v56 }
 0x3d4   : > { %v2742_v46 = vpop.f32.mrf.mxu2  ;;  %v2390_v1 = vrot.slane %v2315_v2, 1 }
 0x3d5   : > { %v7859_v55 = vadd.f32 %v2831_v27, %v2742_v46  ;;  %v4022_v4 = vrot.slane %v4021_v49, 4  ;;  %v4174_v9 = vsel %vm4173_vm5, %v4172_v57, %v4171_v13  ;;  %v9472_v27 = vld [vmem:[#allocation22_spill] sm:$0xff] }
 0x3d6   : > { %v2475_v44 = vsel %vm2433_vm2, %v2388_v53, %v2390_v1  ;;  %v9473_v53 = vld [vmem:[#allocation131_spill] sm:$0xff] }
 0x3d7   : > { %9470 = vst [vmem:[#allocation102_spill] sm:$0xff] %v7859_v55  ;;  %v4023_v26 = vmax.f32 %v4021_v49, %v4022_v4  ;;  %v2540_v61 = vadd.f32 %v2475_v44, %v9471_v39  ;;  %v2228_v25 = vpop.f32.mrf.mxu1  ;;  %v2834_v45 = vpop.f32.mrf.mxu0  ;;  %v9475_v39 = vld [vmem:[#allocation140_spill] sm:$0xff] }
 0x3d8   : > { %v2229_v63 = vadd.f32 %v2228_v25, %v7356_v0  ;;  %3242 = vmatmul.bf16.vlgmr.msra.gmra.mxu3 %v6054_v62 }
 0x3d9   : > { %2784 = vmatmul.bf16.gmra.mxu2 %v9472_v27  ;;  %v4024_v2 = vrot.slane %v4023_v26, 2 }
 0x3da   : > { %v2318_v13 = vadd.f32 %v7809_v11, %v2229_v63  ;;  %2267 = vmatmul.bf16.gmra.mxu1 %v9473_v53  ;;  %2873 = vmatmul.bf16.gmra.mxu0 %v9464_v37  ;;  %v9476_v63 = vld [vmem:[#allocation52_spill] sm:$0xff]  ;;  %v3839_v37 = vadd.f32 %v7683_v31, %v2540_v61 }
 0x3db   : > { %v4025_v38 = vmax.f32 %v4023_v26, %v4024_v2  ;;  %v7874_v49 = vpop.f32.mrf.mxu3 }
 0x3dc   : > { %v2745_v46 = vpop.f32.mrf.mxu2  ;;  %v2392_v57 = vrot.slane %v2318_v13, 1 }
 0x3dd   : > { %v7876_v4 = vadd.f32 %v2834_v45, %v2745_v46  ;;  %v4026_v0 = vrot.slane %v4025_v38, 1 }
 0x3de   : > { %v2473_v44 = vsel %vm2433_vm2, %v2390_v1, %v2392_v57 }
 0x3df   : > { %9474 = vst [vmem:[#allocation139_spill] sm:$0xff] %v7876_v4  ;;  %v4027_v62 = vmax.f32 %v4025_v38, %v4026_v0  ;;  %v2541_v56 = vadd.f32 %v2473_v44, %v9475_v39  ;;  %v2230_v25 = vpop.f32.mrf.mxu1  ;;  %v2836_v11 = vpop.f32.mrf.mxu0 }
 0x3e0   : > { %v2231_v52 = vadd.f32 %v2230_v25, %v9476_v63  ;;  %v9478_v63 = vld [vmem:[#allocation142_spill] sm:$0xff] }
 0x3e1   : > { %v3840_v26 = vadd.f32 %v7690_v34, %v2541_v56  ;;  %v4113_v2 = vadd.f32 %v7776_v50, %v4027_v62 }
 0x3e2   : > { %v2320_v45 = vadd.f32 %v7824_v30, %v2231_v52  ;;  %v9479_v30 = vld [vmem:[#allocation115_spill] sm:$0xff] }
 0x3e3   : > { %v4028_v13 = vmax.f32 %v3839_v37, %v3840_v26  ;;  %v7886_v46 = vpop.f32.mrf.mxu3  ;;  %v4175_v38 = vrot.slane %v4113_v2, 4  ;;  %v9480_v26 = vld [vmem:[#allocation25_spill] sm:$0xff] }
 0x3e4   : > { %v2747_v1 = vpop.f32.mrf.mxu2  ;;  %v2394_v0 = vrot.slane %v2320_v45, 1  ;;  %v9481_v45 = vld [vmem:[#allocation136_spill] sm:$0xff] }
 0x3e5   : > { %v7888_v44 = vadd.f32 %v2836_v11, %v2747_v1  ;;  %v4029_v39 = vrot.slane %v4028_v13, 4  ;;  %v4177_v25 = vsel %vm4176_vm6, %v4175_v38, %v4174_v9  ;;  %v5487_v11 = vld [vmem:[%s9014_s3 + $0x40] sm:$0xff] }
 0x3e6   : > { %v2471_v61 = vsel %vm2433_vm2, %v2392_v57, %v2394_v0  ;;  %3330 = vmatpush.bf16.msra.mxu2 %v5487_v11 }
 0x3e7   : > { %9477 = vst [vmem:[#allocation97_spill] sm:$0xff] %v7888_v44  ;;  %v4030_v56 = vmax.f32 %v4028_v13, %v4029_v39  ;;  %v2542_v62 = vadd.f32 %v2471_v61, %v9478_v63  ;;  %v2233_v4 = vpop.f32.mrf.mxu1  ;;  %v2839_v52 = vpop.f32.mrf.mxu0  ;;  %v9482_v61 = vld [vmem:[#allocation143_spill] sm:$0xff] }
 0x3e8   : > { %v2234_v37 = vadd.f32 %v2233_v4, %v9479_v30  ;;  %3247 = vmatmul.bf16.gmra.mxu3 %v6083_v14  ;;  %v9483_v44 = vld [vmem:[#allocation67_spill] sm:$0xff] }
 0x3e9   : > { %2789 = vmatmul.bf16.gmra.mxu2 %v9480_v26  ;;  %v4031_v2 = vrot.slane %v4030_v56, 2 }
 0x3ea   : > { %v2323_v9 = vadd.f32 %v7839_v23, %v2234_v37  ;;  %2272 = vmatmul.bf16.gmra.mxu1 %v9481_v45  ;;  %2878 = vmatmul.bf16.gmra.mxu0 %v9468_v40 }
 0x3eb   : > { %v4032_v57 = vmax.f32 %v4030_v56, %v4031_v2  ;;  %v7903_v13 = vpop.f32.mrf.mxu3  ;;  %v3841_v56 = vadd.f32 %v7683_v31, %v2542_v62 }
 0x3ec   : > { %v2750_v1 = vpop.f32.mrf.mxu2  ;;  %v2396_v4 = vrot.slane %v2323_v9, 1 }
 0x3ed   : > { %v7905_v38 = vadd.f32 %v2839_v52, %v2750_v1  ;;  %v4033_v14 = vrot.slane %v4032_v57, 1 }
 0x3ee   : > { %v2469_v39 = vsel %vm2433_vm2, %v2394_v0, %v2396_v4 }
 0x3ef   : > { %v2543_v63 = vadd.f32 %v2469_v39, %v9482_v61  ;;  %v2235_v30 = vpop.f32.mrf.mxu1  ;;  %v2841_v23 = vpop.f32.mrf.mxu0  ;;  %v4034_v37 = vmax.f32 %v4032_v57, %v4033_v14 }
 0x3f0   : > { %v2236_v55 = vadd.f32 %v2235_v30, %v9483_v44 }
 0x3f1   : > { %v3842_v2 = vadd.f32 %v7690_v34, %v2543_v63  ;;  %v4114_v11 = vadd.f32 %v7776_v50, %v4034_v37  ;;  %v9484_v63 = vld [vmem:[#allocation144_spill] sm:$0xff] }
 0x3f2   : > { %v2325_v52 = vadd.f32 %v7857_v5, %v2236_v55 }
 0x3f3   : > { %v4035_v9 = vmax.f32 %v3841_v56, %v3842_v2  ;;  %v7915_v1 = vpop.f32.mrf.mxu3  ;;  %v4178_v40 = vrot.slane %v4114_v11, 3  ;;  %v9485_v56 = vld [vmem:[#allocation27_spill] sm:$0xff] }
 0x3f4   : > { %v2752_v0 = vpop.f32.mrf.mxu2  ;;  %v2398_v39 = vrot.slane %v2325_v52, 1 }
 0x3f5   : > { %v7917_v61 = vadd.f32 %v2841_v23, %v2752_v0  ;;  %v4036_v57 = vrot.slane %v4035_v9, 4  ;;  %v4180_v44 = vsel %vm4179_vm7, %v4178_v40, %v4177_v25  ;;  %v9486_v40 = vld [vmem:[#allocation9_spill] sm:$0xff] }
 0x3f6   : > { %v2467_v62 = vsel %vm2433_vm2, %v2396_v4, %v2398_v39 }
 0x3f7   : > { %v4037_v14 = vmax.f32 %v4035_v9, %v4036_v57  ;;  %v2544_v30 = vadd.f32 %v2467_v62, %v9484_v63  ;;  %v2238_v37 = vpop.f32.mrf.mxu1  ;;  %v2844_v5 = vpop.f32.mrf.mxu0 }
 0x3f8   : > { %v2239_v55 = vadd.f32 %v2238_v37, %v7427_v28  ;;  %3252 = vmatmul.bf16.gmra.mxu3 %v6135_v43  ;;  %v9488_v43 = vld [vmem:[#allocation146_spill] sm:$0xff]  ;;  %v9489_v37 = vld [vmem:[#allocation71_spill] sm:$0xff] }
 0x3f9   : > { %2794 = vmatmul.bf16.gmra.mxu2 %v9485_v56  ;;  %v4038_v2 = vrot.slane %v4037_v14, 2 }
 0x3fa   : > { %v2328_v23 = vadd.f32 %v7874_v49, %v2239_v55  ;;  %2883 = vmatmul.bf16.gmra.mxu0 %v9473_v53  ;;  %5224 = vmatmul.msk.bf16.vlgmr.msra.gmra.mxu1 %vm1010_vm1, %v9486_v40  ;;  %v3843_v53 = vadd.f32 %v7683_v31, %v2544_v30 }
 0x3fb   : > { %v4039_v25 = vmax.f32 %v4037_v14, %v4038_v2  ;;  %v7930_v4 = vpop.f32.mrf.mxu3 }
 0x3fc   : > { %v2755_v11 = vpop.f32.mrf.mxu2  ;;  %v2400_v52 = vrot.slane %v2328_v23, 1 }
 0x3fd   : > { %v7932_v9 = vadd.f32 %v2844_v5, %v2755_v11  ;;  %v4040_v28 = vrot.slane %v4039_v25, 1 }
 0x3fe   : > { %v2465_v0 = vsel %vm2433_vm2, %v2398_v39, %v2400_v52 }
 0x3ff   : > { %9487 = vst [vmem:[#allocation106_spill] sm:$0xff] %v7932_v9  ;;  %v2545_v57 = vadd.f32 %v2465_v0, %v9488_v43  ;;  %v2240_v62 = vpop.f32.mrf.mxu1  ;;  %v2846_v49 = vpop.f32.mrf.mxu0  ;;  %v4041_v63 = vmax.f32 %v4039_v25, %v4040_v28 }
 0x400   : > { %v2241_v55 = vadd.f32 %v2240_v62, %v9489_v37  ;;  %v9490_v62 = vld [vmem:[#allocation148_spill] sm:$0xff] }
 0x401   : > { %v3844_v14 = vadd.f32 %v7690_v34, %v2545_v57  ;;  %v4115_v2 = vadd.f32 %v7776_v50, %v4041_v63 }
 0x402   : > { %v2330_v5 = vadd.f32 %v7886_v46, %v2241_v55  ;;  %v9491_v55 = vld [vmem:[#allocation30_spill] sm:$0xff] }
 0x403   : > { %v4042_v23 = vmax.f32 %v3843_v53, %v3844_v14  ;;  %v7942_v11 = vpop.f32.mrf.mxu3  ;;  %v4181_v9 = vrot.slane %v4115_v2, 2 }
 0x404   : > { %v2757_v39 = vpop.f32.mrf.mxu2  ;;  %v2402_v0 = vrot.slane %v2330_v5, 1 }
 0x405   : > { %v7944_v43 = vadd.f32 %v2846_v49, %v2757_v39  ;;  %v4043_v25 = vrot.slane %v4042_v23, 4  ;;  %v4183_v28 = vsel %vm4182_vm8, %v4181_v9, %v4180_v44  ;;  %v9492_v44 = vld [vmem:[#allocation11_spill] sm:$0xff] }
 0x406   : > { %v2463_v30 = vsel %vm2433_vm2, %v2400_v52, %v2402_v0 }
 0x407   : > { %v4044_v57 = vmax.f32 %v4042_v23, %v4043_v25  ;;  %v2546_v63 = vadd.f32 %v2463_v30, %v9490_v62  ;;  %v2243_v37 = vpop.f32.mrf.mxu1  ;;  %v2849_v46 = vpop.f32.mrf.mxu0 }
 0x408   : > { %v2244_v53 = vadd.f32 %v2243_v37, %v7460_v6  ;;  %3257 = vmatmul.bf16.gmra.mxu3 %v6187_v10  ;;  %v9493_v10 = vld [vmem:[#allocation149_spill] sm:$0xff] }
 0x409   : > { %2799 = vmatmul.bf16.gmra.mxu2 %v9491_v55  ;;  %v4045_v14 = vrot.slane %v4044_v57, 2 }
 0x40a   : > { %v2333_v49 = vadd.f32 %v7903_v13, %v2244_v53  ;;  %2888 = vmatmul.bf16.gmra.mxu0 %v9481_v45  ;;  %5225 = vmatmul.msk.bf16.gmra.mxu1 %vm1010_vm1, %v9492_v44  ;;  %v3845_v53 = vadd.f32 %v7683_v31, %v2546_v63  ;;  %v9494_v63 = vld [vmem:[#allocation151_spill] sm:$0xff] }
 0x40b   : > { %v7957_v52 = vpop.f32.mrf.mxu3  ;;  %v4046_v2 = vmax.f32 %v4044_v57, %v4045_v14 }
 0x40c   : > { %v2760_v9 = vpop.f32.mrf.mxu2  ;;  %v2404_v5 = vrot.slane %v2333_v49, 1 }
 0x40d   : > { %v7959_v23 = vadd.f32 %v2849_v46, %v2760_v9  ;;  %v4047_v6 = vrot.slane %v4046_v2, 1 }
 0x40e   : > { %v2461_v39 = vsel %vm2433_vm2, %v2402_v0, %v2404_v5 }
 0x40f   : > { %v2547_v25 = vadd.f32 %v2461_v39, %v9493_v10  ;;  %v2245_v30 = vpop.f32.mrf.mxu1  ;;  %v2851_v13 = vpop.f32.mrf.mxu0  ;;  %v4048_v62 = vmax.f32 %v4046_v2, %v4047_v6 }
 0x410   : > { %v2246_v37 = vadd.f32 %v2245_v30, %v7477_v41 }
 0x411   : > { %v3846_v45 = vadd.f32 %v7690_v34, %v2547_v25  ;;  %v4116_v57 = vadd.f32 %v7776_v50, %v4048_v62 }
 0x412   : > { %v2335_v46 = vadd.f32 %v7915_v1, %v2246_v37 }
 0x413   : > { %v4049_v14 = vmax.f32 %v3845_v53, %v3846_v45  ;;  %v7969_v49 = vpop.f32.mrf.mxu3  ;;  %v4184_v9 = vrot.slane %v4116_v57, 1  ;;  %v9495_v45 = vld [vmem:[#allocation33_spill] sm:$0xff] }
 0x414   : > { %v2762_v0 = vpop.f32.mrf.mxu2  ;;  %v2406_v39 = vrot.slane %v2335_v46, 1  ;;  %v9497_v46 = vld [vmem:[#allocation153_spill] sm:$0xff] }
 0x415   : > { %v7971_v10 = vadd.f32 %v2851_v13, %v2762_v0  ;;  %v7974_v2 = vsel %vm4185_vm9, %v4184_v9, %v4183_v28  ;;  %v9496_v13 = vld [vmem:[#allocation14_spill] sm:$0xff]  ;;  %v4050_v28 = vrot.slane %v4049_v14, 4 }
 0x416   : > { %v2459_v41 = vsel %vm2433_vm2, %v2404_v5, %v2406_v39 }
 0x417   : > { %v2548_v6 = vadd.f32 %v2459_v41, %v9494_v63  ;;  %v2248_v25 = vpop.f32.mrf.mxu1  ;;  %v2854_v30 = vpop.f32.mrf.mxu0 }
 0x418   : > { %v2249_v1 = vadd.f32 %v2248_v25, %v7486_v18  ;;  %3262 = vmatmul.bf16.gmra.mxu3 %v6239_v47  ;;  %v4051_v18 = vmax.f32 %v4049_v14, %v4050_v28 }
 0x419   : > { %3331 = vmatmul.bf16.vlgmr.msra.gmra.mxu2 %v9495_v45  ;;  %v3847_v63 = vadd.f32 %v7683_v31, %v2548_v6 }
 0x41a   : > { %v2338_v62 = vadd.f32 %v7930_v4, %v2249_v1  ;;  %5226 = vmatmul.msk.bf16.gmra.mxu1 %vm1010_vm1, %v9496_v13  ;;  %5316 = vmatmul.msk.bf16.vlgmr.msra.gmra.mxu0 %vm1010_vm1, %v9486_v40  ;;  %v4052_v1 = vrot.slane %v4051_v18, 2 }
 0x41b   : > { %v7987_v5 = vpop.f32.mrf.mxu3 }
 0x41c   : > { %v2765_v37 = vpop.f32.mrf.mxu2  ;;  %v2408_v53 = vrot.slane %v2338_v62, 1 }
 0x41d   : > { %v7989_v57 = vadd.f32 %v2854_v30, %v2765_v37 }
 0x41e   : > { %v2457_v47 = vsel %vm2433_vm2, %v2406_v39, %v2408_v53 }
 0x41f   : > { %v2549_v0 = vadd.f32 %v2457_v47, %v9497_v46  ;;  %v2250_v4 = vpop.f32.mrf.mxu1  ;;  %v2856_v9 = vpop.f32.mrf.mxu0  ;;  %v4053_v47 = vmax.f32 %v4051_v18, %v4052_v1  ;;  %v9498_v46 = vld [vmem:[#allocation155_spill] sm:$0xff] }
 0x420   : > { %v2251_v41 = vadd.f32 %v2250_v4, %v7509_v32 }
 0x421   : > { %v3848_v40 = vadd.f32 %v7690_v34, %v2549_v0 }
 0x422   : > { %v2340_v25 = vadd.f32 %v7942_v11, %v2251_v41 }
 0x423   : > { %v4056_v45 = vmax.f32 %v3847_v63, %v3848_v40  ;;  %v7998_v30 = vpop.f32.mrf.mxu3  ;;  %v9499_v63 = vld [vmem:[#allocation17_spill] sm:$0xff] }
 0x424   : > { %v2767_v62 = vpop.f32.mrf.mxu2  ;;  %v2410_v37 = vrot.slane %v2340_v25, 1 }
 0x425   : > { %v8000_v39 = vadd.f32 %v2856_v9, %v2767_v62  ;;  %v4057_v14 = vrot.slane %v4056_v45, 4  ;;  %v9500_v62 = vld [vmem:[#allocation156_spill] sm:$0xff] }
 0x426   : > { %v2455_v28 = vsel %vm2433_vm2, %v2408_v53, %v2410_v37  ;;  %v4054_v53 = vrot.slane %v4053_v47, 1 }
 0x427   : > { %v4058_v32 = vmax.f32 %v4056_v45, %v4057_v14  ;;  %v2550_v6 = vadd.f32 %v2455_v28, %v9498_v46  ;;  %v2253_v4 = vpop.f32.mrf.mxu1  ;;  %v2859_v0 = vpop.f32.mrf.mxu0 }
 0x428   : > { %v2254_v11 = vadd.f32 %v2253_v4, %v7520_v48  ;;  %3267 = vmatmul.bf16.gmra.mxu3 %v6293_v22  ;;  %v4055_v45 = vmax.f32 %v4053_v47, %v4054_v53 }
 0x429   : > { %3336 = vmatmul.bf16.gmra.mxu2 %v9358_v19  ;;  %v4059_v41 = vrot.slane %v4058_v32, 2  ;;  %v3849_v4 = vadd.f32 %v7683_v31, %v2550_v6 }
 0x42a   : > { %v2343_v9 = vadd.f32 %v7957_v52, %v2254_v11  ;;  %5227 = vmatmul.msk.bf16.gmra.mxu1 %vm1010_vm1, %v9499_v63  ;;  %5317 = vmatmul.msk.bf16.gmra.mxu0 %vm1010_vm1, %v9492_v44 }
 0x42b   : > { %v4060_v18 = vmax.f32 %v4058_v32, %v4059_v41  ;;  %v8013_v40 = vpop.f32.mrf.mxu3  ;;  %v4117_v41 = vadd.f32 %v7776_v50, %v4055_v45 }
 0x42c   : > { %v2770_v25 = vpop.f32.mrf.mxu2  ;;  %v2412_v1 = vrot.slane %v2343_v9, 1 }
 0x42d   : > { %v8015_v48 = vadd.f32 %v2859_v0, %v2770_v25  ;;  %v4061_v22 = vrot.slane %v4060_v18, 1 }
 0x42e   : > { %v2453_v19 = vsel %vm2433_vm2, %v2410_v37, %v2412_v1 }
 0x42f   : > { %v4062_v52 = vmax.f32 %v4060_v18, %v4061_v22  ;;  %v2551_v14 = vadd.f32 %v2453_v19, %v9500_v62  ;;  %v2255_v28 = vpop.f32.mrf.mxu1  ;;  %v2861_v46 = vpop.f32.mrf.mxu0 }
 0x430   : > { %v2256_v44 = vadd.f32 %v2255_v28, %v7537_v8  ;;  %v9502_v28 = vld [vmem:[#allocation49_spill] sm:$0xff] }
 0x431   : > { %v4118_v32 = vadd.f32 %v7776_v50, %v4062_v52  ;;  %v3850_v11 = vadd.f32 %v7690_v34, %v2551_v14  ;;  %v9501_v52 = vld [vmem:[#allocation158_spill] sm:$0xff] }
 0x432   : > { %v2345_v0 = vadd.f32 %v7969_v49, %v2256_v44 }
 0x433   : > { %v4337_v9 = vrot.slane %v4118_v32, 7  ;;  %v4063_v37 = vmax.f32 %v3849_v4, %v3850_v11  ;;  %v8026_v47 = vpop.f32.mrf.mxu3  ;;  %v9503_v32 = vld [vmem:[#allocation20_spill] sm:$0xff] }
 0x434   : > { %v2772_v53 = vpop.f32.mrf.mxu2  ;;  %v2414_v18 = vrot.slane %v2345_v0, 1 }
 0x435   : > { %v8028_v25 = vadd.f32 %v2861_v46, %v2772_v53  ;;  %v4064_v22 = vrot.slane %v4063_v37, 4  ;;  %v4338_v8 = vsel %vm4167_vm3, %v4337_v9, %v4117_v41 }
 0x436   : > { %v2451_v6 = vsel %vm2433_vm2, %v2412_v1, %v2414_v18 }
 0x437   : > { %v4065_v19 = vmax.f32 %v4063_v37, %v4064_v22  ;;  %v2552_v62 = vadd.f32 %v2451_v6, %v9501_v52  ;;  %v2258_v49 = vpop.f32.mrf.mxu1  ;;  %v2864_v14 = vpop.f32.mrf.mxu0  ;;  %v9504_v37 = vld [vmem:[#allocation160_spill] sm:$0xff] }
 0x438   : > { %v2259_v45 = vadd.f32 %v2258_v49, %v7548_v60  ;;  %3272 = vmatmul.bf16.gmra.mxu3 %v9417_v21 }
 0x439   : > { %3341 = vmatmul.bf16.gmra.mxu2 %v9502_v28  ;;  %v4066_v44 = vrot.slane %v4065_v19, 2 }
 0x43a   : > { %v2348_v46 = vadd.f32 %v7987_v5, %v2259_v45  ;;  %5228 = vmatmul.msk.bf16.gmra.mxu1 %vm1010_vm1, %v9503_v32  ;;  %5318 = vmatmul.msk.bf16.gmra.mxu0 %vm1010_vm1, %v9496_v13 }
 0x43b   : > { %v4067_v1 = vmax.f32 %v4065_v19, %v4066_v44  ;;  %v8042_v4 = vpop.f32.mrf.mxu3  ;;  %v3851_v19 = vadd.f32 %v7683_v31, %v2552_v62  ;;  %v9505_v62 = vld [vmem:[#allocation162_spill] sm:$0xff] }
 0x43c   : > { %v2775_v11 = vpop.f32.mrf.mxu2  ;;  %v2416_v0 = vrot.slane %v2348_v46, 1 }
 0x43d   : > { %v8044_v41 = vadd.f32 %v2864_v14, %v2775_v11  ;;  %v4068_v60 = vrot.slane %v4067_v1, 1 }
 0x43e   : > { %v2449_v21 = vsel %vm2433_vm2, %v2414_v18, %v2416_v0 }
 0x43f   : > { %v4069_v9 = vmax.f32 %v4067_v1, %v4068_v60  ;;  %v2553_v5 = vadd.f32 %v2449_v21, %v9504_v37  ;;  %v2260_v53 = vpop.f32.mrf.mxu1  ;;  %v2866_v22 = vpop.f32.mrf.mxu0 }
 0x440   : > { %v2261_v6 = vadd.f32 %v2260_v53, %v7574_v29 }
 0x441   : > { %v4119_v13 = vadd.f32 %v7776_v50, %v4069_v9  ;;  %v3852_v52 = vadd.f32 %v7690_v34, %v2553_v5 }
 0x442   : > { %v2350_v49 = vadd.f32 %v7998_v30, %v2261_v6 }
 0x443   : > { %v4339_v14 = vrot.slane %v4119_v13, 6  ;;  %v4070_v45 = vmax.f32 %v3851_v19, %v3852_v52  ;;  %v8054_v28 = vpop.f32.mrf.mxu3  ;;  %v9507_v52 = vld [vmem:[#allocation164_spill] sm:$0xff] }
 0x444   : > { %v2777_v18 = vpop.f32.mrf.mxu2  ;;  %v2418_v44 = vrot.slane %v2350_v49, 1 }
 0x445   : > { %v8056_v46 = vadd.f32 %v2866_v22, %v2777_v18  ;;  %v4071_v1 = vrot.slane %v4070_v45, 4  ;;  %v4340_v11 = vsel %vm4170_vm4, %v4339_v14, %v4338_v8  ;;  %v9506_v22 = vld [vmem:[#allocation23_spill] sm:$0xff] }
 0x446   : > { %v2447_v29 = vsel %vm2433_vm2, %v2416_v0, %v2418_v44 }
 0x447   : > { %v4072_v60 = vmax.f32 %v4070_v45, %v4071_v1  ;;  %v2554_v21 = vadd.f32 %v2447_v29, %v9505_v62  ;;  %v2263_v9 = vpop.f32.mrf.mxu1  ;;  %v2869_v37 = vpop.f32.mrf.mxu0  ;;  %v9508_v45 = vld [vmem:[#allocation88_spill] sm:$0xff] }
 0x448   : > { %v2264_v30 = vadd.f32 %v2263_v9, %v7586_v58  ;;  %3277 = vmatmul.bf16.gmra.mxu3 %v9433_v16 }
 0x449   : > { %3346 = vmatmul.bf16.gmra.mxu2 %v6441_v51  ;;  %v4073_v5 = vrot.slane %v4072_v60, 2 }
 0x44a   : > { %v2353_v53 = vadd.f32 %v8013_v40, %v2264_v30  ;;  %5229 = vmatmul.msk.bf16.gmra.mxu1 %vm1010_vm1, %v9506_v22  ;;  %5319 = vmatmul.msk.bf16.gmra.mxu0 %vm1010_vm1, %v9499_v63  ;;  %v3853_v63 = vadd.f32 %v7683_v31, %v2554_v21 }
 0x44b   : > { %v4074_v8 = vmax.f32 %v4072_v60, %v4073_v5  ;;  %v8070_v0 = vpop.f32.mrf.mxu3 }
 0x44c   : > { %v2780_v6 = vpop.f32.mrf.mxu2  ;;  %v2420_v13 = vrot.slane %v2353_v53, 1 }
 0x44d   : > { %v8072_v19 = vadd.f32 %v2869_v37, %v2780_v6  ;;  %v4075_v58 = vrot.slane %v4074_v8, 1 }
 0x44e   : > { %v2445_v51 = vsel %vm2433_vm2, %v2418_v44, %v2420_v13 }
 0x44f   : > { %v4076_v16 = vmax.f32 %v4074_v8, %v4075_v58  ;;  %v2555_v40 = vadd.f32 %v2445_v51, %v9507_v52  ;;  %v2265_v49 = vpop.f32.mrf.mxu1  ;;  %v2871_v14 = vpop.f32.mrf.mxu0  ;;  %v9509_v58 = vld [vmem:[#allocation166_spill] sm:$0xff] }
 0x450   : > { %v2266_v18 = vadd.f32 %v2265_v49, %v9508_v45  ;;  %v9511_v49 = vld [vmem:[#allocation66_spill] sm:$0xff] }
 0x451   : > { %v3854_v1 = vadd.f32 %v7690_v34, %v2555_v40  ;;  %v4120_v29 = vadd.f32 %v7776_v50, %v4076_v16 }
 0x452   : > { %v2355_v60 = vadd.f32 %v8026_v47, %v2266_v18  ;;  %v9510_v47 = vld [vmem:[#allocation82_spill] sm:$0xff] }
 0x453   : > { %v4077_v62 = vmax.f32 %v3853_v63, %v3854_v1  ;;  %v8082_v9 = vpop.f32.mrf.mxu3  ;;  %v4341_v44 = vrot.slane %v4120_v29, 5  ;;  %v9512_v18 = vld [vmem:[#allocation26_spill] sm:$0xff] }
 0x454   : > { %v2782_v37 = vpop.f32.mrf.mxu2  ;;  %v2422_v30 = vrot.slane %v2355_v60, 1 }
 0x455   : > { %v8084_v5 = vadd.f32 %v2871_v14, %v2782_v37  ;;  %v4078_v53 = vrot.slane %v4077_v62, 4  ;;  %v4342_v8 = vsel %vm4173_vm5, %v4341_v44, %v4340_v11  ;;  %v9513_v37 = vld [vmem:[#allocation168_spill] sm:$0xff] }
 0x456   : > { %v2443_v21 = vsel %vm2433_vm2, %v2420_v13, %v2422_v30 }
 0x457   : > { %v4079_v6 = vmax.f32 %v4077_v62, %v4078_v53  ;;  %v2556_v51 = vadd.f32 %v2443_v21, %v9509_v58  ;;  %v2268_v16 = vpop.f32.mrf.mxu1  ;;  %v2874_v52 = vpop.f32.mrf.mxu0  ;;  %v9514_v21 = vld [vmem:[#allocation87_spill] sm:$0xff] }
 0x458   : > { %v2269_v40 = vadd.f32 %v2268_v16, %v9510_v47  ;;  %3282 = vmatmul.bf16.gmra.mxu3 %v9451_v54 }
 0x459   : > { %3351 = vmatmul.bf16.gmra.mxu2 %v9511_v49  ;;  %v4080_v45 = vrot.slane %v4079_v6, 2 }
 0x45a   : > { %v2358_v14 = vadd.f32 %v8042_v4, %v2269_v40  ;;  %5230 = vmatmul.msk.bf16.gmra.mxu1 %vm1010_vm1, %v9512_v18  ;;  %5320 = vmatmul.msk.bf16.gmra.mxu0 %vm1010_vm1, %v9503_v32  ;;  %v3855_v32 = vadd.f32 %v7683_v31, %v2556_v51 }
 0x45b   : > { %v4081_v11 = vmax.f32 %v4079_v6, %v4080_v45  ;;  %v8100_v29 = vpop.f32.mrf.mxu3 }
 0x45c   : > { %v2785_v13 = vpop.f32.mrf.mxu2  ;;  %v2424_v63 = vrot.slane %v2358_v14, 1 }
 0x45d   : > { %v8098_v1 = vadd.f32 %v2874_v52, %v2785_v13  ;;  %v4082_v60 = vrot.slane %v4081_v11, 1 }
 0x45e   : > { %v2441_v54 = vsel %vm2433_vm2, %v2422_v30, %v2424_v63 }
 0x45f   : > { %v4083_v62 = vmax.f32 %v4081_v11, %v4082_v60  ;;  %v2557_v4 = vadd.f32 %v2441_v54, %v9513_v37  ;;  %v2270_v44 = vpop.f32.mrf.mxu1  ;;  %v2876_v53 = vpop.f32.mrf.mxu0 }
 0x460   : > { %v2271_v58 = vadd.f32 %v2270_v44, %v9514_v21 }
 0x461   : > { %v3856_v6 = vadd.f32 %v7690_v34, %v2557_v4  ;;  %v4121_v16 = vadd.f32 %v7776_v50, %v4083_v62  ;;  %v9515_v34 = vld [vmem:[#allocation169_spill] sm:$0xff]  ;;  %v9517_v4 = vld [vmem:[#allocation75_spill] sm:$0xff] }
 0x462   : > { %v2360_v52 = vadd.f32 %v8054_v28, %v2271_v58  ;;  %v9516_v28 = vld [vmem:[#allocation95_spill] sm:$0xff] }
 0x463   : > { %v4084_v47 = vmax.f32 %v3855_v32, %v3856_v6  ;;  %v4343_v49 = vrot.slane %v4121_v16, 4  ;;  %v8115_v60 = vpop.f32.mrf.mxu3  ;;  %v9519_v16 = vld [vmem:[#allocation170_spill] sm:$0xff] }
 0x464   : > { %v2787_v40 = vpop.f32.mrf.mxu2  ;;  %v2426_v45 = vrot.slane %v2360_v52, 1 }
 0x465   : > { %v8110_v30 = vadd.f32 %v2876_v53, %v2787_v40  ;;  %v4085_v14 = vrot.slane %v4084_v47, 4  ;;  %v4344_v11 = vsel %vm4176_vm6, %v4343_v49, %v4342_v8  ;;  %v9518_v8 = vld [vmem:[#allocation28_spill] sm:$0xff] }
 0x466   : > { %v2439_v13 = vsel %vm2433_vm2, %v2424_v63, %v2426_v45 }
 0x467   : > { %v4086_v31 = vmax.f32 %v4084_v47, %v4085_v14  ;;  %v2558_v51 = vadd.f32 %v2439_v13, %v9515_v34  ;;  %v2273_v54 = vpop.f32.mrf.mxu1  ;;  %v2879_v62 = vpop.f32.mrf.mxu0  ;;  %v9520_v14 = vld [vmem:[#allocation90_spill] sm:$0xff] }
 0x468   : > { %v2274_v37 = vadd.f32 %v2273_v54, %v9516_v28  ;;  %3287 = vmatmul.bf16.gmra.mxu3 %v9457_v33  ;;  %v5569_v34 = vld [vmem:[%s9016_s5 + $0x18] sm:$0xff] }
 0x469   : > { %3356 = vmatmul.bf16.gmra.mxu2 %v9517_v4  ;;  %v4087_v44 = vrot.slane %v4086_v31, 2 }
 0x46a   : > { %v2363_v53 = vadd.f32 %v8070_v0, %v2274_v37  ;;  %5231 = vmatmul.msk.bf16.gmra.mxu1 %vm1010_vm1, %v9518_v8  ;;  %5321 = vmatmul.msk.bf16.gmra.mxu0 %vm1010_vm1, %v9506_v22  ;;  %v5568_v22 = vld [vmem:[%s9016_s5 + $0x8] sm:$0xff] }
 0x46b   : > { %v4088_v63 = vmax.f32 %v4086_v31, %v4087_v44  ;;  %v8131_v49 = vpop.f32.mrf.mxu3  ;;  %v3857_v31 = vadd.f32 %v5568_v22, %v2558_v51 }
 0x46c   : > { %v2790_v21 = vpop.f32.mrf.mxu2  ;;  %v2428_v58 = vrot.slane %v2363_v53, 1 }
 0x46d   : > { %v8126_v32 = vadd.f32 %v2879_v62, %v2790_v21  ;;  %v4089_v6 = vrot.slane %v4088_v63, 1 }
 0x46e   : > { %v2437_v33 = vsel %vm2433_vm2, %v2426_v45, %v2428_v58 }
 0x46f   : > { %v2559_v52 = vadd.f32 %v2437_v33, %v9519_v16  ;;  %v2275_v47 = vpop.f32.mrf.mxu1  ;;  %v2881_v40 = vpop.f32.mrf.mxu0  ;;  %v4090_v0 = vmax.f32 %v4088_v63, %v4089_v6  ;;  %v9521_v6 = vld [vmem:[#allocation132_spill] sm:$0xff] }
 0x470   : > { %v2276_v13 = vadd.f32 %v2275_v47, %v9520_v14  ;;  %v9522_v33 = vrot.slane %v9521_v6, 1  ;;  %v9523_v47 = vld [vmem:[#allocation171_spill] sm:$0xff] }
 0x471   : > { %v3858_v54 = vadd.f32 %v5569_v34, %v2559_v52  ;;  %v4122_v45 = vadd.f32 %v7776_v50, %v4090_v0  ;;  %v9524_v0 = vld [vmem:[#allocation172_spill] sm:$0xff] }
 0x472   : > { %v2365_v62 = vadd.f32 %v8082_v9, %v2276_v13 }
 0x473   : > { %v4091_v28 = vmax.f32 %v3857_v31, %v3858_v54  ;;  %v4345_v4 = vrot.slane %v4122_v45, 3 }
 0x474   : > { %v2792_v37 = vpop.f32.mrf.mxu2  ;;  %v2430_v44 = vrot.slane %v2365_v62, 1  ;;  %v8158_v62 = vpop.f32.mrf.mxu3 }
 0x475   : > { %v8142_v53 = vadd.f32 %v2881_v40, %v2792_v37  ;;  %v4092_v63 = vrot.slane %v4091_v28, 4  ;;  %v4346_v21 = vsel %vm4179_vm7, %v4345_v4, %v4344_v11  ;;  %v9526_v11 = vld [vmem:[#allocation84_spill] sm:$0xff]  ;;  %v9527_v37 = vld [vmem:[#allocation31_spill] sm:$0xff] }
 0x476   : > { %v2435_v51 = vsel %vm2433_vm2, %v2428_v58, %v2430_v44  ;;  %v2497_v16 = vsel %vm2433_vm2, %v2430_v44, %v9522_v33 }
 0x477   : > { %v4093_v52 = vmax.f32 %v4091_v28, %v4092_v63  ;;  %v2560_v9 = vadd.f32 %v2435_v51, %v9523_v47  ;;  %v2561_v14 = vadd.f32 %v2497_v16, %v9524_v0  ;;  %v2884_v13 = vpop.f32.mrf.mxu0  ;;  %v2903_v31 = vpop.f32.mrf.mxu1 }
 0x478   : > { %v8154_v40 = vadd.f32 %v2903_v31, %v7741_v35  ;;  %3292 = vmatmul.bf16.gmra.mxu3 %v9463_v7 }
 0x479   : > { %3361 = vmatmul.bf16.gmra.mxu2 %v9526_v11  ;;  %v4094_v58 = vrot.slane %v4093_v52, 2  ;;  %v3859_v54 = vadd.f32 %v5568_v22, %v2560_v9  ;;  %v3860_v45 = vadd.f32 %v5569_v34, %v2561_v14  ;;  %v9528_v11 = vld [vmem:[#allocation100_spill] sm:$0xff] }
 0x47a   : > { %9525 = vst [vmem:[#allocation141_spill] sm:$0xff] %v8154_v40  ;;  %5232 = vmatmul.msk.bf16.gmra.mxu1 %vm1010_vm1, %v9527_v37  ;;  %5322 = vmatmul.msk.bf16.gmra.mxu0 %vm1010_vm1, %v9512_v18  ;;  %v9123_v18 = vrot.slane %v8154_v40, 2  ;;  %v9555_v40 = vld [vmem:[#allocation122_spill] sm:$0xff] }
 0x47b   : > { %v4095_v28 = vmax.f32 %v4093_v52, %v4094_v58  ;;  %v4098_v4 = vmax.f32 %v3859_v54, %v3860_v45 }
 0x47c   : > { %v2795_v44 = vpop.f32.mrf.mxu2 }
 0x47d   : > { %v8164_v35 = vadd.f32 %v2884_v13, %v2795_v44  ;;  %v4099_v63 = vrot.slane %v4098_v4, 4  ;;  %v4096_v7 = vrot.slane %v4095_v28, 1  ;;  %v8170_v13 = vpop.f32.mrf.mxu3 }
 0x47f   : > { %v4100_v51 = vmax.f32 %v4098_v4, %v4099_v63  ;;  %v2886_v6 = vpop.f32.mrf.mxu0  ;;  %v2905_v33 = vpop.f32.mrf.mxu1  ;;  %v4097_v22 = vmax.f32 %v4095_v28, %v4096_v7  ;;  %v9529_v63 = vld [vmem:[#allocation91_spill] sm:$0xff] }
 0x480   : > { %v2906_v34 = vadd.f32 %v2905_v33, %v7752_v15  ;;  %v5570_v7 = vld [vmem:[%s9015_s4 + $0x1] ss:$0 sm:$0xff]  ;;  %v9530_v33 = vld [vmem:[#allocation38_spill] sm:$0xff] }
 0x481   : > { %v4101_v16 = vrot.slane %v4100_v51, 2  ;;  %v4123_v47 = vadd.f32 %v7776_v50, %v4097_v22 }
 0x482   : > { %v2984_v52 = vrot.slane %v2906_v34, 2  ;;  %v9531_v34 = vld [vmem:[#allocation34_spill] sm:$0xff] }
 0x483   : > { %v4102_v0 = vmax.f32 %v4100_v51, %v4101_v16  ;;  %v4347_v14 = vrot.slane %v4123_v47, 2 }
 0x484   : > { %v2797_v9 = vpop.f32.mrf.mxu2  ;;  %v3046_v15 = vsel %vm3015_vm10, %v9123_v18, %v2984_v52 }
 0x485   : > { %v8172_v31 = vadd.f32 %v2886_v6, %v2797_v9  ;;  %v8179_v58 = vadd.f32 %v3046_v15, %v9528_v11  ;;  %v4103_v54 = vrot.slane %v4102_v0, 1  ;;  %v4348_v50 = vsel %vm4182_vm8, %v4347_v14, %v4346_v21  ;;  %v8202_v9 = vpop.f32.mrf.mxu3 }
 0x487   : > { %v2889_v45 = vpop.f32.mrf.mxu0  ;;  %v2908_v28 = vpop.f32.mrf.mxu1  ;;  %v4104_v4 = vmax.f32 %v4102_v0, %v4103_v54 }
 0x488   : > { %v2909_v44 = vadd.f32 %v2908_v28, %v7769_v36  ;;  %3297 = vmatmul.bf16.gmra.mxu3 %v9467_v42 }
 0x489   : > { %3366 = vmatmul.bf16.gmra.mxu2 %v9529_v63  ;;  %v4124_v51 = vadd.f32 %v5570_v7, %v4104_v4 }
 0x48a   : > { %v2985_v6 = vrot.slane %v2909_v44, 2  ;;  %5233 = vmatmul.msk.bf16.gmra.mxu1 %vm1010_vm1, %v9530_v33  ;;  %5323 = vmatmul.msk.bf16.gmra.mxu0 %vm1010_vm1, %v9518_v8 }
 0x48b   : > { %v4349_v22 = vrot.slane %v4124_v51, 1  ;;  %v9534_v51 = vld [vmem:[#allocation10_spill] sm:$0xff] }
 0x48c   : > { %v2800_v21 = vpop.f32.mrf.mxu2  ;;  %v3045_v36 = vsel %vm3015_vm10, %v2984_v52, %v2985_v6 }
 0x48d   : > { %v8194_v42 = vadd.f32 %v2889_v45, %v2800_v21  ;;  %v8197_v16 = vadd.f32 %v3045_v36, %v9531_v34  ;;  %v8200_v47 = vsel %vm4185_vm9, %v4349_v22, %v4348_v50  ;;  %v9533_v45 = vld [vmem:[#allocation45_spill] sm:$0xff]  ;;  %v8212_v50 = vpop.f32.mrf.mxu3 }
 0x48e   : > { %9532 = vst [vmem:[#allocation101_spill] sm:$0xff] %v8200_v47  ;;  %v9549_v47 = vld [vmem:[#allocation117_spill] sm:$0xff] }
 0x48f   : > { %v2891_v0 = vpop.f32.mrf.mxu0  ;;  %v2910_v14 = vpop.f32.mrf.mxu1 }
 0x490   : > { %v2911_v15 = vadd.f32 %v2910_v14, %v7796_v24  ;;  %v4157_v24 = vld [vmem:[#allocation3 + $0xf8] sm:$0xff] }
 0x491   : > { %4188 = vmatpush.msrb.mxu3 %v4157_v24  ;;  %v9536_v24 = vld [vmem:[#allocation36_spill] sm:$0xff] }
 0x492   : > { %v2986_v8 = vrot.slane %v2911_v15, 2  ;;  %v4153_v15 = vld [vmem:[#allocation3 + $0xd8] sm:$0xff] }
 0x494   : > { %v2802_v11 = vpop.f32.mrf.mxu2  ;;  %v3044_v52 = vsel %vm3015_vm10, %v2985_v6, %v2986_v8  ;;  %v4156_v6 = vld [vmem:[#allocation3 + $0xf0] sm:$0xff] }
 0x495   : > { %v8205_v54 = vadd.f32 %v2891_v0, %v2802_v11  ;;  %v8210_v28 = vadd.f32 %v3044_v52, %v9533_v45  ;;  %4189 = vmatpush.msrb.mxu3 %v4156_v6  ;;  %v4152_v52 = vld [vmem:[#allocation3 + $0xd0] sm:$0xff] }
 0x497   : > { %v2913_v4 = vpop.f32.mrf.mxu1  ;;  %v3421_v44 = vpop.f32.mrf.mxu0 }
 0x498   : > { %v2914_v63 = vadd.f32 %v2913_v4, %v7811_v59  ;;  %3302 = vmatmul.bf16.gmra.mxu3 %v9472_v27  ;;  %v4155_v59 = vld [vmem:[#allocation3 + $0xe8] sm:$0xff]  ;;  %v9535_v27 = vld [vmem:[#allocation103_spill] sm:$0xff] }
 0x499   : > { %3371 = vmatmul.bf16.gmra.mxu2 %v9420_v3  ;;  %4190 = vmatpush.msrb.mxu3 %v4155_v59  ;;  %v4154_v3 = vld [vmem:[#allocation3 + $0xe0] sm:$0xff]  ;;  %v4151_v4 = vld [vmem:[#allocation3 + $0xc8] sm:$0xff] }
 0x49a   : > { %v2987_v7 = vrot.slane %v2914_v63, 2  ;;  %5234 = vmatmul.msk.bf16.gmra.mxu1 %vm1010_vm1, %v9534_v51  ;;  %5324 = vmatmul.msk.bf16.gmra.mxu0 %vm1010_vm1, %v9527_v37  ;;  %v8227_v37 = vpop.f32.mrf.mxu3 }
 0x49b   : > { %4191 = vmatpush.msrb.mxu3 %v4154_v3 }
 0x49c   : > { %v3332_v21 = vpop.f32.mrf.mxu2  ;;  %v3043_v22 = vsel %vm3015_vm10, %v2986_v8, %v2987_v7 }
 0x49d   : > { %v8224_v36 = vadd.f32 %v3043_v22, %v9535_v27  ;;  %4192 = vmatpush.msrb.mxu3 %v4153_v15  ;;  %v4150_v22 = vld [vmem:[#allocation3 + $0xc0] sm:$0xff] }
 0x49f   : > { %v2915_v34 = vpop.f32.mrf.mxu1  ;;  %v3423_v0 = vpop.f32.mrf.mxu0  ;;  %4193 = vmatpush.msrb.mxu3 %v4152_v52  ;;  %v9539_v52 = vld [vmem:[#allocation12_spill] sm:$0xff] }
 0x4a0   : > { %v2916_v14 = vadd.f32 %v2915_v34, %v7826_v20  ;;  %v3333_v20 = vadd.f32 %v3332_v21, %v8100_v29  ;;  %v4148_v29 = vld [vmem:[#allocation3 + $0xb0] sm:$0xff] }
 0x4a1   : > { %4194 = vmatpush.msrb.mxu3 %v4151_v4 }
 0x4a2   : > { %v2988_v11 = vrot.slane %v2916_v14, 2  ;;  %v4149_v14 = vld [vmem:[#allocation3 + $0xb8] sm:$0xff] }
 0x4a3   : > { %4195 = vmatpush.msrb.mxu3 %v4150_v22 }
 0x4a4   : > { %v3334_v45 = vpop.f32.mrf.mxu2  ;;  %v3042_v63 = vsel %vm3015_vm10, %v2987_v7, %v2988_v11  ;;  %v8239_v7 = vadd.f32 %v3421_v44, %v3333_v20  ;;  %v4147_v44 = vld [vmem:[#allocation3 + $0xa8] sm:$0xff] }
 0x4a5   : > { %v3335_v8 = vadd.f32 %v3334_v45, %v8115_v60  ;;  %v8233_v6 = vadd.f32 %v3042_v63, %v9536_v24  ;;  %v9537_v60 = vld [vmem:[#allocation105_spill] sm:$0xff]  ;;  %4196 = vmatpush.msrb.mxu3 %v4149_v14  ;;  %v4146_v24 = vld [vmem:[#allocation3 + $0xa0] sm:$0xff] }
 0x4a6   : > { %9538 = vst [vmem:[#allocation109_spill] sm:$0xff] %v8239_v7 }
 0x4a7   : > { %v2918_v59 = vpop.f32.mrf.mxu1  ;;  %v3426_v27 = vpop.f32.mrf.mxu0  ;;  %v3424_v3 = vadd.f32 %v3423_v0, %v3335_v8  ;;  %4197 = vmatpush.msrb.mxu3 %v4148_v29  ;;  %v9540_v8 = vld [vmem:[#allocation107_spill] sm:$0xff] }
 0x4a8   : > { %v2919_v34 = vadd.f32 %v2918_v59, %v7841_v12  ;;  %3307 = vmatmul.bf16.gmra.mxu3 %v9480_v26  ;;  %v8245_v0 = vpop.f32.mrf.mxu3 }
 0x4a9   : > { %3376 = vmatmul.bf16.gmra.mxu2 %v9537_v60  ;;  %v3502_v12 = vrot.slane %v3424_v3, 3  ;;  %4198 = vmatpush.msrb.mxu3 %v4147_v44  ;;  %v9541_v3 = vld [vmem:[#allocation102_spill] sm:$0xff]  ;;  %v4143_v44 = vld [vmem:[#allocation3 + $0x88] sm:$0xff] }
 0x4aa   : > { %v2989_v15 = vrot.slane %v2919_v34, 2  ;;  %5235 = vmatmul.msk.bf16.gmra.mxu1 %vm1010_vm1, %v9539_v52  ;;  %5325 = vmatmul.msk.bf16.gmra.mxu0 %vm1010_vm1, %v9530_v33  ;;  %v9122_v33 = vrot.slane %v8239_v7, 3 }
 0x4ab   : > { %4199 = vmatpush.msrb.mxu3 %v4146_v24 }
 0x4ac   : > { %v3337_v21 = vpop.f32.mrf.mxu2  ;;  %v3041_v26 = vsel %vm3015_vm10, %v2988_v11, %v2989_v15  ;;  %v4145_v11 = vld [vmem:[#allocation3 + $0x98] sm:$0xff] }
 0x4ad   : > { %v3338_v45 = vadd.f32 %v3337_v21, %v8131_v49  ;;  %v8252_v4 = vadd.f32 %v3041_v26, %v9540_v8  ;;  %v8260_v49 = vsel %vm3533_vm11, %v9122_v33, %v3502_v12  ;;  %4200 = vmatpush.msrb.mxu3 %v4145_v11  ;;  %v9547_v33 = vld [vmem:[#allocation97_spill] sm:$0xff] }
 0x4ae   : > { %v9121_v21 = vrot.slane %v8260_v49, 1 }
 0x4af   : > { %v3427_v63 = vadd.f32 %v3426_v27, %v3338_v45  ;;  %v2920_v20 = vpop.f32.mrf.mxu1  ;;  %v3428_v22 = vpop.f32.mrf.mxu0  ;;  %v4144_v27 = vld [vmem:[#allocation3 + $0x90] sm:$0xff] }
 0x4b0   : > { %v2921_v34 = vadd.f32 %v2920_v20, %v9541_v3  ;;  %4201 = vmatpush.msrb.mxu3 %v4144_v27  ;;  %v8278_v20 = vpop.f32.mrf.mxu3  ;;  %v9543_v27 = vld [vmem:[#allocation139_spill] sm:$0xff] }
 0x4b1   : > { %v3503_v59 = vrot.slane %v3427_v63, 3 }
 0x4b2   : > { %v2990_v60 = vrot.slane %v2921_v34, 2  ;;  %4202 = vmatpush.msrb.mxu3 %v4143_v44 }
 0x4b3   : > { %v8264_v14 = vsel %vm3533_vm11, %v3502_v12, %v3503_v59  ;;  %v9542_v12 = vld [vmem:[#allocation54_spill] sm:$0xff] }
 0x4b4   : > { %v3339_v29 = vpop.f32.mrf.mxu2  ;;  %v3567_v26 = vrot.slane %v8264_v14, 1  ;;  %v3040_v8 = vsel %vm3015_vm10, %v2989_v15, %v2990_v60 }
 0x4b5   : > { %v3340_v45 = vadd.f32 %v3339_v29, %v8158_v62  ;;  %v8276_v24 = vadd.f32 %v3040_v8, %v9542_v12  ;;  %v4142_v62 = vld [vmem:[#allocation3 + $0x80] sm:$0xff] }
 0x4b6   : > { %v3628_v63 = vsel %vm2433_vm2, %v9121_v21, %v3567_v26  ;;  %4203 = vmatpush.msrb.mxu3 %v4142_v62  ;;  %v9544_v21 = vld [vmem:[#allocation112_spill] sm:$0xff]  ;;  %v9545_v8 = vld [vmem:[#allocation15_spill] sm:$0xff] }
 0x4b7   : > { %v3429_v3 = vadd.f32 %v3428_v22, %v3340_v45  ;;  %3630 = vrot.lane.b32.xlu2 %v3628_v63, %s5674_s22  ;;  %v2923_v34 = vpop.f32.mrf.mxu1  ;;  %v3431_v11 = vpop.f32.mrf.mxu0 }
 0x4b8   : > { %v2924_v29 = vadd.f32 %v2923_v34, %v9543_v27  ;;  %3312 = vmatmul.bf16.gmra.mxu3 %v9485_v56  ;;  %v8302_v27 = vpop.f32.mrf.mxu3 }
 0x4b9   : > { %v3504_v15 = vrot.slane %v3429_v3, 3  ;;  %3381 = vmatmul.bf16.gmra.mxu2 %v9544_v21  ;;  %v9546_v3 = vld [vmem:[#allocation110_spill] sm:$0xff] }
 0x4ba   : > { %v2991_v44 = vrot.slane %v2924_v29, 2  ;;  %5236 = vmatmul.msk.bf16.gmra.mxu1 %vm1010_vm1, %v9545_v8  ;;  %5326 = vmatmul.msk.bf16.gmra.mxu0 %vm1010_vm1, %v9534_v51 }
 0x4bb   : > { %v8290_v22 = vsel %vm3533_vm11, %v3503_v59, %v3504_v15 }
 0x4bc   : > { %v3342_v45 = vpop.f32.mrf.mxu2  ;;  %v3568_v63 = vrot.slane %v8290_v22, 1  ;;  %v3039_v56 = vsel %vm3015_vm10, %v2990_v60, %v2991_v44 }
 0x4bd   : > { %v3343_v12 = vadd.f32 %v3342_v45, %v8170_v13  ;;  %v8299_v62 = vadd.f32 %v3039_v56, %v9546_v3 }
 0x4be   : > { %v3627_v21 = vsel %vm2433_vm2, %v3567_v26, %v3568_v63 }
 0x4bf   : > { %v3432_v34 = vadd.f32 %v3431_v11, %v3343_v12  ;;  %3632 = vrot.lane.b32.xlu2 %v3627_v21, %s5674_s22  ;;  %v2925_v51 = vpop.f32.mrf.mxu1  ;;  %v3433_v59 = vpop.f32.mrf.mxu0  ;;  %v9548_v21 = vld [vmem:[#allocation47_spill] sm:$0xff] }
 0x4c0   : > { %v2926_v18 = vadd.f32 %v2925_v51, %v9547_v33 }
 0x4c1   : > { %v3505_v29 = vrot.slane %v3432_v34, 3 }
 0x4c2   : > { %v2992_v13 = vrot.slane %v2926_v18, 2 }
 0x4c3   : > { %v8307_v60 = vsel %vm3533_vm11, %v3504_v15, %v3505_v29 }
 0x4c4   : > { %v3344_v45 = vpop.f32.mrf.mxu2  ;;  %v3569_v26 = vrot.slane %v8307_v60, 1  ;;  %v3038_v11 = vsel %vm3015_vm10, %v2991_v44, %v2992_v13  ;;  %v8322_v44 = vpop.f32.mrf.mxu3 }
 0x4c5   : > { %v3345_v12 = vadd.f32 %v3344_v45, %v8202_v9  ;;  %v8316_v3 = vadd.f32 %v3038_v11, %v9548_v21  ;;  %v9550_v45 = vld [vmem:[#allocation18_spill] sm:$0xff] }
 0x4c6   : > { %v3626_v56 = vsel %vm2433_vm2, %v3568_v63, %v3569_v26 }
 0x4c7   : > { %v3434_v33 = vadd.f32 %v3433_v59, %v3345_v12  ;;  %3634 = vrot.lane.b32.xlu0 %v3626_v56, %s5674_s22  ;;  %v2928_v18 = vpop.f32.mrf.mxu1  ;;  %v3436_v15 = vpop.f32.mrf.mxu0  ;;  %v9551_v12 = vld [vmem:[#allocation58_spill] sm:$0xff] }
 0x4c8   : > { %v2929_v51 = vadd.f32 %v2928_v18, %v7905_v38  ;;  %3317 = vmatmul.bf16.gmra.mxu3 %v9491_v55 }
 0x4c9   : > { %v3506_v34 = vrot.slane %v3434_v33, 3  ;;  %3386 = vmatmul.bf16.gmra.mxu2 %v9549_v47 }
 0x4ca   : > { %v2993_v9 = vrot.slane %v2929_v51, 2  ;;  %5237 = vmatmul.msk.bf16.gmra.mxu1 %vm1010_vm1, %v9550_v45  ;;  %5327 = vmatmul.msk.bf16.gmra.mxu0 %vm1010_vm1, %v9539_v52 }
 0x4cb   : > { %v8330_v63 = vsel %vm3533_vm11, %v3505_v29, %v3506_v34 }
 0x4cc   : > { %v3347_v59 = vpop.f32.mrf.mxu2  ;;  %v3570_v38 = vrot.slane %v8330_v63, 1  ;;  %v3037_v55 = vsel %vm3015_vm10, %v2992_v13, %v2993_v9 }
 0x4cd   : > { %v3348_v47 = vadd.f32 %v3347_v59, %v8212_v50  ;;  %v8339_v56 = vadd.f32 %v3037_v55, %v9551_v12 }
 0x4ce   : > { %v3625_v11 = vsel %vm2433_vm2, %v3569_v26, %v3570_v38  ;;  %v8348_v26 = vpop.f32.mrf.mxu3 }
 0x4cf   : > { %v3437_v21 = vadd.f32 %v3436_v15, %v3348_v47  ;;  %3636 = vrot.lane.b32.xlu0 %v3625_v11, %s5674_s22  ;;  %v2930_v52 = vpop.f32.mrf.mxu1  ;;  %v3438_v29 = vpop.f32.mrf.mxu0  ;;  %v9552_v11 = vld [vmem:[#allocation113_spill] sm:$0xff] }
 0x4d0   : > { %v2931_v18 = vadd.f32 %v2930_v52, %v7917_v61 }
 0x4d1   : > { %v3507_v33 = vrot.slane %v3437_v21, 3 }
 0x4d2   : > { %v2994_v51 = vrot.slane %v2931_v18, 2  ;;  %v9554_v18 = vld [vmem:[#allocation106_spill] sm:$0xff] }
 0x4d3   : > { %v8345_v13 = vsel %vm3533_vm11, %v3506_v34, %v3507_v33 }
 0x4d4   : > { %v3349_v50 = vpop.f32.mrf.mxu2  ;;  %v3571_v59 = vrot.slane %v8345_v13, 1  ;;  %v3036_v15 = vsel %vm3015_vm10, %v2993_v9, %v2994_v51 }
 0x4d5   : > { %v3350_v55 = vadd.f32 %v3349_v50, %v8227_v37  ;;  %v8356_v61 = vadd.f32 %v3036_v15, %v9552_v11  ;;  %v9556_v37 = vld [vmem:[#allocation21_spill] sm:$0xff] }
 0x4d6   : > { %v3624_v47 = vsel %vm2433_vm2, %v3570_v38, %v3571_v59 }
 0x4d7   : > { %9553 = vst [vmem:[#allocation104_spill] sm:$0xff] %v8356_v61  ;;  %v3439_v12 = vadd.f32 %v3438_v29, %v3350_v55  ;;  %3638 = vrot.lane.b32.xlu1 %v3624_v47, %s5674_s22  ;;  %v2933_v34 = vpop.f32.mrf.mxu1  ;;  %v3441_v21 = vpop.f32.mrf.mxu0  ;;  %v9560_v61 = vld [vmem:[#allocation127_spill] sm:$0xff] }
 0x4d8   : > { %v2934_v7 = vadd.f32 %v2933_v34, %v9554_v18  ;;  %4204 = vmatmul.f32.vlgmr.msrb.gmra.mxu3 %v7974_v2  ;;  %v8379_v47 = vpop.f32.mrf.mxu3 }
 0x4d9   : > { %v3508_v52 = vrot.slane %v3439_v12, 3  ;;  %3391 = vmatmul.bf16.gmra.mxu2 %v9555_v40 }
 0x4da   : > { %v2995_v9 = vrot.slane %v2934_v7, 2  ;;  %5238 = vmatmul.msk.bf16.gmra.mxu1 %vm1010_vm1, %v9556_v37  ;;  %5328 = vmatmul.msk.bf16.gmra.mxu0 %vm1010_vm1, %v9545_v8  ;;  %v9557_v7 = vld [vmem:[#allocation62_spill] sm:$0xff] }
 0x4db   : > { %v8368_v38 = vsel %vm3533_vm11, %v3507_v33, %v3508_v52 }
 0x4dc   : > { %v3352_v29 = vpop.f32.mrf.mxu2  ;;  %v3572_v50 = vrot.slane %v8368_v38, 1  ;;  %v3035_v15 = vsel %vm3015_vm10, %v2994_v51, %v2995_v9 }
 0x4dd   : > { %v3353_v40 = vadd.f32 %v3352_v29, %v8245_v0  ;;  %v8377_v55 = vadd.f32 %v3035_v15, %v9557_v7 }
 0x4de   : > { %v3623_v2 = vsel %vm2433_vm2, %v3571_v59, %v3572_v50 }
 0x4df   : > { %v3442_v8 = vadd.f32 %v3441_v21, %v3353_v40  ;;  %3640 = vrot.lane.b32.xlu1 %v3623_v2, %s5674_s22  ;;  %v2935_v33 = vpop.f32.mrf.mxu1  ;;  %v3443_v11 = vpop.f32.mrf.mxu0  ;;  %v9558_v40 = vld [vmem:[#allocation56_spill] sm:$0xff] }
 0x4e0   : > { %v2936_v34 = vadd.f32 %v2935_v33, %v7944_v43 }
 0x4e1   : > { %v3509_v12 = vrot.slane %v3442_v8, 3  ;;  %v8397_v8 = vpop.f32.mrf.mxu3 }
 0x4e2   : > { %v2996_v18 = vrot.slane %v2936_v34, 2 }
 0x4e3   : > { %v8385_v0 = vsel %vm3533_vm11, %v3508_v52, %v3509_v12 }
 0x4e4   : > { %v3354_v51 = vpop.f32.mrf.mxu2  ;;  %v3573_v59 = vrot.slane %v8385_v0, 1  ;;  %v3034_v29 = vsel %vm3015_vm10, %v2995_v9, %v2996_v18 }
 0x4e5   : > { %v3355_v21 = vadd.f32 %v3354_v51, %v8278_v20  ;;  %v8394_v2 = vadd.f32 %v3034_v29, %v9558_v40  ;;  %v9561_v20 = vld [vmem:[#allocation24_spill] sm:$0xff] }
 0x4e6   : > { %v3622_v15 = vsel %vm2433_vm2, %v3572_v50, %v3573_v59 }
 0x4e7   : > { %9559 = vst [vmem:[#allocation42_spill] sm:$0xff] %v8394_v2  ;;  %v3444_v43 = vadd.f32 %v3443_v11, %v3355_v21  ;;  %3642 = vrot.lane.b32.xlu0 %v3622_v15, %s5674_s22  ;;  %v2938_v7 = vpop.f32.mrf.mxu1  ;;  %v3446_v52 = vpop.f32.mrf.mxu0  ;;  %v9562_v21 = vld [vmem:[#allocation118_spill] sm:$0xff] }
 0x4e8   : > { %v2939_v34 = vadd.f32 %v2938_v7, %v7959_v23 }
 0x4e9   : > { %v3510_v33 = vrot.slane %v3444_v43, 3  ;;  %3396 = vmatmul.bf16.gmra.mxu2 %v9560_v61 }
 0x4ea   : > { %v2997_v9 = vrot.slane %v2939_v34, 2  ;;  %5239 = vmatmul.msk.bf16.gmra.mxu1 %vm1010_vm1, %v9561_v20  ;;  %5329 = vmatmul.msk.bf16.gmra.mxu0 %vm1010_vm1, %v9550_v45  ;;  %v8420_v34 = vpop.f32.mrf.mxu3 }
 0x4eb   : > { %v8407_v50 = vsel %vm3533_vm11, %v3509_v12, %v3510_v33 }
 0x4ec   : > { %v3357_v11 = vpop.f32.mrf.mxu2  ;;  %v3574_v51 = vrot.slane %v8407_v50, 1  ;;  %v3033_v29 = vsel %vm3015_vm10, %v2996_v18, %v2997_v9 }
 0x4ed   : > { %v3358_v23 = vadd.f32 %v3357_v11, %v8302_v27  ;;  %v8416_v15 = vadd.f32 %v3033_v29, %v9562_v21 }
 0x4ee   : > { %v3621_v61 = vsel %vm2433_vm2, %v3573_v59, %v3574_v51 }
 0x4ef   : > { %9563 = vst [vmem:[#allocation108_spill] sm:$0xff] %v8416_v15  ;;  %v3447_v40 = vadd.f32 %v3446_v52, %v3358_v23  ;;  %3644 = vrot.lane.b32.xlu1 %v3621_v61, %s5674_s22  ;;  %v2940_v45 = vpop.f32.mrf.mxu1  ;;  %v3448_v12 = vpop.f32.mrf.mxu0  ;;  %v9564_v23 = vld [vmem:[#allocation60_spill] sm:$0xff] }
 0x4f0   : > { %v2941_v7 = vadd.f32 %v2940_v45, %v7971_v10 }
 0x4f1   : > { %v3511_v43 = vrot.slane %v3447_v40, 3 }
 0x4f2   : > { %v2998_v2 = vrot.slane %v2941_v7, 2  ;;  %v9565_v7 = vld [vmem:[#allocation131_spill] sm:$0xff] }
 0x4f3   : > { %v8424_v27 = vsel %vm3533_vm11, %v3510_v33, %v3511_v43 }
 0x4f4   : > { %v3359_v18 = vpop.f32.mrf.mxu2  ;;  %v3575_v59 = vrot.slane %v8424_v27, 1  ;;  %v3032_v52 = vsel %vm3015_vm10, %v2997_v9, %v2998_v2 }
 0x4f5   : > { %v3360_v11 = vadd.f32 %v3359_v18, %v8322_v44  ;;  %v8433_v10 = vadd.f32 %v3032_v52, %v9564_v23 }
 0x4f6   : > { %v3620_v29 = vsel %vm2433_vm2, %v3574_v51, %v3575_v59 }
 0x4f7   : > { %v3449_v61 = vadd.f32 %v3448_v12, %v3360_v11  ;;  %3646 = vrot.lane.b32.xlu2 %v3620_v29, %s5674_s22  ;;  %v2943_v21 = vpop.f32.mrf.mxu1  ;;  %v3451_v33 = vpop.f32.mrf.mxu0  ;;  %v9566_v11 = vld [vmem:[#allocation120_spill] sm:$0xff] }
 0x4f8   : > { %v2944_v45 = vadd.f32 %v2943_v21, %v7989_v57  ;;  %v8445_v12 = vpop.f32.mrf.mxu3 }
 0x4f9   : > { %v3512_v40 = vrot.slane %v3449_v61, 3  ;;  %3401 = vmatmul.bf16.gmra.mxu2 %v9565_v7 }
 0x4fa   : > { %v2999_v15 = vrot.slane %v2944_v45, 2  ;;  %5330 = vmatmul.msk.bf16.gmra.mxu0 %vm1010_vm1, %v9556_v37 }
 0x4fb   : > { %v8442_v44 = vsel %vm3533_vm11, %v3511_v43, %v3512_v40 }
 0x4fc   : > { %v3362_v9 = vpop.f32.mrf.mxu2  ;;  %v3576_v51 = vrot.slane %v8442_v44, 1  ;;  %v3031_v18 = vsel %vm3015_vm10, %v2998_v2, %v2999_v15 }
 0x4fd   : > { %v3363_v57 = vadd.f32 %v3362_v9, %v8348_v26  ;;  %v8453_v29 = vadd.f32 %v3031_v18, %v9566_v11  ;;  %v9568_v18 = vld [vmem:[#allocation64_spill] sm:$0xff] }
 0x4fe   : > { %v3619_v52 = vsel %vm2433_vm2, %v3575_v59, %v3576_v51 }
 0x4ff   : > { %9567 = vst [vmem:[#allocation46_spill] sm:$0xff] %v8453_v29  ;;  %v3452_v37 = vadd.f32 %v3451_v33, %v3363_v57  ;;  %3648 = vrot.lane.b32.xlu0 %v3619_v52, %s5674_s22  ;;  %v2945_v43 = vpop.f32.mrf.mxu1  ;;  %v3453_v23 = vpop.f32.mrf.mxu0 }
 0x500   : > { %v2946_v21 = vadd.f32 %v2945_v43, %v8000_v39  ;;  %v8470_v39 = vpop.f32.mrf.mxu3 }
 0x501   : > { %v3513_v61 = vrot.slane %v3452_v37, 3 }
 0x502   : > { %v3000_v45 = vrot.slane %v2946_v21, 2  ;;  %v9570_v21 = vld [vmem:[#allocation136_spill] sm:$0xff] }
 0x503   : > { %v8459_v2 = vsel %vm3533_vm11, %v3512_v40, %v3513_v61 }
 0x504   : > { %v3364_v26 = vpop.f32.mrf.mxu2  ;;  %v3577_v7 = vrot.slane %v8459_v2, 1  ;;  %v3030_v59 = vsel %vm3015_vm10, %v2999_v15, %v3000_v45 }
 0x505   : > { %v3365_v33 = vadd.f32 %v3364_v26, %v8379_v47  ;;  %v8468_v57 = vadd.f32 %v3030_v59, %v9568_v18 }
 0x506   : > { %v3618_v9 = vsel %vm2433_vm2, %v3576_v51, %v3577_v7 }
 0x507   : > { %9569 = vst [vmem:[#allocation145_spill] sm:$0xff] %v8468_v57  ;;  %v3454_v52 = vadd.f32 %v3453_v23, %v3365_v33  ;;  %3650 = vrot.lane.b32.xlu1 %v3618_v9, %s5674_s22  ;;  %v2948_v40 = vpop.f32.mrf.mxu1  ;;  %v3456_v11 = vpop.f32.mrf.mxu0  ;;  %v9571_v33 = vld [vmem:[#allocation76_spill] sm:$0xff] }
 0x508   : > { %v2949_v43 = vadd.f32 %v2948_v40, %v8015_v48 }
 0x509   : > { %v3514_v37 = vrot.slane %v3454_v52, 3  ;;  %3406 = vmatmul.bf16.gmra.mxu2 %v9570_v21  ;;  %v9573_v52 = vlaneseq }
 0x50a   : > { %v3001_v15 = vrot.slane %v2949_v43, 2  ;;  %5331 = vmatmul.msk.bf16.gmra.mxu0 %vm1010_vm1, %v9561_v20  ;;  %v8494_v43 = vpop.f32.mrf.mxu3 }
 0x50b   : > { %v8479_v47 = vsel %vm3533_vm11, %v3513_v61, %v3514_v37  ;;  %v8492_v40 = vand.u32 127, %v9573_v52 }
 0x50c   : > { %v3367_v51 = vpop.f32.mrf.mxu2  ;;  %v3578_v23 = vrot.slane %v8479_v47, 1  ;;  %v3029_v26 = vsel %vm3015_vm10, %v3000_v45, %v3001_v15 }
 0x50d   : > { %v3368_v59 = vadd.f32 %v3367_v51, %v8397_v8  ;;  %v8488_v9 = vadd.f32 %v3029_v26, %v9571_v33  ;;  %v4267_v51 = vld [vmem:[#allocation3 + $0x178] sm:$0xff]  ;;  %vm3696_vm12 = vcmp.lt.s32.totalorder %v8492_v40, 64 }
 0x50e   : > { %v3617_v48 = vsel %vm2433_vm2, %v3577_v7, %v3578_v23  ;;  %4291 = vmatpush.msrb.mxu1 %v4267_v51 }
 0x50f   : > { %9572 = vst [vmem:[#allocation111_spill] sm:$0xff] %v8488_v9  ;;  %v3457_v18 = vadd.f32 %v3456_v11, %v3368_v59  ;;  %3652 = vrot.lane.b32.xlu2 %v3617_v48, %s5674_s22  ;;  %v3458_v20 = vpop.f32.mrf.mxu0  ;;  %v2950_v61 = vpop.f32.mrf.mxu1 }
 0x510   : > { %v2951_v8 = vadd.f32 %v2950_v61, %v8028_v25  ;;  %v9574_v61 = vld [vmem:[#allocation123_spill] sm:$0xff] }
 0x511   : > { %v3515_v21 = vrot.slane %v3457_v18, 3  ;;  %v3631_v45 = vpop.permute.xlu2 %3630 }
 0x512   : > { %v3002_v7 = vrot.slane %v2951_v8, 2  ;;  %v3697_v11 = vadd.f32 %v3631_v45, %v8260_v49 }
 0x513   : > { %v8499_v26 = vsel %vm3533_vm11, %v3514_v37, %v3515_v21 }
 0x514   : > { %v3369_v59 = vpop.f32.mrf.mxu2  ;;  %v3579_v48 = vrot.slane %v8499_v26, 1  ;;  %v3028_v33 = vsel %vm3015_vm10, %v3001_v15, %v3002_v7  ;;  %v3729_v45 = vsel %vm3696_vm12, %v3697_v11, 0.0  ;;  %v8525_v11 = vld [vmem:[%s9016_s5] sm:$0xff] }
 0x515   : > { %v3370_v18 = vadd.f32 %v3369_v59, %v8420_v34  ;;  %v8510_v52 = vadd.f32 %v3028_v33, %v9574_v61  ;;  %v3290_v59 = vpop.f32.mrf.mxu3  ;;  %v8530_v33 = vld [vmem:[%s9016_s5 + $0x10] sm:$0xff] }
 0x516   : > { %v3616_v25 = vsel %vm2433_vm2, %v3578_v23, %v3579_v48  ;;  %v3761_v23 = vadd.f32 %v3729_v45, %v8179_v58  ;;  %v9576_v61 = vld [vmem:[#allocation69_spill] sm:$0xff] }
 0x517   : > { %9575 = vst [vmem:[#allocation51_spill] sm:$0xff] %v8510_v52  ;;  %v3459_v37 = vadd.f32 %v3458_v20, %v3370_v18  ;;  %3654 = vrot.lane.b32.xlu0 %v3616_v25, %s5674_s22  ;;  %v3461_v8 = vpop.f32.mrf.mxu0  ;;  %v2953_v51 = vpop.f32.mrf.mxu1  ;;  %v4265_v52 = vld [vmem:[#allocation3 + $0x168] sm:$0xff] }
 0x518   : > { %v2954_v15 = vadd.f32 %v2953_v51, %v8044_v41  ;;  %v3797_v45 = vadd.f32 %v8525_v11, %v3761_v23 }
 0x519   : > { %v3516_v9 = vrot.slane %v3459_v37, 3  ;;  %v3633_v57 = vpop.permute.xlu2 %3632 }
 0x51a   : > { %v3698_v34 = vadd.f32 %v3633_v57, %v8264_v14  ;;  %v3003_v29 = vrot.slane %v2954_v15, 2 }
 0x51b   : > { %v8520_v20 = vsel %vm3533_vm11, %v3515_v21, %v3516_v9 }
 0x51c   : > { %v3730_v41 = vsel %vm3696_vm12, %v3698_v34, 0.0  ;;  %v3372_v14 = vpop.f32.mrf.mxu2  ;;  %v3580_v58 = vrot.slane %v8520_v20, 1  ;;  %v3027_v21 = vsel %vm3015_vm10, %v3002_v7, %v3003_v29 }
 0x51d   : > { %v3762_v57 = vadd.f32 %v3730_v41, %v8197_v16  ;;  %v3373_v18 = vadd.f32 %v3372_v14, %v8445_v12  ;;  %v8542_v37 = vadd.f32 %v3027_v21, %v9576_v61  ;;  %v4266_v14 = vld [vmem:[#allocation3 + $0x170] sm:$0xff] }
 0x51e   : > { %v3615_v25 = vsel %vm2433_vm2, %v3579_v48, %v3580_v58  ;;  %4292 = vmatpush.msrb.mxu1 %v4266_v14 }
 0x51f   : > { %v3798_v51 = vadd.f32 %v8530_v33, %v3762_v57  ;;  %v3462_v15 = vadd.f32 %v3461_v8, %v3373_v18  ;;  %3656 = vrot.lane.b32.xlu1 %v3615_v25, %s5674_s22  ;;  %v2955_v34 = vpop.f32.mrf.mxu1  ;;  %v3463_v16 = vpop.f32.mrf.mxu0 }
 0x520   : > { %v2956_v12 = vadd.f32 %v2955_v34, %v8056_v46  ;;  %v3293_v8 = vpop.f32.mrf.mxu3  ;;  %v9577_v46 = vld [vmem:[#allocation80_spill] sm:$0xff]  ;;  %4293 = vmatpush.msrb.mxu1 %v4265_v52 }
 0x521   : > { %v8547_v41 = vmax.f32 %v3797_v45, %v3798_v51  ;;  %v3517_v7 = vrot.slane %v3462_v15, 3 }
 0x522   : > { %v3004_v48 = vrot.slane %v2956_v12, 2 }
 0x523   : > { %v8552_v21 = vsel %vm3533_vm11, %v3516_v9, %v3517_v7 }
 0x524   : > { %v3374_v23 = vpop.f32.mrf.mxu2  ;;  %v3581_v57 = vrot.slane %v8552_v21, 1  ;;  %v3026_v18 = vsel %vm3015_vm10, %v3003_v29, %v3004_v48 }
 0x525   : > { %v3375_v25 = vadd.f32 %v3374_v23, %v8470_v39  ;;  %v8561_v45 = vadd.f32 %v3026_v18, %v9577_v46 }
 0x526   : > { %v3614_v61 = vsel %vm2433_vm2, %v3580_v58, %v3581_v57 }
 0x527   : > { %9578 = vst [vmem:[#allocation147_spill] sm:$0xff] %v8561_v45  ;;  %v3464_v51 = vadd.f32 %v3463_v16, %v3375_v25  ;;  %3658 = vrot.lane.b32.xlu2 %v3614_v61, %s5674_s22  ;;  %v2958_v9 = vpop.f32.mrf.mxu1  ;;  %v3466_v15 = vpop.f32.mrf.mxu0  ;;  %v9579_v25 = vld [vmem:[#allocation125_spill] sm:$0xff] }
 0x528   : > { %v2959_v12 = vadd.f32 %v2958_v9, %v8072_v19  ;;  %v3295_v19 = vpop.f32.mrf.mxu3 }
 0x529   : > { %v3518_v34 = vrot.slane %v3464_v51, 3 }
 0x52a   : > { %v3005_v14 = vrot.slane %v2959_v12, 2 }
 0x52b   : > { %v8567_v29 = vsel %vm3533_vm11, %v3517_v7, %v3518_v34 }
 0x52c   : > { %v3377_v39 = vpop.f32.mrf.mxu2  ;;  %v3582_v23 = vrot.slane %v8567_v29, 1  ;;  %v3025_v58 = vsel %vm3015_vm10, %v3004_v48, %v3005_v14 }
 0x52d   : > { %v3378_v16 = vadd.f32 %v3377_v39, %v8494_v43  ;;  %v8576_v61 = vadd.f32 %v3025_v58, %v9579_v25 }
 0x52e   : > { %v3613_v18 = vsel %vm2433_vm2, %v3581_v57, %v3582_v23 }
 0x52f   : > { %9580 = vst [vmem:[#allocation35_spill] sm:$0xff] %v8576_v61  ;;  %v3467_v46 = vadd.f32 %v3466_v15, %v3378_v16  ;;  %3660 = vrot.lane.b32.xlu0 %v3613_v18, %s5674_s22  ;;  %v2960_v7 = vpop.f32.mrf.mxu1  ;;  %v3468_v51 = vpop.f32.mrf.mxu0  ;;  %v9581_v16 = vld [vmem:[#allocation73_spill] sm:$0xff] }
 0x530   : > { %v2961_v12 = vadd.f32 %v2960_v7, %v8084_v5 }
 0x531   : > { %v3519_v9 = vrot.slane %v3467_v46, 3 }
 0x532   : > { %v3006_v45 = vrot.slane %v2961_v12, 2 }
 0x533   : > { %v8582_v48 = vsel %vm3533_vm11, %v3518_v34, %v3519_v9  ;;  %v3298_v34 = vpop.f32.mrf.mxu3 }
 0x534   : > { %v3379_v43 = vpop.f32.mrf.mxu2  ;;  %v3583_v57 = vrot.slane %v8582_v48, 1  ;;  %v3024_v39 = vsel %vm3015_vm10, %v3005_v14, %v3006_v45 }
 0x535   : > { %v3380_v58 = vadd.f32 %v3379_v43, %v3290_v59  ;;  %v8590_v18 = vadd.f32 %v3024_v39, %v9581_v16 }
 0x536   : > { %v3612_v15 = vsel %vm2433_vm2, %v3582_v23, %v3583_v57 }
 0x537   : > { %v3469_v25 = vadd.f32 %v3468_v51, %v3380_v58  ;;  %3662 = vrot.lane.b32.xlu2 %v3612_v15, %s5674_s22  ;;  %v3471_v5 = vpop.f32.mrf.mxu0  ;;  %v2963_v46 = vpop.f32.mrf.mxu1 }
 0x538   : > { %v2964_v61 = vadd.f32 %v2963_v46, %v8098_v1  ;;  %v9582_v1 = vld [vmem:[#allocation85_spill] sm:$0xff] }
 0x539   : > { %v3520_v7 = vrot.slane %v3469_v25, 3  ;;  %v3635_v12 = vpop.permute.xlu0 %3634  ;;  %v3862_v25 = vrot.slane %v8547_v41, 4 }
 0x53a   : > { %v3007_v14 = vrot.slane %v2964_v61, 2  ;;  %v3699_v23 = vadd.f32 %v3635_v12, %v8290_v22 }
 0x53b   : > { %v8596_v59 = vsel %vm3533_vm11, %v3519_v9, %v3520_v7 }
 0x53c   : > { %v3382_v43 = vpop.f32.mrf.mxu2  ;;  %v3584_v51 = vrot.slane %v8596_v59, 1  ;;  %v3023_v39 = vsel %vm3015_vm10, %v3006_v45, %v3007_v14  ;;  %v3731_v61 = vsel %vm3696_vm12, %v3699_v23, 0.0 }
 0x53d   : > { %v3383_v58 = vadd.f32 %v3382_v43, %v3293_v8  ;;  %v8605_v16 = vadd.f32 %v3023_v39, %v9582_v1  ;;  %v3763_v43 = vadd.f32 %v3731_v61, %v8210_v28  ;;  %v3863_v1 = vmax.f32 %v8547_v41, %v3862_v25  ;;  %v9583_v61 = vld [vmem:[#allocation78_spill] sm:$0xff] }
 0x53e   : > { %v3611_v15 = vsel %vm2433_vm2, %v3583_v57, %v3584_v51  ;;  %v8613_v57 = vpop.f32.mrf.mxu3 }
 0x53f   : > { %v3472_v52 = vadd.f32 %v3471_v5, %v3383_v58  ;;  %3664 = vrot.lane.b32.xlu0 %v3611_v15, %s5674_s22  ;;  %v3473_v22 = vpop.f32.mrf.mxu0  ;;  %v2965_v9 = vpop.f32.mrf.mxu1 }
 0x540   : > { %v2966_v8 = vadd.f32 %v2965_v9, %v8110_v30  ;;  %v3799_v9 = vadd.f32 %v8525_v11, %v3763_v43 }
 0x541   : > { %v3521_v46 = vrot.slane %v3472_v52, 3  ;;  %v3637_v12 = vpop.permute.xlu0 %3636 }
 0x542   : > { %v3700_v45 = vadd.f32 %v3637_v12, %v8307_v60  ;;  %v3008_v5 = vrot.slane %v2966_v8, 2 }
 0x543   : > { %v8618_v39 = vsel %vm3533_vm11, %v3520_v7, %v3521_v46 }
 0x544   : > { %v3732_v23 = vsel %vm3696_vm12, %v3700_v45, 0.0  ;;  %v3384_v58 = vpop.f32.mrf.mxu2  ;;  %v3585_v15 = vrot.slane %v8618_v39, 1  ;;  %v3022_v60 = vsel %vm3015_vm10, %v3007_v14, %v3008_v5 }
 0x545   : > { %v3764_v30 = vadd.f32 %v3732_v23, %v8224_v36  ;;  %v3385_v52 = vadd.f32 %v3384_v58, %v3295_v19  ;;  %v8630_v7 = vadd.f32 %v3022_v60, %v9583_v61  ;;  %v3864_v36 = vrot.slane %v3863_v1, 2  ;;  %v4264_v58 = vld [vmem:[#allocation3 + $0x160] sm:$0xff] }
 0x546   : > { %v3610_v28 = vsel %vm2433_vm2, %v3584_v51, %v3585_v15  ;;  %4294 = vmatpush.msrb.mxu1 %v4264_v58  ;;  %v3303_v61 = vpop.f32.mrf.mxu3 }
 0x547   : > { %v3800_v12 = vadd.f32 %v8530_v33, %v3764_v30  ;;  %v3474_v8 = vadd.f32 %v3473_v22, %v3385_v52  ;;  %3666 = vrot.lane.b32.xlu1 %v3610_v28, %s5674_s22  ;;  %v3476_v41 = vpop.f32.mrf.mxu0  ;;  %v2968_v25 = vpop.f32.mrf.mxu1  ;;  %v3865_v28 = vmax.f32 %v3863_v1, %v3864_v36 }
 0x548   : > { %v2969_v19 = vadd.f32 %v2968_v25, %v8126_v32  ;;  %v9584_v25 = vld [vmem:[#allocation129_spill] sm:$0xff] }
 0x549   : > { %v3868_v45 = vmax.f32 %v3799_v9, %v3800_v12  ;;  %v3522_v23 = vrot.slane %v3474_v8, 3  ;;  %v3639_v14 = vpop.permute.xlu1 %3638 }
 0x54a   : > { %v3009_v60 = vrot.slane %v2969_v19, 2  ;;  %v3701_v22 = vadd.f32 %v3639_v14, %v8330_v63 }
 0x54b   : > { %v3869_v51 = vrot.slane %v3868_v45, 4  ;;  %v8638_v43 = vsel %vm3533_vm11, %v3521_v46, %v3522_v23 }
 0x54c   : > { %v3387_v30 = vpop.f32.mrf.mxu2  ;;  %v3586_v52 = vrot.slane %v8638_v43, 1  ;;  %v3021_v12 = vsel %vm3015_vm10, %v3008_v5, %v3009_v60  ;;  %v3733_v63 = vsel %vm3696_vm12, %v3701_v22, 0.0 }
 0x54d   : > { %v3870_v9 = vmax.f32 %v3868_v45, %v3869_v51  ;;  %v3388_v32 = vadd.f32 %v3387_v30, %v3298_v34  ;;  %v8647_v19 = vadd.f32 %v3021_v12, %v9584_v25  ;;  %v3866_v45 = vrot.slane %v3865_v28, 1 }
 0x54e   : > { %v3609_v8 = vsel %vm2433_vm2, %v3585_v15, %v3586_v52  ;;  %v3765_v12 = vadd.f32 %v3733_v63, %v8233_v6  ;;  %v9585_v63 = vld [vmem:[#allocation92_spill] sm:$0xff] }
 0x54f   : > { %v3871_v46 = vrot.slane %v3870_v9, 2  ;;  %v3477_v58 = vadd.f32 %v3476_v41, %v3388_v32  ;;  %3668 = vrot.lane.b32.xlu2 %v3609_v8, %s5674_s22  ;;  %v3478_v1 = vpop.f32.mrf.mxu0  ;;  %v2970_v36 = vpop.f32.mrf.mxu1 }
 0x550   : > { %v2971_v34 = vadd.f32 %v2970_v36, %v8142_v53  ;;  %v8665_v53 = vld [vmem:[%s9015_s4] ss:$0 sm:$0xff] }
 0x551   : > { %v3872_v14 = vmax.f32 %v3870_v9, %v3871_v46  ;;  %v3523_v51 = vrot.slane %v3477_v58, 3  ;;  %v3641_v5 = vpop.permute.xlu1 %3640 }
 0x552   : > { %v3702_v15 = vadd.f32 %v3641_v5, %v8345_v13  ;;  %v3010_v25 = vrot.slane %v2971_v34, 2  ;;  %v3867_v13 = vmax.f32 %v3865_v28, %v3866_v45  ;;  %v3305_v5 = vpop.f32.mrf.mxu3 }
 0x553   : > { %v3873_v30 = vrot.slane %v3872_v14, 1  ;;  %v8657_v41 = vsel %vm3533_vm11, %v3522_v23, %v3523_v51 }
 0x554   : > { %v3734_v22 = vsel %vm3696_vm12, %v3702_v15, 0.0  ;;  %v3389_v32 = vpop.f32.mrf.mxu2  ;;  %v3587_v9 = vrot.slane %v8657_v41, 1  ;;  %v3020_v46 = vsel %vm3015_vm10, %v3009_v60, %v3010_v25  ;;  %v3801_v15 = vadd.f32 %v8525_v11, %v3765_v12 }
 0x555   : > { %v3874_v8 = vmax.f32 %v3872_v14, %v3873_v30  ;;  %v3766_v6 = vadd.f32 %v3734_v22, %v8252_v4  ;;  %v3390_v23 = vadd.f32 %v3389_v32, %v8613_v57  ;;  %v8674_v36 = vadd.f32 %v3020_v46, %v9585_v63  ;;  %v4263_v32 = vld [vmem:[#allocation3 + $0x158] sm:$0xff] }
 0x556   : > { %v3608_v58 = vsel %vm2433_vm2, %v3586_v52, %v3587_v9  ;;  %v3977_v57 = vadd.f32 %v8665_v53, %v3867_v13  ;;  %4295 = vmatpush.msrb.mxu1 %v4263_v32 }
 0x557   : > { %v3978_v34 = vadd.f32 %v8665_v53, %v3874_v8  ;;  %v3802_v28 = vadd.f32 %v8530_v33, %v3766_v6  ;;  %3670 = vrot.lane.b32.xlu0 %v3608_v58, %s5674_s22  ;;  %v3479_v4 = vadd.f32 %v3478_v1, %v3390_v23  ;;  %v3481_v45 = vpop.f32.mrf.mxu0  ;;  %v2973_v60 = vpop.f32.mrf.mxu1 }
 0x558   : > { %v2974_v22 = vadd.f32 %v2973_v60, %v8164_v35 }
 0x559   : > { %v4216_v14 = vrot.slane %v3978_v34, 7  ;;  %v3875_v30 = vmax.f32 %v3801_v15, %v3802_v28  ;;  %v3643_v52 = vpop.permute.xlu0 %3642  ;;  %v3524_v46 = vrot.slane %v3479_v4, 3  ;;  %v9586_v15 = vld [vmem:[#allocation40_spill] sm:$0xff] }
 0x55a   : > { %v3011_v63 = vrot.slane %v2974_v22, 2  ;;  %v3703_v6 = vadd.f32 %v3643_v52, %v8368_v38  ;;  %v3308_v22 = vpop.f32.mrf.mxu3 }
 0x55b   : > { %v3876_v8 = vrot.slane %v3875_v30, 4  ;;  %v4217_v12 = vsel %vm4167_vm3, %v4216_v14, %v3977_v57  ;;  %v8686_v1 = vsel %vm3533_vm11, %v3523_v51, %v3524_v46 }
 0x55c   : > { %v3392_v58 = vpop.f32.mrf.mxu2  ;;  %v3019_v23 = vsel %vm3015_vm10, %v3010_v25, %v3011_v63  ;;  %v3588_v35 = vrot.slane %v8686_v1, 1  ;;  %v3735_v38 = vsel %vm3696_vm12, %v3703_v6, 0.0 }
 0x55d   : > { %v3877_v13 = vmax.f32 %v3875_v30, %v3876_v8  ;;  %v3393_v34 = vadd.f32 %v3392_v58, %v3303_v61  ;;  %v8692_v28 = vadd.f32 %v3019_v23, %v9586_v15 }
 0x55e   : > { %v3607_v57 = vsel %vm2433_vm2, %v3587_v9, %v3588_v35 }
 0x55f   : > { %v3878_v4 = vrot.slane %v3877_v13, 2  ;;  %v3482_v60 = vadd.f32 %v3481_v45, %v3393_v34  ;;  %v3483_v51 = vpop.f32.mrf.mxu0  ;;  %v2975_v14 = vpop.f32.mrf.mxu1  ;;  %3672 = vrot.lane.b32.xlu1 %v3607_v57, %s5674_s22  ;;  %v3767_v45 = vadd.f32 %v3735_v38, %v8276_v24 }
 0x560   : > { %v2976_v25 = vadd.f32 %v2975_v14, %v8172_v31  ;;  %v3647_v38 = vpop.permute.xlu2 %3646 }
 0x561   : > { %v3879_v30 = vmax.f32 %v3877_v13, %v3878_v4  ;;  %v3525_v52 = vrot.slane %v3482_v60, 3  ;;  %v3645_v61 = vpop.permute.xlu1 %3644  ;;  %v9587_v4 = vld [vmem:[#allocation134_spill] sm:$0xff]  ;;  %v3803_v57 = vadd.f32 %v8525_v11, %v3767_v45 }
 0x562   : > { %v3704_v32 = vadd.f32 %v3645_v61, %v8385_v0  ;;  %v3012_v58 = vrot.slane %v2976_v25, 2  ;;  %v4140_v61 = vld [vmem:[#allocation3 + $0x78] sm:$0xff] }
 0x563   : > { %v3880_v8 = vrot.slane %v3879_v30, 1  ;;  %v8704_v6 = vsel %vm3533_vm11, %v3524_v46, %v3525_v52  ;;  %4231 = vmatpush.msra.mxu3 %v4140_v61 }
 0x564   : > { %v3736_v9 = vsel %vm3696_vm12, %v3704_v32, 0.0  ;;  %v3394_v13 = vpop.f32.mrf.mxu2  ;;  %v3589_v23 = vrot.slane %v8704_v6, 1  ;;  %v3018_v0 = vsel %vm3015_vm10, %v3011_v63, %v3012_v58 }
 0x565   : > { %v3881_v34 = vmax.f32 %v3879_v30, %v3880_v8  ;;  %v3768_v31 = vadd.f32 %v3736_v9, %v8299_v62  ;;  %v3395_v15 = vadd.f32 %v3394_v13, %v3305_v5  ;;  %v8715_v60 = vadd.f32 %v3018_v0, %v9587_v4  ;;  %v4139_v8 = vld [vmem:[#allocation3 + $0x70] sm:$0xff]  ;;  %v3310_v0 = vpop.f32.mrf.mxu3 }
 0x566   : > { %v3606_v24 = vsel %vm2433_vm2, %v3588_v35, %v3589_v23  ;;  %v3705_v9 = vadd.f32 %v3647_v38, %v8407_v50  ;;  %4232 = vmatpush.msra.mxu3 %v4139_v8  ;;  %v4137_v38 = vld [vmem:[#allocation3 + $0x60] sm:$0xff] }
 0x567   : > { %v3979_v46 = vadd.f32 %v8665_v53, %v3881_v34  ;;  %v3804_v14 = vadd.f32 %v8530_v33, %v3768_v31  ;;  %v3484_v30 = vadd.f32 %v3483_v51, %v3395_v15  ;;  %v3486_v62 = vpop.f32.mrf.mxu0  ;;  %v2978_v25 = vpop.f32.mrf.mxu1  ;;  %3674 = vrot.lane.b32.xlu1 %v3606_v24, %s5674_s22  ;;  %v4138_v34 = vld [vmem:[#allocation3 + $0x68] sm:$0xff] }
 0x568   : > { %v2979_v35 = vadd.f32 %v2978_v25, %v8194_v42  ;;  %4233 = vmatpush.msra.mxu3 %v4138_v34  ;;  %v4135_v34 = vld [vmem:[#allocation3 + $0x50] sm:$0xff] }
 0x569   : > { %v4218_v63 = vrot.slane %v3979_v46, 6  ;;  %v3882_v5 = vmax.f32 %v3803_v57, %v3804_v14  ;;  %v3526_v32 = vrot.slane %v3484_v30, 3  ;;  %v4262_v46 = vld [vmem:[#allocation3 + $0x150] sm:$0xff]  ;;  %v9588_v57 = vld [vmem:[#allocation99_spill] sm:$0xff]  ;;  %v3737_v14 = vsel %vm3696_vm12, %v3705_v9, 0.0  ;;  %v3653_v61 = vpop.permute.xlu2 %3652 }
 0x56a   : > { %v3013_v45 = vrot.slane %v2979_v35, 2  ;;  %4296 = vmatpush.msrb.mxu1 %v4262_v46  ;;  %4234 = vmatpush.msra.mxu3 %v4137_v38 }
 0x56b   : > { %v3883_v13 = vrot.slane %v3882_v5, 4  ;;  %v8725_v51 = vsel %vm3533_vm11, %v3525_v52, %v3526_v32  ;;  %v8728_v31 = vsel %vm4170_vm4, %v4218_v63, %v4217_v12 }
 0x56c   : > { %v3397_v15 = vpop.f32.mrf.mxu2  ;;  %v3590_v24 = vrot.slane %v8725_v51, 1  ;;  %v3017_v50 = vsel %vm3015_vm10, %v3012_v58, %v3013_v45  ;;  %v4136_v58 = vld [vmem:[#allocation3 + $0x58] sm:$0xff] }
 0x56d   : > { %v3884_v42 = vmax.f32 %v3882_v5, %v3883_v13  ;;  %v3398_v4 = vadd.f32 %v3397_v15, %v3308_v22  ;;  %v8736_v12 = vadd.f32 %v3017_v50, %v9588_v57  ;;  %4235 = vmatpush.msra.mxu3 %v4136_v58  ;;  %v4261_v13 = vld [vmem:[#allocation3 + $0x148] sm:$0xff]  ;;  %v3769_v15 = vadd.f32 %v3737_v14, %v8316_v3 }
 0x56e   : > { %v3605_v52 = vsel %vm2433_vm2, %v3589_v23, %v3590_v24  ;;  %4297 = vmatpush.msrb.mxu1 %v4261_v13  ;;  %v3708_v50 = vadd.f32 %v3653_v61, %v8459_v2  ;;  %v9589_v2 = vld [vmem:[#allocation141_spill] sm:$0xff]  ;;  %v3313_v61 = vpop.f32.mrf.mxu3 }
 0x56f   : > { %v3885_v30 = vrot.slane %v3884_v42, 2  ;;  %v3487_v25 = vadd.f32 %v3486_v62, %v3398_v4  ;;  %3676 = vrot.lane.b32.xlu2 %v3605_v52, %s5674_s22  ;;  %v3488_v22 = vpop.f32.mrf.mxu0  ;;  %v2980_v63 = vpop.f32.mrf.mxu1  ;;  %4236 = vmatpush.msra.mxu3 %v4135_v34  ;;  %v9590_v14 = vrot.slane %v9589_v2, 2 }
 0x570   : > { %v2981_v8 = vadd.f32 %v2980_v63, %v8205_v54  ;;  %v9591_v63 = vld [vmem:[#allocation137_spill] sm:$0xff]  ;;  %v3740_v13 = vsel %vm3696_vm12, %v3708_v50, 0.0  ;;  %v4130_v50 = vld [vmem:[#allocation3 + $0x28] sm:$0xff] }
 0x571   : > { %v3886_v5 = vmax.f32 %v3884_v42, %v3885_v30  ;;  %v3527_v35 = vrot.slane %v3487_v25, 3  ;;  %v3649_v23 = vpop.permute.xlu0 %3648  ;;  %v4134_v42 = vld [vmem:[#allocation3 + $0x48] sm:$0xff]  ;;  %v4133_v30 = vld [vmem:[#allocation3 + $0x40] sm:$0xff] }
 0x572   : > { %v3706_v9 = vadd.f32 %v3649_v23, %v8424_v27  ;;  %v3014_v4 = vrot.slane %v2981_v8, 2  ;;  %4237 = vmatpush.msra.mxu3 %v4134_v42 }
 0x573   : > { %v3887_v62 = vrot.slane %v3886_v5, 1  ;;  %v8747_v46 = vsel %vm3533_vm11, %v3526_v32, %v3527_v35 }
 0x574   : > { %v3738_v54 = vsel %vm3696_vm12, %v3706_v9, 0.0  ;;  %v3399_v38 = vpop.f32.mrf.mxu2  ;;  %v3591_v52 = vrot.slane %v8747_v46, 1  ;;  %v3016_v57 = vsel %vm3015_vm10, %v3013_v45, %v3014_v4  ;;  %v3047_v32 = vsel %vm3015_vm10, %v3014_v4, %v9590_v14  ;;  %4238 = vmatpush.msra.mxu3 %v4133_v30 }
 0x575   : > { %v3888_v3 = vmax.f32 %v3886_v5, %v3887_v62  ;;  %v3770_v27 = vadd.f32 %v3738_v54, %v8339_v56  ;;  %v3400_v25 = vadd.f32 %v3399_v38, %v3310_v0  ;;  %v8762_v23 = vadd.f32 %v3016_v57, %v9591_v63  ;;  %v9592_v5 = vld [vmem:[#allocation94_spill] sm:$0xff]  ;;  %v4131_v54 = vld [vmem:[#allocation3 + $0x30] sm:$0xff] }
 0x576   : > { %v3604_v58 = vsel %vm2433_vm2, %v3590_v24, %v3591_v52  ;;  %v8765_v56 = vadd.f32 %v3047_v32, %v9592_v5  ;;  %v3805_v45 = vadd.f32 %v8525_v11, %v3769_v15  ;;  %v4132_v0 = vld [vmem:[#allocation3 + $0x38] sm:$0xff]  ;;  %v3772_v38 = vadd.f32 %v3740_v13, %v8377_v55  ;;  %v9593_v55 = vld [vmem:[#allocation104_spill] sm:$0xff]  ;;  %v3315_v13 = vpop.f32.mrf.mxu3 }
 0x577   : > { %v3980_v8 = vadd.f32 %v8665_v53, %v3888_v3  ;;  %v3806_v34 = vadd.f32 %v8530_v33, %v3770_v27  ;;  %3678 = vrot.lane.b32.xlu0 %v3604_v58, %s5674_s22  ;;  %v3489_v24 = vadd.f32 %v3488_v22, %v3400_v25  ;;  %v3491_v9 = vpop.f32.mrf.mxu0  ;;  %4239 = vmatpush.msra.mxu3 %v4132_v0  ;;  %v4129_v58 = vld [vmem:[#allocation3 + $0x20] sm:$0xff] }
 0x578   : > { %v3808_v63 = vadd.f32 %v8530_v33, %v3772_v38 }
 0x579   : > { %v4220_v62 = vrot.slane %v3980_v8, 5  ;;  %v3889_v4 = vmax.f32 %v3805_v45, %v3806_v34  ;;  %v3651_v42 = vpop.permute.xlu1 %3650  ;;  %v3528_v15 = vrot.slane %v3489_v24, 3  ;;  %4240 = vmatpush.msra.mxu3 %v4131_v54  ;;  %v4127_v24 = vld [vmem:[#allocation3 + $0x10] sm:$0xff] }
 0x57a   : > { %v3707_v3 = vadd.f32 %v3651_v42, %v8442_v44 }
 0x57b   : > { %v3890_v57 = vrot.slane %v3889_v4, 4  ;;  %v4221_v27 = vsel %vm4173_vm5, %v4220_v62, %v8728_v31  ;;  %v8781_v14 = vsel %vm3533_vm11, %v3527_v35, %v3528_v15  ;;  %4241 = vmatpush.msra.mxu3 %v4130_v50  ;;  %v4128_v35 = vld [vmem:[#allocation3 + $0x18] sm:$0xff] }
 0x57c   : > { %v3739_v22 = vsel %vm3696_vm12, %v3707_v3, 0.0  ;;  %v3402_v2 = vpop.f32.mrf.mxu2  ;;  %v3592_v44 = vrot.slane %v8781_v14, 1 }
 0x57d   : > { %v3891_v32 = vmax.f32 %v3889_v4, %v3890_v57  ;;  %v3771_v30 = vadd.f32 %v3739_v22, %v9593_v55  ;;  %v3403_v25 = vadd.f32 %v3402_v2, %v3313_v61  ;;  %4242 = vmatpush.msra.mxu3 %v4129_v58  ;;  %v4260_v22 = vld [vmem:[#allocation3 + $0x140] sm:$0xff]  ;;  %v4328_v55 = vld [vmem:[#allocation3 + $0x1f8] sm:$0xff]  ;;  %v4327_v58 = vld [vmem:[#allocation3 + $0x1f0] sm:$0xff] }
 0x57e   : > { %v3603_v8 = vsel %vm2433_vm2, %v3591_v52, %v3592_v44  ;;  %v4125_v2 = vld [vmem:[#allocation3] sm:$0xff]  ;;  %4298 = vmatpush.msrb.mxu1 %v4260_v22 }
 0x57f   : > { %v3892_v31 = vrot.slane %v3891_v32, 2  ;;  %v3807_v5 = vadd.f32 %v8525_v11, %v3771_v30  ;;  %v3492_v45 = vadd.f32 %v3491_v9, %v3403_v25  ;;  %3680 = vrot.lane.b32.xlu1 %v3603_v8, %s5674_s22  ;;  %4243 = vmatpush.msra.mxu3 %v4128_v35  ;;  %v3493_v62 = vpop.f32.mrf.mxu0  ;;  %v4126_v9 = vld [vmem:[#allocation3 + $0x8] sm:$0xff]  ;;  %v3318_v8 = vpop.f32.mrf.mxu3 }
 0x580   : > { %v4326_v35 = vld [vmem:[#allocation3 + $0x1e8] sm:$0xff] }
 0x581   : > { %v3893_v34 = vmax.f32 %v3891_v32, %v3892_v31  ;;  %v3896_v61 = vmax.f32 %v3807_v5, %v3808_v63  ;;  %v3529_v0 = vrot.slane %v3492_v45, 3  ;;  %4244 = vmatpush.msra.mxu3 %v4127_v24 }
 0x583   : > { %v3894_v4 = vrot.slane %v3893_v34, 1  ;;  %v3897_v42 = vrot.slane %v3896_v61, 4  ;;  %v8792_v54 = vsel %vm3533_vm11, %v3528_v15, %v3529_v0  ;;  %4245 = vmatpush.msra.mxu3 %v4126_v9 }
 0x584   : > { %v3404_v38 = vpop.f32.mrf.mxu2  ;;  %v3593_v52 = vrot.slane %v8792_v54, 1 }
 0x585   : > { %v3895_v3 = vmax.f32 %v3893_v34, %v3894_v4  ;;  %v3898_v57 = vmax.f32 %v3896_v61, %v3897_v42  ;;  %v3405_v50 = vadd.f32 %v3404_v38, %v3315_v13  ;;  %4246 = vmatpush.msra.mxu3 %v4125_v2  ;;  %v4325_v42 = vld [vmem:[#allocation3 + $0x1e0] sm:$0xff] }
 0x586   : > { %v3602_v32 = vsel %vm2433_vm2, %v3592_v44, %v3593_v52 }
 0x587   : > { %v3981_v30 = vadd.f32 %v8665_v53, %v3895_v3  ;;  %v3899_v15 = vrot.slane %v3898_v57, 2  ;;  %v3494_v25 = vadd.f32 %v3493_v62, %v3405_v50  ;;  %3682 = vrot.lane.b32.xlu2 %v3602_v32, %s5674_s22  ;;  %4352 = vmatpush.msrb.mxu3 %v4328_v55  ;;  %v3496_v61 = vpop.f32.mrf.mxu0 }
 0x589   : > { %v4222_v63 = vrot.slane %v3981_v30, 4  ;;  %v3900_v31 = vmax.f32 %v3898_v57, %v3899_v15  ;;  %v3530_v5 = vrot.slane %v3494_v25, 3  ;;  %v3655_v45 = vpop.permute.xlu0 %3654  ;;  %4353 = vmatpush.msrb.mxu3 %v4327_v58  ;;  %v4324_v57 = vld [vmem:[#allocation3 + $0x1d8] sm:$0xff]  ;;  %v4322_v30 = vld [vmem:[#allocation3 + $0x1c8] sm:$0xff] }
 0x58a   : > { %v3709_v24 = vadd.f32 %v3655_v45, %v8479_v47  ;;  %v9594_v15 = vld [vmem:[#allocation42_spill] sm:$0xff] }
 0x58b   : > { %v3901_v13 = vrot.slane %v3900_v31, 1  ;;  %v8801_v44 = vsel %vm3533_vm11, %v3529_v0, %v3530_v5  ;;  %4354 = vmatpush.msrb.mxu3 %v4326_v35  ;;  %v4223_v34 = vsel %vm4176_vm6, %v4222_v63, %v4221_v27  ;;  %v4323_v0 = vld [vmem:[#allocation3 + $0x1d0] sm:$0xff]  ;;  %v4259_v58 = vld [vmem:[#allocation3 + $0x138] sm:$0xff] }
 0x58c   : > { %v3407_v62 = vpop.f32.mrf.mxu2  ;;  %v3594_v4 = vrot.slane %v8801_v44, 1  ;;  %v3741_v47 = vsel %vm3696_vm12, %v3709_v24, 0.0  ;;  %4299 = vmatpush.msrb.mxu1 %v4259_v58  ;;  %v4317_v58 = vld [vmem:[#allocation3 + $0x1a0] sm:$0xff] }
 0x58d   : > { %v3902_v9 = vmax.f32 %v3900_v31, %v3901_v13  ;;  %v3408_v38 = vadd.f32 %v3407_v62, %v3318_v8  ;;  %4355 = vmatpush.msrb.mxu3 %v4325_v42  ;;  %v3320_v31 = vpop.f32.mrf.mxu3  ;;  %v9595_v13 = vld [vmem:[#allocation108_spill] sm:$0xff]  ;;  %v4320_v42 = vld [vmem:[#allocation3 + $0x1b8] sm:$0xff] }
 0x58e   : > { %v3601_v3 = vsel %vm2433_vm2, %v3593_v52, %v3594_v4  ;;  %v3773_v52 = vadd.f32 %v3741_v47, %v9594_v15  ;;  %v4318_v47 = vld [vmem:[#allocation3 + $0x1a8] sm:$0xff] }
 0x58f   : > { %v3497_v50 = vadd.f32 %v3496_v61, %v3408_v38  ;;  %3684 = vrot.lane.b32.xlu0 %v3601_v3, %s5674_s22  ;;  %4356 = vmatpush.msrb.mxu3 %v4324_v57  ;;  %v3982_v27 = vadd.f32 %v8665_v53, %v3902_v9  ;;  %v4319_v3 = vld [vmem:[#allocation3 + $0x1b0] sm:$0xff]  ;;  %v3659_v57 = vpop.permute.xlu2 %3658 }
 0x591   : > { %v3531_v22 = vrot.slane %v3497_v50, 3  ;;  %v3657_v2 = vpop.permute.xlu1 %3656  ;;  %4357 = vmatpush.msrb.mxu3 %v4323_v0  ;;  %v4224_v32 = vrot.slane %v3982_v27, 3 }
 0x592   : > { %v3710_v55 = vadd.f32 %v3657_v2, %v8499_v26  ;;  %v4321_v26 = vld [vmem:[#allocation3 + $0x1c0] sm:$0xff] }
 0x593   : > { %v8816_v25 = vsel %vm3533_vm11, %v3530_v5, %v3531_v22  ;;  %4358 = vmatpush.msrb.mxu3 %v4322_v30  ;;  %v8819_v63 = vsel %vm4179_vm7, %v4224_v32, %v4223_v34  ;;  %v3498_v5 = vpop.f32.mrf.mxu0  ;;  %v3809_v34 = vadd.f32 %v8525_v11, %v3773_v52  ;;  %v3711_v30 = vadd.f32 %v3659_v57, %v8520_v20 }
 0x594   : > { %v3742_v45 = vsel %vm3696_vm12, %v3710_v55, 0.0  ;;  %v3409_v8 = vpop.f32.mrf.mxu2  ;;  %v3595_v35 = vrot.slane %v8816_v25, 1 }
 0x595   : > { %v3774_v61 = vadd.f32 %v3742_v45, %v9595_v13  ;;  %v3410_v24 = vadd.f32 %v3409_v8, %v3320_v31  ;;  %4359 = vmatpush.msrb.mxu3 %v4321_v26  ;;  %v9598_v45 = vrot.slane %v8260_v49, 1  ;;  %v4316_v13 = vld [vmem:[#allocation3 + $0x198] sm:$0xff] }
 0x596   : > { %v3600_v62 = vsel %vm2433_vm2, %v3594_v4, %v3595_v35  ;;  %v9596_v4 = vld [vmem:[#allocation109_spill] sm:$0xff] }
 0x597   : > { %v3810_v9 = vadd.f32 %v8530_v33, %v3774_v61  ;;  %v3499_v38 = vadd.f32 %v3498_v5, %v3410_v24  ;;  %3686 = vrot.lane.b32.xlu1 %v3600_v62, %s5674_s22  ;;  %4360 = vmatpush.msrb.mxu3 %v4320_v42  ;;  %v9597_v32 = vrot.slane %v9596_v4, 3  ;;  %v3743_v61 = vsel %vm3696_vm12, %v3711_v30, 0.0  ;;  %v4315_v24 = vld [vmem:[#allocation3 + $0x190] sm:$0xff] }
 0x599   : > { %v3903_v50 = vmax.f32 %v3809_v34, %v3810_v9  ;;  %v3532_v27 = vrot.slane %v3499_v38, 3  ;;  %4361 = vmatpush.msrb.mxu3 %v4319_v3  ;;  %v4313_v9 = vld [vmem:[#allocation3 + $0x180] sm:$0xff]  ;;  %v9599_v3 = vld [vmem:[#allocation46_spill] sm:$0xff] }
 0x59b   : > { %v3904_v0 = vrot.slane %v3903_v50, 4  ;;  %v8832_v2 = vsel %vm3533_vm11, %v3531_v22, %v3532_v27  ;;  %v8838_v55 = vsel %vm3533_vm11, %v3532_v27, %v9597_v32  ;;  %4362 = vmatpush.msrb.mxu3 %v4318_v47  ;;  %v3663_v47 = vpop.permute.xlu2 %3662 }
 0x59c   : > { %v3596_v15 = vrot.slane %v8832_v2, 1  ;;  %v3597_v52 = vrot.slane %v8838_v55, 1  ;;  %v3713_v30 = vadd.f32 %v3663_v47, %v8567_v29  ;;  %v9602_v47 = vld [vmem:[#allocation51_spill] sm:$0xff] }
 0x59d   : > { %v3905_v31 = vmax.f32 %v3903_v50, %v3904_v0  ;;  %4363 = vmatpush.msrb.mxu3 %v4317_v58 }
 0x59e   : > { %v3598_v22 = vsel %vm2433_vm2, %v3596_v15, %v3597_v52  ;;  %v3629_v8 = vsel %vm2433_vm2, %v3597_v52, %v9598_v45  ;;  %v3599_v26 = vsel %vm2433_vm2, %v3595_v35, %v3596_v15  ;;  %v3775_v35 = vadd.f32 %v3743_v61, %v8433_v10 }
 0x59f   : > { %v3906_v20 = vrot.slane %v3905_v31, 2  ;;  %3690 = vrot.lane.b32.xlu0 %v3598_v22, %s5674_s22  ;;  %3692 = vrot.lane.b32.xlu1 %v3629_v8, %s5674_s22  ;;  %v3745_v58 = vsel %vm3696_vm12, %v3713_v30, 0.0  ;;  %v4258_v8 = vld [vmem:[#allocation3 + $0x130] sm:$0xff] }
 0x5a0   : > { %3688 = vrot.lane.b32.xlu2 %v3599_v26, %s5674_s22  ;;  %4364 = vmatpush.msrb.mxu3 %v4316_v13  ;;  %v3811_v50 = vadd.f32 %v8525_v11, %v3775_v35  ;;  %v4257_v26 = vld [vmem:[#allocation3 + $0x128] sm:$0xff]  ;;  %s5333_s22 = sshll.u32 %s5741_s9, 3  ;;  %s4380_s9 = scalar_lea.sflag [#allocation5], %s5930_s21 }
 0x5a1   : > { %v3907_v49 = vmax.f32 %v3905_v31, %v3906_v20  ;;  %v3661_v5 = vpop.permute.xlu0 %3660  ;;  %4300 = vmatpush.msrb.mxu1 %v4258_v8  ;;  %v9600_v20 = vld [vmem:[#allocation145_spill] sm:$0xff]  ;;  %s4390_s18 = scalar_lea.hbm %s9019_s8, %s5333_s22 }
 0x5a2   : > { %v3712_v62 = vadd.f32 %v3661_v5, %v8552_v21  ;;  %4365 = vmatpush.msrb.mxu3 %v4315_v24  ;;  %v3777_v61 = vadd.f32 %v3745_v58, %v9600_v20  ;;  %s4394_s23 = sshll.u32 %s4390_s18, 4  ;;  %s4395_s23 = int_to_ptr.hbm [resolvable:$true] %s4394_s23 }
 0x5a3   : > { %v3908_v42 = vrot.slane %v3907_v49, 1  ;;  %4301 = vmatpush.msrb.mxu1 %v4257_v26  ;;  %s5617_s19 = sshra.s32 %s4395_s23, 4  ;;  %s5618_s19 = int_to_ptr.hbm [resolvable:$true] %s5617_s19 }
 0x5a4   : > { %v3744_v34 = vsel %vm3696_vm12, %v3712_v62, 0.0  ;;  %4366 = vmatpush.msrb.mxu3 %v4314_v17  ;;  %v3813_v17 = vadd.f32 %v8525_v11, %v3777_v61  ;;  %s5619_s20 = scalar_lea.hbm %s5618_s19, 8  ;;  %p5624_p5 = scmp.lt.s32.totalorder %s5618_s19, %s9019_s8 }
 0x5a5   : > { %v3909_v38 = vmax.f32 %v3907_v49, %v3908_v42  ;;  %v3776_v57 = vadd.f32 %v3744_v34, %v9599_v3  ;;  %v9601_v49 = vld [vmem:[#allocation111_spill] sm:$0xff]  ;;  %p5620_p2 = scmp.ne.s32.totalorder %s5618_s19, %s5619_s20  ;;  %p5625_p7 = scmp.lt.s32.totalorder %s5623_s25, %s5619_s20 }
 0x5a6   : > { %4367 = vmatpush.msrb.mxu3 %v4313_v9 }
 0x5a7   : > { %v3812_v27 = vadd.f32 %v8530_v33, %v3776_v57  ;;  %v3983_v21 = vadd.f32 %v8665_v53, %v3909_v38  ;;  %p5621_p3 = pnand %p5620_p2, %p5763_p6  ;;  %p5626_p8 = por %p5625_p7, %p5624_p5 }
 0x5a9   : > { %v3910_v0 = vmax.f32 %v3811_v50, %v3812_v27  ;;  %v4226_v4 = vrot.slane %v3983_v21, 2  ;;  %v3669_v22 = vpop.permute.xlu2 %3668  ;;  %p5622_p4 = pneg %p5621_p3 }
 0x5ab   : > { %v3911_v10 = vrot.slane %v3910_v0, 4  ;;  %v4227_v32 = vsel %vm4182_vm8, %v4226_v4, %v8819_v63  ;;  %v3716_v63 = vadd.f32 %v3669_v22, %v8618_v39  ;;  %p5627_p9 = pnand %p5626_p8, %p5622_p4 }
 0x5ad   : > { %v3912_v15 = vmax.f32 %v3910_v0, %v3911_v10 }
 0x5af   : > { %v3913_v52 = vrot.slane %v3912_v15, 2 }
 0x5b1   : > { %v3914_v31 = vmax.f32 %v3912_v15, %v3913_v52  ;;  %v3665_v45 = vpop.permute.xlu0 %3664 }
 0x5b2   : > { %v3714_v13 = vadd.f32 %v3665_v45, %v8582_v48  ;;  %v3748_v48 = vsel %vm3696_vm12, %v3716_v63, 0.0 }
 0x5b3   : > { %v3915_v24 = vrot.slane %v3914_v31, 1  ;;  %v3780_v3 = vadd.f32 %v3748_v48, %v8542_v37 }
 0x5b4   : > { %v3746_v29 = vsel %vm3696_vm12, %v3714_v13, 0.0 }
 0x5b5   : > { %v3778_v5 = vadd.f32 %v3746_v29, %v9601_v49  ;;  %v3916_v62 = vmax.f32 %v3914_v31, %v3915_v24  ;;  %v3816_v4 = vadd.f32 %v8530_v33, %v3780_v3  ;;  %v4256_v49 = vld [vmem:[#allocation3 + $0x120] sm:$0xff] }
 0x5b6   : > { %4302 = vmatpush.msrb.mxu1 %v4256_v49 }
 0x5b7   : > { %v3814_v35 = vadd.f32 %v8530_v33, %v3778_v5  ;;  %v3984_v42 = vadd.f32 %v8665_v53, %v3916_v62  ;;  %v4255_v5 = vld [vmem:[#allocation3 + $0x118] sm:$0xff] }
 0x5b8   : > { %4303 = vmatpush.msrb.mxu1 %v4255_v5 }
 0x5b9   : > { %v3917_v34 = vmax.f32 %v3813_v17, %v3814_v35  ;;  %v3667_v9 = vpop.permute.xlu1 %3666  ;;  %v4228_v38 = vrot.slane %v3984_v42, 1  ;;  %v9604_v35 = vld [vmem:[#allocation147_spill] sm:$0xff] }
 0x5ba   : > { %v3715_v39 = vadd.f32 %v3667_v9, %v8596_v59  ;;  %v9603_v59 = vld [vmem:[#allocation101_spill] sm:$0xff] }
 0x5bb   : > { %v3918_v57 = vrot.slane %v3917_v34, 4  ;;  %v4229_v50 = vsel %vm4185_vm9, %v4228_v38, %v4227_v32  ;;  %v8904_v38 = vld [vmem:[%s9016_s5] sm:$0xff] }
 0x5bc   : > { %v3747_v27 = vsel %vm3696_vm12, %v3715_v39, 0.0  ;;  %4247 = vmatmul.f32.vlgmr.msra.gmra.mxu3 %v4229_v50 }
 0x5bd   : > { %v3919_v21 = vmax.f32 %v3917_v34, %v3918_v57  ;;  %v3779_v0 = vadd.f32 %v3747_v27, %v9602_v47  ;;  %v9605_v34 = vld [vmem:[#allocation35_spill] sm:$0xff] }
 0x5bf   : > { %v3815_v10 = vadd.f32 %v8525_v11, %v3779_v0  ;;  %v3920_v30 = vrot.slane %v3919_v21, 2 }
 0x5c1   : > { %v3924_v15 = vmax.f32 %v3815_v10, %v3816_v4  ;;  %v3921_v37 = vmax.f32 %v3919_v21, %v3920_v30 }
 0x5c3   : > { %v3925_v52 = vrot.slane %v3924_v15, 4  ;;  %v3922_v32 = vrot.slane %v3921_v37, 1 }
 0x5c4   : > { %4368 = vmatmul.f32.vlgmr.msrb.gmra.mxu3 %v9603_v59 }
 0x5c5   : > { %v3926_v58 = vmax.f32 %v3924_v15, %v3925_v52  ;;  %v3923_v26 = vmax.f32 %v3921_v37, %v3922_v32 }
 0x5c7   : > { %v3927_v31 = vrot.slane %v3926_v58, 2  ;;  %v3985_v11 = vadd.f32 %v8665_v53, %v3923_v26 }
 0x5c9   : > { %v3928_v22 = vmax.f32 %v3926_v58, %v3927_v31  ;;  %v3671_v8 = vpop.permute.xlu0 %3670  ;;  %v3677_v63 = vpop.permute.xlu2 %3676 }
 0x5ca   : > { %v3717_v20 = vadd.f32 %v3671_v8, %v8638_v43  ;;  %v3720_v43 = vadd.f32 %v3677_v63, %v8704_v6  ;;  %v4254_v8 = vld [vmem:[#allocation3 + $0x110] sm:$0xff] }
 0x5cb   : > { %v3929_v45 = vrot.slane %v3928_v22, 1  ;;  %4304 = vmatpush.msrb.mxu1 %v4254_v8 }
 0x5cc   : > { %v3749_v24 = vsel %vm3696_vm12, %v3717_v20, 0.0  ;;  %v3752_v3 = vsel %vm3696_vm12, %v3720_v43, 0.0 }
 0x5cd   : > { %v3930_v13 = vmax.f32 %v3928_v22, %v3929_v45  ;;  %v3781_v42 = vadd.f32 %v3749_v24, %v9604_v35  ;;  %v3784_v21 = vadd.f32 %v3752_v3, %v8605_v16 }
 0x5cf   : > { %v3986_v33 = vadd.f32 %v8665_v53, %v3930_v13  ;;  %v3817_v39 = vadd.f32 %v8904_v38, %v3781_v42 }
 0x5d1   : > { %v4276_v61 = vrot.slane %v3986_v33, 7  ;;  %v3673_v29 = vpop.permute.xlu1 %3672 }
 0x5d2   : > { %v3718_v17 = vadd.f32 %v3673_v29, %v8657_v41  ;;  %v8910_v41 = vld [vmem:[%s9016_s5 + $0x10] sm:$0xff] }
 0x5d3   : > { %v4277_v62 = vsel %vm4167_vm3, %v4276_v61, %v3985_v11  ;;  %v3820_v30 = vadd.f32 %v8910_v41, %v3784_v21  ;;  %v4252_v21 = vld [vmem:[#allocation3 + $0x100] sm:$0xff] }
 0x5d4   : > { %v3750_v48 = vsel %vm3696_vm12, %v3718_v17, 0.0 }
 0x5d5   : > { %v3782_v9 = vadd.f32 %v3750_v48, %v9605_v34 }
 0x5d7   : > { %v3818_v6 = vadd.f32 %v8910_v41, %v3782_v9 }
 0x5d9   : > { %v3931_v57 = vmax.f32 %v3817_v39, %v3818_v6  ;;  %v3675_v50 = vpop.permute.xlu1 %3674  ;;  %v4253_v39 = vld [vmem:[#allocation3 + $0x108] sm:$0xff] }
 0x5da   : > { %v3719_v27 = vadd.f32 %v3675_v50, %v8686_v1  ;;  %4305 = vmatpush.msrb.mxu1 %v4253_v39 }
 0x5db   : > { %v3932_v47 = vrot.slane %v3931_v57, 4 }
 0x5dc   : > { %v3751_v0 = vsel %vm3696_vm12, %v3719_v27, 0.0  ;;  %4306 = vmatpush.msrb.mxu1 %v4252_v21 }
 0x5dd   : > { %v3933_v4 = vmax.f32 %v3931_v57, %v3932_v47  ;;  %v3783_v10 = vadd.f32 %v3751_v0, %v8590_v18 }
 0x5df   : > { %v3934_v15 = vrot.slane %v3933_v4, 2  ;;  %v3819_v52 = vadd.f32 %v8904_v38, %v3783_v10 }
 0x5e1   : > { %v3935_v59 = vmax.f32 %v3933_v4, %v3934_v15  ;;  %v3938_v37 = vmax.f32 %v3819_v52, %v3820_v30  ;;  %v3683_v43 = vpop.permute.xlu2 %3682 }
 0x5e2   : > { %v3723_v34 = vadd.f32 %v3683_v43, %v8781_v14 }
 0x5e3   : > { %v3936_v58 = vrot.slane %v3935_v59, 1  ;;  %v3939_v31 = vrot.slane %v3938_v37, 4 }
 0x5e5   : > { %v3937_v32 = vmax.f32 %v3935_v59, %v3936_v58  ;;  %v3940_v1 = vmax.f32 %v3938_v37, %v3939_v31 }
 0x5e7   : > { %v3987_v16 = vadd.f32 %v8665_v53, %v3937_v32  ;;  %v3941_v22 = vrot.slane %v3940_v1, 2 }
 0x5e9   : > { %v3679_v45 = vpop.permute.xlu0 %3678  ;;  %v4278_v26 = vrot.slane %v3987_v16, 6  ;;  %v3942_v13 = vmax.f32 %v3940_v1, %v3941_v22 }
 0x5ea   : > { %v3721_v20 = vadd.f32 %v3679_v45, %v8725_v51 }
 0x5eb   : > { %v3943_v18 = vrot.slane %v3942_v13, 1  ;;  %v4279_v33 = vsel %vm4170_vm4, %v4278_v26, %v4277_v62 }
 0x5ec   : > { %v3753_v24 = vsel %vm3696_vm12, %v3721_v20, 0.0 }
 0x5ed   : > { %v3944_v11 = vmax.f32 %v3942_v13, %v3943_v18  ;;  %v3785_v5 = vadd.f32 %v3753_v24, %v8630_v7  ;;  %v3755_v7 = vsel %vm3696_vm12, %v3723_v34, 0.0 }
 0x5ee   : > { %v3787_v27 = vadd.f32 %v3755_v7, %v8674_v36 }
 0x5ef   : > { %v3988_v61 = vadd.f32 %v8665_v53, %v3944_v11  ;;  %v3821_v62 = vadd.f32 %v8904_v38, %v3785_v5 }
 0x5f0   : > { %v3823_v30 = vadd.f32 %v8904_v38, %v3787_v27 }
 0x5f1   : > { %v3681_v63 = vpop.permute.xlu1 %3680  ;;  %v4280_v29 = vrot.slane %v3988_v61, 5 }
 0x5f2   : > { %v3722_v49 = vadd.f32 %v3681_v63, %v8747_v46 }
 0x5f3   : > { %v4281_v35 = vsel %vm4173_vm5, %v4280_v29, %v4279_v33 }
 0x5f4   : > { %v3754_v17 = vsel %vm3696_vm12, %v3722_v49, 0.0 }
 0x5f5   : > { %v3786_v51 = vadd.f32 %v3754_v17, %v8647_v19 }
 0x5f7   : > { %v3822_v42 = vadd.f32 %v8910_v41, %v3786_v51 }
 0x5f9   : > { %v3945_v48 = vmax.f32 %v3821_v62, %v3822_v42 }
 0x5fa   : > { %v3689_v3 = vpop.permute.xlu2 %3688 }
 0x5fb   : > { %v3946_v9 = vrot.slane %v3945_v48, 4  ;;  %v3726_v0 = vadd.f32 %v3689_v3, %v8816_v25 }
 0x5fd   : > { %v3947_v46 = vmax.f32 %v3945_v48, %v3946_v9  ;;  %v3758_v36 = vsel %vm3696_vm12, %v3726_v0, 0.0 }
 0x5fe   : > { %v3790_v58 = vadd.f32 %v3758_v36, %v8736_v12 }
 0x5ff   : > { %v3948_v6 = vrot.slane %v3947_v46, 2 }
 0x600   : > { %v3826_v22 = vadd.f32 %v8910_v41, %v3790_v58 }
 0x601   : > { %v3685_v57 = vpop.permute.xlu0 %3684  ;;  %v3949_v50 = vmax.f32 %v3947_v46, %v3948_v6 }
 0x602   : > { %v3724_v19 = vadd.f32 %v3685_v57, %v8792_v54  ;;  %v4205_v57 = vpop.f32.mrf.mxu3 }
 0x603   : > { %v3950_v47 = vrot.slane %v3949_v50, 1 }
 0x604   : > { %v3756_v14 = vsel %vm3696_vm12, %v3724_v19, 0.0 }
 0x605   : > { %v3788_v4 = vadd.f32 %v3756_v14, %v8692_v28  ;;  %v3951_v10 = vmax.f32 %v3949_v50, %v3950_v47 }
 0x607   : > { %v3824_v15 = vadd.f32 %v8910_v41, %v3788_v4  ;;  %v3989_v52 = vadd.f32 %v8665_v53, %v3951_v10 }
 0x609   : > { %v3952_v54 = vmax.f32 %v3823_v30, %v3824_v15  ;;  %v3687_v59 = vpop.permute.xlu1 %3686  ;;  %v4282_v37 = vrot.slane %v3989_v52, 4 }
 0x60a   : > { %v3725_v25 = vadd.f32 %v3687_v59, %v8801_v44 }
 0x60b   : > { %v3953_v31 = vrot.slane %v3952_v54, 4  ;;  %v4283_v32 = vsel %vm4176_vm6, %v4282_v37, %v4281_v35 }
 0x60c   : > { %v3757_v28 = vsel %vm3696_vm12, %v3725_v25, 0.0 }
 0x60d   : > { %v3954_v1 = vmax.f32 %v3952_v54, %v3953_v31  ;;  %v3789_v16 = vadd.f32 %v3757_v28, %v8715_v60 }
 0x60f   : > { %v3955_v45 = vrot.slane %v3954_v1, 2  ;;  %v3825_v8 = vadd.f32 %v8904_v38, %v3789_v16 }
 0x611   : > { %v3956_v26 = vmax.f32 %v3954_v1, %v3955_v45  ;;  %v3959_v13 = vmax.f32 %v3825_v8, %v3826_v22  ;;  %v3691_v18 = vpop.permute.xlu0 %3690  ;;  %v3693_v44 = vpop.permute.xlu1 %3692 }
 0x612   : > { %v3727_v12 = vadd.f32 %v3691_v18, %v8832_v2  ;;  %v3728_v20 = vadd.f32 %v3693_v44, %v8838_v55 }
 0x613   : > { %v3957_v33 = vrot.slane %v3956_v26, 1  ;;  %v3960_v11 = vrot.slane %v3959_v13, 4 }
 0x614   : > { %v3759_v61 = vsel %vm3696_vm12, %v3727_v12, 0.0  ;;  %v3760_v60 = vsel %vm3696_vm12, %v3728_v20, 0.0 }
 0x615   : > { %v3958_v24 = vmax.f32 %v3956_v26, %v3957_v33  ;;  %v3961_v63 = vmax.f32 %v3959_v13, %v3960_v11  ;;  %v3791_v29 = vadd.f32 %v3759_v61, %v8762_v23  ;;  %v3792_v49 = vadd.f32 %v3760_v60, %v8765_v56 }
 0x617   : > { %v3962_v5 = vrot.slane %v3961_v63, 2  ;;  %v3827_v17 = vadd.f32 %v8904_v38, %v3791_v29  ;;  %v3828_v2 = vadd.f32 %v8910_v41, %v3792_v49  ;;  %v3990_v55 = vadd.f32 %v8665_v53, %v3958_v24 }
 0x619   : > { %v3963_v35 = vmax.f32 %v3961_v63, %v3962_v5  ;;  %v3966_v51 = vmax.f32 %v3827_v17, %v3828_v2  ;;  %v4284_v62 = vrot.slane %v3990_v55, 3 }
 0x61b   : > { %v3964_v42 = vrot.slane %v3963_v35, 1  ;;  %v3967_v43 = vrot.slane %v3966_v51, 4  ;;  %v4285_v40 = vsel %vm4179_vm7, %v4284_v62, %v4283_v32 }
 0x61d   : > { %v3965_v48 = vmax.f32 %v3963_v35, %v3964_v42  ;;  %v3968_v23 = vmax.f32 %v3966_v51, %v3967_v43 }
 0x61f   : > { %v3969_v34 = vrot.slane %v3968_v23, 2  ;;  %v3991_v56 = vadd.f32 %v8665_v53, %v3965_v48 }
 0x621   : > { %v3970_v9 = vmax.f32 %v3968_v23, %v3969_v34  ;;  %v4286_v38 = vrot.slane %v3991_v56, 2 }
 0x623   : > { %v3971_v39 = vrot.slane %v3970_v9, 1  ;;  %v4287_v41 = vsel %vm4182_vm8, %v4286_v38, %v4285_v40 }
 0x625   : > { %v3972_v46 = vmax.f32 %v3970_v9, %v3971_v39 }
 0x627   : > { %v3992_v7 = vadd.f32 %v8665_v53, %v3972_v46  ;;  %v5567_v53 = vld [vmem:[%s9018_s7] ss:$0 sm:$0xff] }
 0x629   : > { %v4288_v6 = vrot.slane %v3992_v7, 1 }
 0x62b   : > { %v4289_v3 = vsel %vm4185_vm9, %v4288_v6, %v4287_v41 }
 0x62c   : > { %4307 = vmatmul.f32.vlgmr.msrb.gmra.mxu1 %v4289_v3 }
 0x63f   : > { %v4248_v50 = vpop.f32.mrf.mxu3 }
 0x640   : > { %v4249_v19 = vadd.f32 %v4248_v50, %v4205_v57 }
 0x647   : > { %v4369_v47 = vpop.f32.mrf.mxu3 }
 0x6a9   : > { %v4308_v27 = vpop.f32.mrf.mxu1 }
 0x6aa   : > { %v4311_v21 = vadd.f32 %v4308_v27, %v4249_v19 }
 0x6ac   : > { %v4372_v0 = vadd.f32 %v4369_v47, %v4311_v21 }
 0x6ae   : > { %v4377_v14 = vadd.f32 %v5567_v53, %v4372_v0 }
 0x6b0   : > { %4378 = vst [vmem:[%s477_s12] sm:$0xff] %v4377_v14 }
 0x6b1   : > { %5630 = shalt.err (!%p5627_p9)
}
 0x6b2   : > { %5516 = dma.vmem_to_hbm [thread:$0]  (%p5763_p6), %s4393_s13, 128, %s4395_s23, %s4380_s9  }
 0x6b3 PF: > { %s4406_s21 = sand.u32 1, %s5657_s27   ;;  %p5523_p11 = pnand %p4479_p1, %p5769_p10 }
 0x6b4   : > { %s4407_s18 = scalar_lea.sflag [#allocation5], %s4406_s21 }
 0x6b5   : > { %p5524_p12 = pneg %p5523_p11 }
 0x6b7   : > { %5652 = dma.done.wait (%p5524_p12), %s4407_s18, 128  }
 0x6b8   : > { %5654 = vsyncadd (%p5524_p12), %s4407_s18, 4294967168  ;;  %p19_p13 = scmp.ge.s32.totalorder %s5745_s11, 4   ;;  %s9606_s27 = smov %s5661_s28 }
 0x6b9   : > { %s9607_s28 = smov %s5665_s29  ;;  %s9608_s29 = smov %s5757_s14 }
 0x6ba   : > { %s9609_s30 = smov %s5745_s11  ;;  %21 = sbr.rel (!%p19_p13) target bundleno = 4 (0x4), region = 133 }
 0x6bf   :  { %4413 = vsyncpa [#allocation4], 1 }
 0x6c0   :  { %4415 = vsyncpa [#allocation4 + $0x1], 1 }
 0x6c1   :  { %4416 = vsyncpa [#allocation5], 1 }
 0x6c2   :  { %4418 = vsyncpa [#allocation5 + $0x1], 1 }

</bundles_post_ra>
